<compile_context>
chip_gen: v7x
topology: tpu7x:2x2x1
jax: 0.10.0
libtpu: 0.0.40
codegen_flags: <defaults>
</compile_context>

<pallas_src>
import functools

import jax
import jax.numpy as jnp
from jax import lax
from jax.experimental import pallas as pl
from jax.experimental.pallas import tpu as pltpu


# ---------------------------------------------------------------------------
# Fully fused DoubleConv kernel (whole batch per invocation)
# ---------------------------------------------------------------------------
def _down_fused_kernel(xp_ref, g1_ref, b1_ref, g2_ref, b2_ref, w1_ref, w2_ref,
                       o_ref, pad1_ref, pad2_ref, *, eps):
    # xp_ref : (N, Hp, Wp, Cin)        pooled NHWC input (whole batch in VMEM)
    # g*/b*  : (1, Cout)               BatchNorm affine parameters
    # w1_ref : (3, 3, Cin, Cout)       w2_ref : (3, 3, Cout, Cout)
    # o_ref  : (N, Cout, Hp*Wp)        NCHW output (free row-major reshape outside)
    # pad1_ref: (N, Hp+2, Wp+2, Cin)   pad2_ref: (N, Hp+2, Wp+2, Cout)  scratch
    N, Hp, Wp, Cin = xp_ref.shape
    Cout = w1_ref.shape[3]
    HW = Hp * Wp
    inv_count = 1.0 / float(N * HW)

    def conv3x3(pad_img, w_ref, cin):
        # pad_img: (Hp+2, Wp+2, cin) zero-padded image; 9-tap conv as
        # (HW, cin) x (cin, Cout) matmuls accumulated in f32 on the MXU.
        acc = jnp.zeros((HW, Cout), jnp.float32)
        for dy in range(3):
            for dx in range(3):
                patch = pad_img[dy:dy + Hp, dx:dx + Wp, :].reshape(HW, cin)
                acc = acc + jnp.dot(patch, w_ref[dy, dx],
                                    preferred_element_type=jnp.float32)
        return acc

    def bn_coeffs(s, ss, g_ref, b_ref):
        mean = s * inv_count
        var = jnp.maximum(ss * inv_count - mean * mean, 0.0)  # clamp fp cancel
        scale = g_ref[...] * lax.rsqrt(var + eps)              # EUP rsqrt
        shift = b_ref[...] - mean * scale
        return scale, shift

    # ---- conv1 over the whole batch; batch statistics accumulated on the fly
    pad1_ref[...] = jnp.zeros_like(pad1_ref)   # border stays zero for every n
    y1 = []
    s1 = jnp.zeros((1, Cout), jnp.float32)
    ss1 = jnp.zeros((1, Cout), jnp.float32)
    for n in range(N):
        pad1_ref[n, 1:Hp + 1, 1:Wp + 1, :] = xp_ref[n]
        acc = conv3x3(pad1_ref[n], w1_ref, Cin)          # (HW, Cout), pre-BN
        y1.append(acc)
        s1 = s1 + jnp.sum(acc, axis=0, keepdims=True)
        ss1 = ss1 + jnp.sum(acc * acc, axis=0, keepdims=True)
    sc1, sh1 = bn_coeffs(s1, ss1, g1_ref, b1_ref)

    # ---- BN1 + ReLU fused into conv2's input; conv2 + batch statistics ----
    pad2_ref[...] = jnp.zeros_like(pad2_ref)
    y2 = []
    s2 = jnp.zeros((1, Cout), jnp.float32)
    ss2 = jnp.zeros((1, Cout), jnp.float32)
    for n in range(N):
        a1 = jnp.maximum(y1[n] * sc1 + sh1, 0.0)         # (HW, Cout)
        pad2_ref[n, 1:Hp + 1, 1:Wp + 1, :] = a1.reshape(Hp, Wp, Cout)
        acc = conv3x3(pad2_ref[n], w2_ref, Cout)
        y2.append(acc)
        s2 = s2 + jnp.sum(acc, axis=0, keepdims=True)
        ss2 = ss2 + jnp.sum(acc * acc, axis=0, keepdims=True)
    sc2, sh2 = bn_coeffs(s2, ss2, g2_ref, b2_ref)

    # ---- BN2 + ReLU fused with the NCHW writeback --------------------------
    for n in range(N):
        a2 = jnp.maximum(y2[n] * sc2 + sh2, 0.0)         # (HW, Cout)
        o_ref[n] = jnp.transpose(a2, (1, 0))             # (Cout, HW)


def _double_conv_fused(xp, w1, g1, b1, w2, g2, b2, *, eps=1e-5):
    # xp: (N, Hp, Wp, Cin) f32 pooled NHWC input.
    N, Hp, Wp, Cin = xp.shape
    Cout = w1.shape[3]
    kernel = functools.partial(_down_fused_kernel, eps=eps)
    out = pl.pallas_call(
        kernel,
        out_shape=jax.ShapeDtypeStruct((N, Cout, Hp * Wp), jnp.float32),
        grid=(1,),
        in_specs=[
            pl.BlockSpec((N, Hp, Wp, Cin), lambda i: (0, 0, 0, 0)),
            pl.BlockSpec((1, Cout), lambda i: (0, 0)),
            pl.BlockSpec((1, Cout), lambda i: (0, 0)),
            pl.BlockSpec((1, Cout), lambda i: (0, 0)),
            pl.BlockSpec((1, Cout), lambda i: (0, 0)),
            pl.BlockSpec((3, 3, Cin, Cout), lambda i: (0, 0, 0, 0)),
            pl.BlockSpec((3, 3, Cout, Cout), lambda i: (0, 0, 0, 0)),
        ],
        out_specs=pl.BlockSpec((N, Cout, Hp * Wp), lambda i: (0, 0, 0)),
        scratch_shapes=[
            pltpu.VMEM((N, Hp + 2, Wp + 2, Cin), jnp.float32),
            pltpu.VMEM((N, Hp + 2, Wp + 2, Cout), jnp.float32),
        ],
        compiler_params=pltpu.CompilerParams(
            dimension_semantics=("arbitrary",)),
    )(xp, g1.reshape(1, Cout), b1.reshape(1, Cout),
      g2.reshape(1, Cout), b2.reshape(1, Cout), w1, w2)
    return out.reshape(N, Cout, Hp, Wp)   # free row-major reshape


# ---------------------------------------------------------------------------
# Glue
# ---------------------------------------------------------------------------
def _maxpool2x2_to_nhwc(x_nchw):
    # MaxPool2d(k=2, s=2) + NCHW->NHWC; XLA fuses this into one pass over x.
    x = x_nchw.astype(jnp.float32)
    p = jnp.maximum(jnp.maximum(x[:, :, 0::2, 0::2], x[:, :, 0::2, 1::2]),
                    jnp.maximum(x[:, :, 1::2, 0::2], x[:, :, 1::2, 1::2]))
    return jnp.transpose(p, (0, 2, 3, 1))


def down_forward(x_nchw, params):
    xp = _maxpool2x2_to_nhwc(x_nchw)
    return _double_conv_fused(
        xp,
        params["conv1_w"], params["bn1_g"], params["bn1_b"],
        params["conv2_w"], params["bn2_g"], params["bn2_b"])


# ---------------------------------------------------------------------------
# Pure-jnp reference (same math, independent formulation)
# ---------------------------------------------------------------------------
def _conv3x3_ref(x, w):
    N, H, W, Cin = x.shape
    xpad = jnp.pad(x, ((0, 0), (1, 1), (1, 1), (0, 0)))
    out = jnp.zeros((N, H, W, w.shape[3]), jnp.float32)
    for dy in range(3):
        for dx in range(3):
            out = out + jnp.einsum("nhwc,cd->nhwd",
                                   xpad[:, dy:dy + H, dx:dx + W, :], w[dy, dx])
    return out


def _bn_relu_ref(y, gamma, beta, eps=1e-5):
    mean = jnp.mean(y, axis=(0, 1, 2))
    var = jnp.mean((y - mean) ** 2, axis=(0, 1, 2))
    return jnp.maximum((y - mean) / jnp.sqrt(var + eps) * gamma + beta, 0.0)


def down_forward_ref(x_nchw, params):
    xp = _maxpool2x2_to_nhwc(x_nchw)
    a1 = _bn_relu_ref(_conv3x3_ref(xp, params["conv1_w"]),
                      params["bn1_g"], params["bn1_b"])
    a2 = _bn_relu_ref(_conv3x3_ref(a1, params["conv2_w"]),
                      params["bn2_g"], params["bn2_b"])
    return jnp.transpose(a2, (0, 3, 1, 2))


# ---------------------------------------------------------------------------
# Deterministic params + demo
# ---------------------------------------------------------------------------
def init_params(key, in_channels, out_channels):
    ks = jax.random.split(key, 4)

    def u(k, shape, fan_in):
        bound = 1.0 / jnp.sqrt(float(fan_in))
        return jax.random.uniform(k, shape, jnp.float32, -bound, bound)

    return {
        # 3x3 convs (no bias), weights stored as (kh, kw, Cin, Cout)
        "conv1_w": u(ks[0], (3, 3, in_channels, out_channels), in_channels * 9),
        "bn1_g": 1.0 + 0.1 * jax.random.normal(ks[1], (out_channels,), jnp.float32),
        "bn1_b": 0.1 * jax.random.normal(ks[2], (out_channels,), jnp.float32),
        "conv2_w": u(ks[3], (3, 3, out_channels, out_channels), out_channels * 9),
        "bn2_g": jnp.ones((out_channels,), jnp.float32),
        "bn2_b": jnp.zeros((out_channels,), jnp.float32),
    }


if __name__ == "__main__":
    key = jax.random.PRNGKey(0)
    k_params, k_x = jax.random.split(key)

    in_channels, out_channels = 4, 8
    N, H, W = 2, 16, 16                      # NCHW input; pooled to 8x8

    params = init_params(k_params, in_channels, out_channels)
    x = jax.random.normal(k_x, (N, in_channels, H, W), jnp.float32)

    fwd = jax.jit(functools.partial(down_forward, params=params))
    out = jax.block_until_ready(fwd(x))

    ref = down_forward_ref(x, params)
    assert out.shape == (N, out_channels, H // 2, W // 2), out.shape
    assert jnp.allclose(out, ref, atol=2e-3, rtol=2e-3), \
        float(jnp.max(jnp.abs(out - ref)))

    print("KERNEL_OK")
</pallas_src>

<mosaic_0001>
module attributes {stable_mosaic.version = 11 : i64} {
  func.func @_down_fused_kernel(%arg0: i32, %arg1: memref<2x8x8x4xf32, #tpu.memory_space<vmem>>, %arg2: memref<1x8xf32, #tpu.memory_space<vmem>>, %arg3: memref<1x8xf32, #tpu.memory_space<vmem>>, %arg4: memref<1x8xf32, #tpu.memory_space<vmem>>, %arg5: memref<1x8xf32, #tpu.memory_space<vmem>>, %arg6: memref<3x3x4x8xf32, #tpu.memory_space<vmem>>, %arg7: memref<3x3x8x8xf32, #tpu.memory_space<vmem>>, %arg8: memref<2x8x64xf32, #tpu.memory_space<vmem>>, %arg9: memref<2x10x10x4xf32, #tpu.memory_space<vmem>>, %arg10: memref<2x10x10x8xf32, #tpu.memory_space<vmem>>) attributes {dimension_semantics = [#tpu.dimension_semantics<arbitrary>], iteration_bounds = array<i64: 1>, scalar_prefetch = 0 : i64, scratch_operands = 2 : i64, tpu.core_type = #tpu.core_type<tc>, window_params = [{pipeline_mode = #tpu.pipeline_mode<synchronous>, transform_indices = @transform_0, window_bounds = array<i64: 2, 8, 8, 4>}, {pipeline_mode = #tpu.pipeline_mode<synchronous>, transform_indices = @transform_1, window_bounds = array<i64: 1, 8>}, {pipeline_mode = #tpu.pipeline_mode<synchronous>, transform_indices = @transform_2, window_bounds = array<i64: 1, 8>}, {pipeline_mode = #tpu.pipeline_mode<synchronous>, transform_indices = @transform_3, window_bounds = array<i64: 1, 8>}, {pipeline_mode = #tpu.pipeline_mode<synchronous>, transform_indices = @transform_4, window_bounds = array<i64: 1, 8>}, {pipeline_mode = #tpu.pipeline_mode<synchronous>, transform_indices = @transform_5, window_bounds = array<i64: 3, 3, 4, 8>}, {pipeline_mode = #tpu.pipeline_mode<synchronous>, transform_indices = @transform_6, window_bounds = array<i64: 3, 3, 8, 8>}, {pipeline_mode = #tpu.pipeline_mode<synchronous>, transform_indices = @transform_7, window_bounds = array<i64: 2, 8, 64>}]} {
    %cst = arith.constant 0.000000e+00 : f32
    %0 = vector.broadcast %cst : f32 to vector<2x10x10x4xf32>
    %c0 = arith.constant 0 : index
    %c0_0 = arith.constant 0 : index
    %c0_1 = arith.constant 0 : index
    %c0_2 = arith.constant 0 : index
    %1 = vector.load %arg9[%c0, %c0_0, %c0_1, %c0_2] : memref<2x10x10x4xf32, #tpu.memory_space<vmem>>, vector<2x10x10x4xf32>
    tpu.vector_store %arg9[%c0, %c0_0, %c0_1, %c0_2], %0 {strides = array<i32>} : memref<2x10x10x4xf32, #tpu.memory_space<vmem>>, vector<2x10x10x4xf32>,
    %cst_3 = arith.constant 0.000000e+00 : f32
    %2 = vector.broadcast %cst_3 : f32 to vector<1x8xf32>
    %cst_4 = arith.constant 0.000000e+00 : f32
    %3 = vector.broadcast %cst_4 : f32 to vector<1x8xf32>
    %c0_5 = arith.constant 0 : index
    %c0_6 = arith.constant 0 : index
    %c0_7 = arith.constant 0 : index
    %c0_8 = arith.constant 0 : index
    %4 = vector.load %arg1[%c0_5, %c0_6, %c0_7, %c0_8] : memref<2x8x8x4xf32, #tpu.memory_space<vmem>>, vector<1x8x8x4xf32>
    %5 = vector.shape_cast %4 : vector<1x8x8x4xf32> to vector<8x8x4xf32>
    %c0_9 = arith.constant 0 : index
    %c1 = arith.constant 1 : index
    %c1_10 = arith.constant 1 : index
    %c0_11 = arith.constant 0 : index
    %6 = vector.load %arg9[%c0_9, %c1, %c1_10, %c0_11] : memref<2x10x10x4xf32, #tpu.memory_space<vmem>>, vector<1x8x8x4xf32>
    %7 = vector.shape_cast %6 : vector<1x8x8x4xf32> to vector<8x8x4xf32>
    %8 = vector.shape_cast %5 : vector<8x8x4xf32> to vector<1x8x8x4xf32>
    tpu.vector_store %arg9[%c0_9, %c1, %c1_10, %c0_11], %8 {strides = array<i32>} : memref<2x10x10x4xf32, #tpu.memory_space<vmem>>, vector<1x8x8x4xf32>,
    %c0_12 = arith.constant 0 : index
    %c0_13 = arith.constant 0 : index
    %c0_14 = arith.constant 0 : index
    %c0_15 = arith.constant 0 : index
    %9 = vector.load %arg9[%c0_12, %c0_13, %c0_14, %c0_15] : memref<2x10x10x4xf32, #tpu.memory_space<vmem>>, vector<1x10x10x4xf32>
    %10 = vector.shape_cast %9 : vector<1x10x10x4xf32> to vector<10x10x4xf32>
    %cst_16 = arith.constant 0.000000e+00 : f32
    %11 = vector.broadcast %cst_16 : f32 to vector<64x8xf32>
    %12 = vector.extract_strided_slice %10 {offsets = [0, 0, 0], sizes = [8, 8, 4], strides = [1, 1, 1]} : vector<10x10x4xf32> to vector<8x8x4xf32>
    %13 = vector.shape_cast %12 : vector<8x8x4xf32> to vector<64x4xf32>
    %c0_17 = arith.constant 0 : index
    %c0_18 = arith.constant 0 : index
    %c0_19 = arith.constant 0 : index
    %c0_20 = arith.constant 0 : index
    %14 = vector.load %arg6[%c0_17, %c0_18, %c0_19, %c0_20] : memref<3x3x4x8xf32, #tpu.memory_space<vmem>>, vector<1x1x4x8xf32>
    %15 = vector.shape_cast %14 : vector<1x1x4x8xf32> to vector<4x8xf32>
    %cst_21 = arith.constant dense<0.000000e+00> : vector<64x8xf32>
    %16 = tpu.matmul %13, %15, %cst_21 {dimension_numbers = #tpu.dot_dimension_numbers<[1], [0], [0], [1], [0, 0, 1, 1], [], []>} : vector<64x4xf32>, vector<4x8xf32>, vector<64x8xf32> -> vector<64x8xf32>
    %17 = arith.addf %11, %16 : vector<64x8xf32>
    %18 = vector.extract_strided_slice %10 {offsets = [0, 1, 0], sizes = [8, 8, 4], strides = [1, 1, 1]} : vector<10x10x4xf32> to vector<8x8x4xf32>
    %19 = vector.shape_cast %18 : vector<8x8x4xf32> to vector<64x4xf32>
    %c0_22 = arith.constant 0 : index
    %c1_23 = arith.constant 1 : index
    %c0_24 = arith.constant 0 : index
    %c0_25 = arith.constant 0 : index
    %20 = vector.load %arg6[%c0_22, %c1_23, %c0_24, %c0_25] : memref<3x3x4x8xf32, #tpu.memory_space<vmem>>, vector<1x1x4x8xf32>
    %21 = vector.shape_cast %20 : vector<1x1x4x8xf32> to vector<4x8xf32>
    %cst_26 = arith.constant dense<0.000000e+00> : vector<64x8xf32>
    %22 = tpu.matmul %19, %21, %cst_26 {dimension_numbers = #tpu.dot_dimension_numbers<[1], [0], [0], [1], [0, 0, 1, 1], [], []>} : vector<64x4xf32>, vector<4x8xf32>, vector<64x8xf32> -> vector<64x8xf32>
    %23 = arith.addf %17, %22 : vector<64x8xf32>
    %24 = vector.extract_strided_slice %10 {offsets = [0, 2, 0], sizes = [8, 8, 4], strides = [1, 1, 1]} : vector<10x10x4xf32> to vector<8x8x4xf32>
    %25 = vector.shape_cast %24 : vector<8x8x4xf32> to vector<64x4xf32>
    %c0_27 = arith.constant 0 : index
    %c2 = arith.constant 2 : index
    %c0_28 = arith.constant 0 : index
    %c0_29 = arith.constant 0 : index
    %26 = vector.load %arg6[%c0_27, %c2, %c0_28, %c0_29] : memref<3x3x4x8xf32, #tpu.memory_space<vmem>>, vector<1x1x4x8xf32>
    %27 = vector.shape_cast %26 : vector<1x1x4x8xf32> to vector<4x8xf32>
    %cst_30 = arith.constant dense<0.000000e+00> : vector<64x8xf32>
    %28 = tpu.matmul %25, %27, %cst_30 {dimension_numbers = #tpu.dot_dimension_numbers<[1], [0], [0], [1], [0, 0, 1, 1], [], []>} : vector<64x4xf32>, vector<4x8xf32>, vector<64x8xf32> -> vector<64x8xf32>
    %29 = arith.addf %23, %28 : vector<64x8xf32>
    %30 = vector.extract_strided_slice %10 {offsets = [1, 0, 0], sizes = [8, 8, 4], strides = [1, 1, 1]} : vector<10x10x4xf32> to vector<8x8x4xf32>
    %31 = vector.shape_cast %30 : vector<8x8x4xf32> to vector<64x4xf32>
    %c1_31 = arith.constant 1 : index
    %c0_32 = arith.constant 0 : index
    %c0_33 = arith.constant 0 : index
    %c0_34 = arith.constant 0 : index
    %32 = vector.load %arg6[%c1_31, %c0_32, %c0_33, %c0_34] : memref<3x3x4x8xf32, #tpu.memory_space<vmem>>, vector<1x1x4x8xf32>
    %33 = vector.shape_cast %32 : vector<1x1x4x8xf32> to vector<4x8xf32>
    %cst_35 = arith.constant dense<0.000000e+00> : vector<64x8xf32>
    %34 = tpu.matmul %31, %33, %cst_35 {dimension_numbers = #tpu.dot_dimension_numbers<[1], [0], [0], [1], [0, 0, 1, 1], [], []>} : vector<64x4xf32>, vector<4x8xf32>, vector<64x8xf32> -> vector<64x8xf32>
    %35 = arith.addf %29, %34 : vector<64x8xf32>
    %36 = vector.extract_strided_slice %10 {offsets = [1, 1, 0], sizes = [8, 8, 4], strides = [1, 1, 1]} : vector<10x10x4xf32> to vector<8x8x4xf32>
    %37 = vector.shape_cast %36 : vector<8x8x4xf32> to vector<64x4xf32>
    %c1_36 = arith.constant 1 : index
    %c1_37 = arith.constant 1 : index
    %c0_38 = arith.constant 0 : index
    %c0_39 = arith.constant 0 : index
    %38 = vector.load %arg6[%c1_36, %c1_37, %c0_38, %c0_39] : memref<3x3x4x8xf32, #tpu.memory_space<vmem>>, vector<1x1x4x8xf32>
    %39 = vector.shape_cast %38 : vector<1x1x4x8xf32> to vector<4x8xf32>
    %cst_40 = arith.constant dense<0.000000e+00> : vector<64x8xf32>
    %40 = tpu.matmul %37, %39, %cst_40 {dimension_numbers = #tpu.dot_dimension_numbers<[1], [0], [0], [1], [0, 0, 1, 1], [], []>} : vector<64x4xf32>, vector<4x8xf32>, vector<64x8xf32> -> vector<64x8xf32>
    %41 = arith.addf %35, %40 : vector<64x8xf32>
    %42 = vector.extract_strided_slice %10 {offsets = [1, 2, 0], sizes = [8, 8, 4], strides = [1, 1, 1]} : vector<10x10x4xf32> to vector<8x8x4xf32>
    %43 = vector.shape_cast %42 : vector<8x8x4xf32> to vector<64x4xf32>
    %c1_41 = arith.constant 1 : index
    %c2_42 = arith.constant 2 : index
    %c0_43 = arith.constant 0 : index
    %c0_44 = arith.constant 0 : index
    %44 = vector.load %arg6[%c1_41, %c2_42, %c0_43, %c0_44] : memref<3x3x4x8xf32, #tpu.memory_space<vmem>>, vector<1x1x4x8xf32>
    %45 = vector.shape_cast %44 : vector<1x1x4x8xf32> to vector<4x8xf32>
    %cst_45 = arith.constant dense<0.000000e+00> : vector<64x8xf32>
    %46 = tpu.matmul %43, %45, %cst_45 {dimension_numbers = #tpu.dot_dimension_numbers<[1], [0], [0], [1], [0, 0, 1, 1], [], []>} : vector<64x4xf32>, vector<4x8xf32>, vector<64x8xf32> -> vector<64x8xf32>
    %47 = arith.addf %41, %46 : vector<64x8xf32>
    %48 = vector.extract_strided_slice %10 {offsets = [2, 0, 0], sizes = [8, 8, 4], strides = [1, 1, 1]} : vector<10x10x4xf32> to vector<8x8x4xf32>
    %49 = vector.shape_cast %48 : vector<8x8x4xf32> to vector<64x4xf32>
    %c2_46 = arith.constant 2 : index
    %c0_47 = arith.constant 0 : index
    %c0_48 = arith.constant 0 : index
    %c0_49 = arith.constant 0 : index
    %50 = vector.load %arg6[%c2_46, %c0_47, %c0_48, %c0_49] : memref<3x3x4x8xf32, #tpu.memory_space<vmem>>, vector<1x1x4x8xf32>
    %51 = vector.shape_cast %50 : vector<1x1x4x8xf32> to vector<4x8xf32>
    %cst_50 = arith.constant dense<0.000000e+00> : vector<64x8xf32>
    %52 = tpu.matmul %49, %51, %cst_50 {dimension_numbers = #tpu.dot_dimension_numbers<[1], [0], [0], [1], [0, 0, 1, 1], [], []>} : vector<64x4xf32>, vector<4x8xf32>, vector<64x8xf32> -> vector<64x8xf32>
    %53 = arith.addf %47, %52 : vector<64x8xf32>
    %54 = vector.extract_strided_slice %10 {offsets = [2, 1, 0], sizes = [8, 8, 4], strides = [1, 1, 1]} : vector<10x10x4xf32> to vector<8x8x4xf32>
    %55 = vector.shape_cast %54 : vector<8x8x4xf32> to vector<64x4xf32>
    %c2_51 = arith.constant 2 : index
    %c1_52 = arith.constant 1 : index
    %c0_53 = arith.constant 0 : index
    %c0_54 = arith.constant 0 : index
    %56 = vector.load %arg6[%c2_51, %c1_52, %c0_53, %c0_54] : memref<3x3x4x8xf32, #tpu.memory_space<vmem>>, vector<1x1x4x8xf32>
    %57 = vector.shape_cast %56 : vector<1x1x4x8xf32> to vector<4x8xf32>
    %cst_55 = arith.constant dense<0.000000e+00> : vector<64x8xf32>
    %58 = tpu.matmul %55, %57, %cst_55 {dimension_numbers = #tpu.dot_dimension_numbers<[1], [0], [0], [1], [0, 0, 1, 1], [], []>} : vector<64x4xf32>, vector<4x8xf32>, vector<64x8xf32> -> vector<64x8xf32>
    %59 = arith.addf %53, %58 : vector<64x8xf32>
    %60 = vector.extract_strided_slice %10 {offsets = [2, 2, 0], sizes = [8, 8, 4], strides = [1, 1, 1]} : vector<10x10x4xf32> to vector<8x8x4xf32>
    %61 = vector.shape_cast %60 : vector<8x8x4xf32> to vector<64x4xf32>
    %c2_56 = arith.constant 2 : index
    %c2_57 = arith.constant 2 : index
    %c0_58 = arith.constant 0 : index
    %c0_59 = arith.constant 0 : index
    %62 = vector.load %arg6[%c2_56, %c2_57, %c0_58, %c0_59] : memref<3x3x4x8xf32, #tpu.memory_space<vmem>>, vector<1x1x4x8xf32>
    %63 = vector.shape_cast %62 : vector<1x1x4x8xf32> to vector<4x8xf32>
    %cst_60 = arith.constant dense<0.000000e+00> : vector<64x8xf32>
    %64 = tpu.matmul %61, %63, %cst_60 {dimension_numbers = #tpu.dot_dimension_numbers<[1], [0], [0], [1], [0, 0, 1, 1], [], []>} : vector<64x4xf32>, vector<4x8xf32>, vector<64x8xf32> -> vector<64x8xf32>
    %65 = arith.addf %59, %64 : vector<64x8xf32>
    %cst_61 = arith.constant dense<0.000000e+00> : vector<8xf32>
    %66 = vector.multi_reduction <add>, %65, %cst_61 [0] : vector<64x8xf32> to vector<8xf32>
    %67 = vector.shape_cast %66 : vector<8xf32> to vector<1x8xf32>
    %68 = arith.addf %2, %67 : vector<1x8xf32>
    %69 = arith.mulf %65, %65 : vector<64x8xf32>
    %cst_62 = arith.constant dense<0.000000e+00> : vector<8xf32>
    %70 = vector.multi_reduction <add>, %69, %cst_62 [0] : vector<64x8xf32> to vector<8xf32>
    %71 = vector.shape_cast %70 : vector<8xf32> to vector<1x8xf32>
    %72 = arith.addf %3, %71 : vector<1x8xf32>
    %c1_63 = arith.constant 1 : index
    %c0_64 = arith.constant 0 : index
    %c0_65 = arith.constant 0 : index
    %c0_66 = arith.constant 0 : index
    %73 = vector.load %arg1[%c1_63, %c0_64, %c0_65, %c0_66] : memref<2x8x8x4xf32, #tpu.memory_space<vmem>>, vector<1x8x8x4xf32>
    %74 = vector.shape_cast %73 : vector<1x8x8x4xf32> to vector<8x8x4xf32>
    %c1_67 = arith.constant 1 : index
    %c1_68 = arith.constant 1 : index
    %c1_69 = arith.constant 1 : index
    %c0_70 = arith.constant 0 : index
    %75 = vector.load %arg9[%c1_67, %c1_68, %c1_69, %c0_70] : memref<2x10x10x4xf32, #tpu.memory_space<vmem>>, vector<1x8x8x4xf32>
    %76 = vector.shape_cast %75 : vector<1x8x8x4xf32> to vector<8x8x4xf32>
    %77 = vector.shape_cast %74 : vector<8x8x4xf32> to vector<1x8x8x4xf32>
    tpu.vector_store %arg9[%c1_67, %c1_68, %c1_69, %c0_70], %77 {strides = array<i32>} : memref<2x10x10x4xf32, #tpu.memory_space<vmem>>, vector<1x8x8x4xf32>,
    %c1_71 = arith.constant 1 : index
    %c0_72 = arith.constant 0 : index
    %c0_73 = arith.constant 0 : index
    %c0_74 = arith.constant 0 : index
    %78 = vector.load %arg9[%c1_71, %c0_72, %c0_73, %c0_74] : memref<2x10x10x4xf32, #tpu.memory_space<vmem>>, vector<1x10x10x4xf32>
    %79 = vector.shape_cast %78 : vector<1x10x10x4xf32> to vector<10x10x4xf32>
    %cst_75 = arith.constant 0.000000e+00 : f32
    %80 = vector.broadcast %cst_75 : f32 to vector<64x8xf32>
    %81 = vector.extract_strided_slice %79 {offsets = [0, 0, 0], sizes = [8, 8, 4], strides = [1, 1, 1]} : vector<10x10x4xf32> to vector<8x8x4xf32>
    %82 = vector.shape_cast %81 : vector<8x8x4xf32> to vector<64x4xf32>
    %c0_76 = arith.constant 0 : index
    %c0_77 = arith.constant 0 : index
    %c0_78 = arith.constant 0 : index
    %c0_79 = arith.constant 0 : index
    %83 = vector.load %arg6[%c0_76, %c0_77, %c0_78, %c0_79] : memref<3x3x4x8xf32, #tpu.memory_space<vmem>>, vector<1x1x4x8xf32>
    %84 = vector.shape_cast %83 : vector<1x1x4x8xf32> to vector<4x8xf32>
    %cst_80 = arith.constant dense<0.000000e+00> : vector<64x8xf32>
    %85 = tpu.matmul %82, %84, %cst_80 {dimension_numbers = #tpu.dot_dimension_numbers<[1], [0], [0], [1], [0, 0, 1, 1], [], []>} : vector<64x4xf32>, vector<4x8xf32>, vector<64x8xf32> -> vector<64x8xf32>
    %86 = arith.addf %80, %85 : vector<64x8xf32>
    %87 = vector.extract_strided_slice %79 {offsets = [0, 1, 0], sizes = [8, 8, 4], strides = [1, 1, 1]} : vector<10x10x4xf32> to vector<8x8x4xf32>
    %88 = vector.shape_cast %87 : vector<8x8x4xf32> to vector<64x4xf32>
    %c0_81 = arith.constant 0 : index
    %c1_82 = arith.constant 1 : index
    %c0_83 = arith.constant 0 : index
    %c0_84 = arith.constant 0 : index
    %89 = vector.load %arg6[%c0_81, %c1_82, %c0_83, %c0_84] : memref<3x3x4x8xf32, #tpu.memory_space<vmem>>, vector<1x1x4x8xf32>
    %90 = vector.shape_cast %89 : vector<1x1x4x8xf32> to vector<4x8xf32>
    %cst_85 = arith.constant dense<0.000000e+00> : vector<64x8xf32>
    %91 = tpu.matmul %88, %90, %cst_85 {dimension_numbers = #tpu.dot_dimension_numbers<[1], [0], [0], [1], [0, 0, 1, 1], [], []>} : vector<64x4xf32>, vector<4x8xf32>, vector<64x8xf32> -> vector<64x8xf32>
    %92 = arith.addf %86, %91 : vector<64x8xf32>
    %93 = vector.extract_strided_slice %79 {offsets = [0, 2, 0], sizes = [8, 8, 4], strides = [1, 1, 1]} : vector<10x10x4xf32> to vector<8x8x4xf32>
    %94 = vector.shape_cast %93 : vector<8x8x4xf32> to vector<64x4xf32>
    %c0_86 = arith.constant 0 : index
    %c2_87 = arith.constant 2 : index
    %c0_88 = arith.constant 0 : index
    %c0_89 = arith.constant 0 : index
    %95 = vector.load %arg6[%c0_86, %c2_87, %c0_88, %c0_89] : memref<3x3x4x8xf32, #tpu.memory_space<vmem>>, vector<1x1x4x8xf32>
    %96 = vector.shape_cast %95 : vector<1x1x4x8xf32> to vector<4x8xf32>
    %cst_90 = arith.constant dense<0.000000e+00> : vector<64x8xf32>
    %97 = tpu.matmul %94, %96, %cst_90 {dimension_numbers = #tpu.dot_dimension_numbers<[1], [0], [0], [1], [0, 0, 1, 1], [], []>} : vector<64x4xf32>, vector<4x8xf32>, vector<64x8xf32> -> vector<64x8xf32>
    %98 = arith.addf %92, %97 : vector<64x8xf32>
    %99 = vector.extract_strided_slice %79 {offsets = [1, 0, 0], sizes = [8, 8, 4], strides = [1, 1, 1]} : vector<10x10x4xf32> to vector<8x8x4xf32>
    %100 = vector.shape_cast %99 : vector<8x8x4xf32> to vector<64x4xf32>
    %c1_91 = arith.constant 1 : index
    %c0_92 = arith.constant 0 : index
    %c0_93 = arith.constant 0 : index
    %c0_94 = arith.constant 0 : index
    %101 = vector.load %arg6[%c1_91, %c0_92, %c0_93, %c0_94] : memref<3x3x4x8xf32, #tpu.memory_space<vmem>>, vector<1x1x4x8xf32>
    %102 = vector.shape_cast %101 : vector<1x1x4x8xf32> to vector<4x8xf32>
    %cst_95 = arith.constant dense<0.000000e+00> : vector<64x8xf32>
    %103 = tpu.matmul %100, %102, %cst_95 {dimension_numbers = #tpu.dot_dimension_numbers<[1], [0], [0], [1], [0, 0, 1, 1], [], []>} : vector<64x4xf32>, vector<4x8xf32>, vector<64x8xf32> -> vector<64x8xf32>
    %104 = arith.addf %98, %103 : vector<64x8xf32>
    %105 = vector.extract_strided_slice %79 {offsets = [1, 1, 0], sizes = [8, 8, 4], strides = [1, 1, 1]} : vector<10x10x4xf32> to vector<8x8x4xf32>
    %106 = vector.shape_cast %105 : vector<8x8x4xf32> to vector<64x4xf32>
    %c1_96 = arith.constant 1 : index
    %c1_97 = arith.constant 1 : index
    %c0_98 = arith.constant 0 : index
    %c0_99 = arith.constant 0 : index
    %107 = vector.load %arg6[%c1_96, %c1_97, %c0_98, %c0_99] : memref<3x3x4x8xf32, #tpu.memory_space<vmem>>, vector<1x1x4x8xf32>
    %108 = vector.shape_cast %107 : vector<1x1x4x8xf32> to vector<4x8xf32>
    %cst_100 = arith.constant dense<0.000000e+00> : vector<64x8xf32>
    %109 = tpu.matmul %106, %108, %cst_100 {dimension_numbers = #tpu.dot_dimension_numbers<[1], [0], [0], [1], [0, 0, 1, 1], [], []>} : vector<64x4xf32>, vector<4x8xf32>, vector<64x8xf32> -> vector<64x8xf32>
    %110 = arith.addf %104, %109 : vector<64x8xf32>
    %111 = vector.extract_strided_slice %79 {offsets = [1, 2, 0], sizes = [8, 8, 4], strides = [1, 1, 1]} : vector<10x10x4xf32> to vector<8x8x4xf32>
    %112 = vector.shape_cast %111 : vector<8x8x4xf32> to vector<64x4xf32>
    %c1_101 = arith.constant 1 : index
    %c2_102 = arith.constant 2 : index
    %c0_103 = arith.constant 0 : index
    %c0_104 = arith.constant 0 : index
    %113 = vector.load %arg6[%c1_101, %c2_102, %c0_103, %c0_104] : memref<3x3x4x8xf32, #tpu.memory_space<vmem>>, vector<1x1x4x8xf32>
    %114 = vector.shape_cast %113 : vector<1x1x4x8xf32> to vector<4x8xf32>
    %cst_105 = arith.constant dense<0.000000e+00> : vector<64x8xf32>
    %115 = tpu.matmul %112, %114, %cst_105 {dimension_numbers = #tpu.dot_dimension_numbers<[1], [0], [0], [1], [0, 0, 1, 1], [], []>} : vector<64x4xf32>, vector<4x8xf32>, vector<64x8xf32> -> vector<64x8xf32>
    %116 = arith.addf %110, %115 : vector<64x8xf32>
    %117 = vector.extract_strided_slice %79 {offsets = [2, 0, 0], sizes = [8, 8, 4], strides = [1, 1, 1]} : vector<10x10x4xf32> to vector<8x8x4xf32>
    %118 = vector.shape_cast %117 : vector<8x8x4xf32> to vector<64x4xf32>
    %c2_106 = arith.constant 2 : index
    %c0_107 = arith.constant 0 : index
    %c0_108 = arith.constant 0 : index
    %c0_109 = arith.constant 0 : index
    %119 = vector.load %arg6[%c2_106, %c0_107, %c0_108, %c0_109] : memref<3x3x4x8xf32, #tpu.memory_space<vmem>>, vector<1x1x4x8xf32>
    %120 = vector.shape_cast %119 : vector<1x1x4x8xf32> to vector<4x8xf32>
    %cst_110 = arith.constant dense<0.000000e+00> : vector<64x8xf32>
    %121 = tpu.matmul %118, %120, %cst_110 {dimension_numbers = #tpu.dot_dimension_numbers<[1], [0], [0], [1], [0, 0, 1, 1], [], []>} : vector<64x4xf32>, vector<4x8xf32>, vector<64x8xf32> -> vector<64x8xf32>
    %122 = arith.addf %116, %121 : vector<64x8xf32>
    %123 = vector.extract_strided_slice %79 {offsets = [2, 1, 0], sizes = [8, 8, 4], strides = [1, 1, 1]} : vector<10x10x4xf32> to vector<8x8x4xf32>
    %124 = vector.shape_cast %123 : vector<8x8x4xf32> to vector<64x4xf32>
    %c2_111 = arith.constant 2 : index
    %c1_112 = arith.constant 1 : index
    %c0_113 = arith.constant 0 : index
    %c0_114 = arith.constant 0 : index
    %125 = vector.load %arg6[%c2_111, %c1_112, %c0_113, %c0_114] : memref<3x3x4x8xf32, #tpu.memory_space<vmem>>, vector<1x1x4x8xf32>
    %126 = vector.shape_cast %125 : vector<1x1x4x8xf32> to vector<4x8xf32>
    %cst_115 = arith.constant dense<0.000000e+00> : vector<64x8xf32>
    %127 = tpu.matmul %124, %126, %cst_115 {dimension_numbers = #tpu.dot_dimension_numbers<[1], [0], [0], [1], [0, 0, 1, 1], [], []>} : vector<64x4xf32>, vector<4x8xf32>, vector<64x8xf32> -> vector<64x8xf32>
    %128 = arith.addf %122, %127 : vector<64x8xf32>
    %129 = vector.extract_strided_slice %79 {offsets = [2, 2, 0], sizes = [8, 8, 4], strides = [1, 1, 1]} : vector<10x10x4xf32> to vector<8x8x4xf32>
    %130 = vector.shape_cast %129 : vector<8x8x4xf32> to vector<64x4xf32>
    %c2_116 = arith.constant 2 : index
    %c2_117 = arith.constant 2 : index
    %c0_118 = arith.constant 0 : index
    %c0_119 = arith.constant 0 : index
    %131 = vector.load %arg6[%c2_116, %c2_117, %c0_118, %c0_119] : memref<3x3x4x8xf32, #tpu.memory_space<vmem>>, vector<1x1x4x8xf32>
    %132 = vector.shape_cast %131 : vector<1x1x4x8xf32> to vector<4x8xf32>
    %cst_120 = arith.constant dense<0.000000e+00> : vector<64x8xf32>
    %133 = tpu.matmul %130, %132, %cst_120 {dimension_numbers = #tpu.dot_dimension_numbers<[1], [0], [0], [1], [0, 0, 1, 1], [], []>} : vector<64x4xf32>, vector<4x8xf32>, vector<64x8xf32> -> vector<64x8xf32>
    %134 = arith.addf %128, %133 : vector<64x8xf32>
    %cst_121 = arith.constant dense<0.000000e+00> : vector<8xf32>
    %135 = vector.multi_reduction <add>, %134, %cst_121 [0] : vector<64x8xf32> to vector<8xf32>
    %136 = vector.shape_cast %135 : vector<8xf32> to vector<1x8xf32>
    %137 = arith.addf %68, %136 : vector<1x8xf32>
    %138 = arith.mulf %134, %134 : vector<64x8xf32>
    %cst_122 = arith.constant dense<0.000000e+00> : vector<8xf32>
    %139 = vector.multi_reduction <add>, %138, %cst_122 [0] : vector<64x8xf32> to vector<8xf32>
    %140 = vector.shape_cast %139 : vector<8xf32> to vector<1x8xf32>
    %141 = arith.addf %72, %140 : vector<1x8xf32>
    %cst_123 = arith.constant 7.812500e-03 : f32
    %142 = vector.broadcast %cst_123 : f32 to vector<1x8xf32>
    %143 = arith.mulf %137, %142 : vector<1x8xf32>
    %cst_124 = arith.constant 7.812500e-03 : f32
    %144 = vector.broadcast %cst_124 : f32 to vector<1x8xf32>
    %145 = arith.mulf %141, %144 : vector<1x8xf32>
    %146 = arith.mulf %143, %143 : vector<1x8xf32>
    %147 = arith.subf %145, %146 : vector<1x8xf32>
    %cst_125 = arith.constant 0.000000e+00 : f32
    %148 = vector.broadcast %cst_125 : f32 to vector<1x8xf32>
    %149 = arith.maximumf %147, %148 : vector<1x8xf32>
    %c0_126 = arith.constant 0 : index
    %c0_127 = arith.constant 0 : index
    %150 = vector.load %arg2[%c0_126, %c0_127] : memref<1x8xf32, #tpu.memory_space<vmem>>, vector<1x8xf32>
    %cst_128 = arith.constant 9.99999974E-6 : f32
    %151 = vector.broadcast %cst_128 : f32 to vector<1x8xf32>
    %152 = arith.addf %149, %151 : vector<1x8xf32>
    %153 = math.rsqrt %152 : vector<1x8xf32>
    %154 = arith.mulf %150, %153 : vector<1x8xf32>
    %c0_129 = arith.constant 0 : index
    %c0_130 = arith.constant 0 : index
    %155 = vector.load %arg3[%c0_129, %c0_130] : memref<1x8xf32, #tpu.memory_space<vmem>>, vector<1x8xf32>
    %156 = arith.mulf %143, %154 : vector<1x8xf32>
    %157 = arith.subf %155, %156 : vector<1x8xf32>
    %cst_131 = arith.constant 0.000000e+00 : f32
    %158 = vector.broadcast %cst_131 : f32 to vector<2x10x10x8xf32>
    %c0_132 = arith.constant 0 : index
    %c0_133 = arith.constant 0 : index
    %c0_134 = arith.constant 0 : index
    %c0_135 = arith.constant 0 : index
    %159 = vector.load %arg10[%c0_132, %c0_133, %c0_134, %c0_135] : memref<2x10x10x8xf32, #tpu.memory_space<vmem>>, vector<2x10x10x8xf32>
    tpu.vector_store %arg10[%c0_132, %c0_133, %c0_134, %c0_135], %158 {strides = array<i32>} : memref<2x10x10x8xf32, #tpu.memory_space<vmem>>, vector<2x10x10x8xf32>,
    %cst_136 = arith.constant 0.000000e+00 : f32
    %160 = vector.broadcast %cst_136 : f32 to vector<1x8xf32>
    %cst_137 = arith.constant 0.000000e+00 : f32
    %161 = vector.broadcast %cst_137 : f32 to vector<1x8xf32>
    %162 = vector.broadcast %154 : vector<1x8xf32> to vector<64x8xf32>
    %163 = arith.mulf %65, %162 : vector<64x8xf32>
    %164 = vector.broadcast %157 : vector<1x8xf32> to vector<64x8xf32>
    %165 = arith.addf %163, %164 : vector<64x8xf32>
    %cst_138 = arith.constant 0.000000e+00 : f32
    %166 = vector.broadcast %cst_138 : f32 to vector<64x8xf32>
    %167 = arith.maximumf %165, %166 : vector<64x8xf32>
    %168 = vector.shape_cast %167 : vector<64x8xf32> to vector<8x8x8xf32>
    %c0_139 = arith.constant 0 : index
    %c1_140 = arith.constant 1 : index
    %c1_141 = arith.constant 1 : index
    %c0_142 = arith.constant 0 : index
    %169 = vector.load %arg10[%c0_139, %c1_140, %c1_141, %c0_142] : memref<2x10x10x8xf32, #tpu.memory_space<vmem>>, vector<1x8x8x8xf32>
    %170 = vector.shape_cast %169 : vector<1x8x8x8xf32> to vector<8x8x8xf32>
    %171 = vector.shape_cast %168 : vector<8x8x8xf32> to vector<1x8x8x8xf32>
    tpu.vector_store %arg10[%c0_139, %c1_140, %c1_141, %c0_142], %171 {strides = array<i32>} : memref<2x10x10x8xf32, #tpu.memory_space<vmem>>, vector<1x8x8x8xf32>,
    %c0_143 = arith.constant 0 : index
    %c0_144 = arith.constant 0 : index
    %c0_145 = arith.constant 0 : index
    %c0_146 = arith.constant 0 : index
    %172 = vector.load %arg10[%c0_143, %c0_144, %c0_145, %c0_146] : memref<2x10x10x8xf32, #tpu.memory_space<vmem>>, vector<1x10x10x8xf32>
    %173 = vector.shape_cast %172 : vector<1x10x10x8xf32> to vector<10x10x8xf32>
    %cst_147 = arith.constant 0.000000e+00 : f32
    %174 = vector.broadcast %cst_147 : f32 to vector<64x8xf32>
    %175 = vector.extract_strided_slice %173 {offsets = [0, 0, 0], sizes = [8, 8, 8], strides = [1, 1, 1]} : vector<10x10x8xf32> to vector<8x8x8xf32>
    %176 = vector.shape_cast %175 : vector<8x8x8xf32> to vector<64x8xf32>
    %c0_148 = arith.constant 0 : index
    %c0_149 = arith.constant 0 : index
    %c0_150 = arith.constant 0 : index
    %c0_151 = arith.constant 0 : index
    %177 = vector.load %arg7[%c0_148, %c0_149, %c0_150, %c0_151] : memref<3x3x8x8xf32, #tpu.memory_space<vmem>>, vector<1x1x8x8xf32>
    %178 = vector.shape_cast %177 : vector<1x1x8x8xf32> to vector<8x8xf32>
    %cst_152 = arith.constant dense<0.000000e+00> : vector<64x8xf32>
    %179 = tpu.matmul %176, %178, %cst_152 {dimension_numbers = #tpu.dot_dimension_numbers<[1], [0], [0], [1], [0, 0, 1, 1], [], []>} : vector<64x8xf32>, vector<8x8xf32>, vector<64x8xf32> -> vector<64x8xf32>
    %180 = arith.addf %174, %179 : vector<64x8xf32>
    %181 = vector.extract_strided_slice %173 {offsets = [0, 1, 0], sizes = [8, 8, 8], strides = [1, 1, 1]} : vector<10x10x8xf32> to vector<8x8x8xf32>
    %182 = vector.shape_cast %181 : vector<8x8x8xf32> to vector<64x8xf32>
    %c0_153 = arith.constant 0 : index
    %c1_154 = arith.constant 1 : index
    %c0_155 = arith.constant 0 : index
    %c0_156 = arith.constant 0 : index
    %183 = vector.load %arg7[%c0_153, %c1_154, %c0_155, %c0_156] : memref<3x3x8x8xf32, #tpu.memory_space<vmem>>, vector<1x1x8x8xf32>
    %184 = vector.shape_cast %183 : vector<1x1x8x8xf32> to vector<8x8xf32>
    %cst_157 = arith.constant dense<0.000000e+00> : vector<64x8xf32>
    %185 = tpu.matmul %182, %184, %cst_157 {dimension_numbers = #tpu.dot_dimension_numbers<[1], [0], [0], [1], [0, 0, 1, 1], [], []>} : vector<64x8xf32>, vector<8x8xf32>, vector<64x8xf32> -> vector<64x8xf32>
    %186 = arith.addf %180, %185 : vector<64x8xf32>
    %187 = vector.extract_strided_slice %173 {offsets = [0, 2, 0], sizes = [8, 8, 8], strides = [1, 1, 1]} : vector<10x10x8xf32> to vector<8x8x8xf32>
    %188 = vector.shape_cast %187 : vector<8x8x8xf32> to vector<64x8xf32>
    %c0_158 = arith.constant 0 : index
    %c2_159 = arith.constant 2 : index
    %c0_160 = arith.constant 0 : index
    %c0_161 = arith.constant 0 : index
    %189 = vector.load %arg7[%c0_158, %c2_159, %c0_160, %c0_161] : memref<3x3x8x8xf32, #tpu.memory_space<vmem>>, vector<1x1x8x8xf32>
    %190 = vector.shape_cast %189 : vector<1x1x8x8xf32> to vector<8x8xf32>
    %cst_162 = arith.constant dense<0.000000e+00> : vector<64x8xf32>
    %191 = tpu.matmul %188, %190, %cst_162 {dimension_numbers = #tpu.dot_dimension_numbers<[1], [0], [0], [1], [0, 0, 1, 1], [], []>} : vector<64x8xf32>, vector<8x8xf32>, vector<64x8xf32> -> vector<64x8xf32>
    %192 = arith.addf %186, %191 : vector<64x8xf32>
    %193 = vector.extract_strided_slice %173 {offsets = [1, 0, 0], sizes = [8, 8, 8], strides = [1, 1, 1]} : vector<10x10x8xf32> to vector<8x8x8xf32>
    %194 = vector.shape_cast %193 : vector<8x8x8xf32> to vector<64x8xf32>
    %c1_163 = arith.constant 1 : index
    %c0_164 = arith.constant 0 : index
    %c0_165 = arith.constant 0 : index
    %c0_166 = arith.constant 0 : index
    %195 = vector.load %arg7[%c1_163, %c0_164, %c0_165, %c0_166] : memref<3x3x8x8xf32, #tpu.memory_space<vmem>>, vector<1x1x8x8xf32>
    %196 = vector.shape_cast %195 : vector<1x1x8x8xf32> to vector<8x8xf32>
    %cst_167 = arith.constant dense<0.000000e+00> : vector<64x8xf32>
    %197 = tpu.matmul %194, %196, %cst_167 {dimension_numbers = #tpu.dot_dimension_numbers<[1], [0], [0], [1], [0, 0, 1, 1], [], []>} : vector<64x8xf32>, vector<8x8xf32>, vector<64x8xf32> -> vector<64x8xf32>
    %198 = arith.addf %192, %197 : vector<64x8xf32>
    %199 = vector.extract_strided_slice %173 {offsets = [1, 1, 0], sizes = [8, 8, 8], strides = [1, 1, 1]} : vector<10x10x8xf32> to vector<8x8x8xf32>
    %200 = vector.shape_cast %199 : vector<8x8x8xf32> to vector<64x8xf32>
    %c1_168 = arith.constant 1 : index
    %c1_169 = arith.constant 1 : index
    %c0_170 = arith.constant 0 : index
    %c0_171 = arith.constant 0 : index
    %201 = vector.load %arg7[%c1_168, %c1_169, %c0_170, %c0_171] : memref<3x3x8x8xf32, #tpu.memory_space<vmem>>, vector<1x1x8x8xf32>
    %202 = vector.shape_cast %201 : vector<1x1x8x8xf32> to vector<8x8xf32>
    %cst_172 = arith.constant dense<0.000000e+00> : vector<64x8xf32>
    %203 = tpu.matmul %200, %202, %cst_172 {dimension_numbers = #tpu.dot_dimension_numbers<[1], [0], [0], [1], [0, 0, 1, 1], [], []>} : vector<64x8xf32>, vector<8x8xf32>, vector<64x8xf32> -> vector<64x8xf32>
    %204 = arith.addf %198, %203 : vector<64x8xf32>
    %205 = vector.extract_strided_slice %173 {offsets = [1, 2, 0], sizes = [8, 8, 8], strides = [1, 1, 1]} : vector<10x10x8xf32> to vector<8x8x8xf32>
    %206 = vector.shape_cast %205 : vector<8x8x8xf32> to vector<64x8xf32>
    %c1_173 = arith.constant 1 : index
    %c2_174 = arith.constant 2 : index
    %c0_175 = arith.constant 0 : index
    %c0_176 = arith.constant 0 : index
    %207 = vector.load %arg7[%c1_173, %c2_174, %c0_175, %c0_176] : memref<3x3x8x8xf32, #tpu.memory_space<vmem>>, vector<1x1x8x8xf32>
    %208 = vector.shape_cast %207 : vector<1x1x8x8xf32> to vector<8x8xf32>
    %cst_177 = arith.constant dense<0.000000e+00> : vector<64x8xf32>
    %209 = tpu.matmul %206, %208, %cst_177 {dimension_numbers = #tpu.dot_dimension_numbers<[1], [0], [0], [1], [0, 0, 1, 1], [], []>} : vector<64x8xf32>, vector<8x8xf32>, vector<64x8xf32> -> vector<64x8xf32>
    %210 = arith.addf %204, %209 : vector<64x8xf32>
    %211 = vector.extract_strided_slice %173 {offsets = [2, 0, 0], sizes = [8, 8, 8], strides = [1, 1, 1]} : vector<10x10x8xf32> to vector<8x8x8xf32>
    %212 = vector.shape_cast %211 : vector<8x8x8xf32> to vector<64x8xf32>
    %c2_178 = arith.constant 2 : index
    %c0_179 = arith.constant 0 : index
    %c0_180 = arith.constant 0 : index
    %c0_181 = arith.constant 0 : index
    %213 = vector.load %arg7[%c2_178, %c0_179, %c0_180, %c0_181] : memref<3x3x8x8xf32, #tpu.memory_space<vmem>>, vector<1x1x8x8xf32>
    %214 = vector.shape_cast %213 : vector<1x1x8x8xf32> to vector<8x8xf32>
    %cst_182 = arith.constant dense<0.000000e+00> : vector<64x8xf32>
    %215 = tpu.matmul %212, %214, %cst_182 {dimension_numbers = #tpu.dot_dimension_numbers<[1], [0], [0], [1], [0, 0, 1, 1], [], []>} : vector<64x8xf32>, vector<8x8xf32>, vector<64x8xf32> -> vector<64x8xf32>
    %216 = arith.addf %210, %215 : vector<64x8xf32>
    %217 = vector.extract_strided_slice %173 {offsets = [2, 1, 0], sizes = [8, 8, 8], strides = [1, 1, 1]} : vector<10x10x8xf32> to vector<8x8x8xf32>
    %218 = vector.shape_cast %217 : vector<8x8x8xf32> to vector<64x8xf32>
    %c2_183 = arith.constant 2 : index
    %c1_184 = arith.constant 1 : index
    %c0_185 = arith.constant 0 : index
    %c0_186 = arith.constant 0 : index
    %219 = vector.load %arg7[%c2_183, %c1_184, %c0_185, %c0_186] : memref<3x3x8x8xf32, #tpu.memory_space<vmem>>, vector<1x1x8x8xf32>
    %220 = vector.shape_cast %219 : vector<1x1x8x8xf32> to vector<8x8xf32>
    %cst_187 = arith.constant dense<0.000000e+00> : vector<64x8xf32>
    %221 = tpu.matmul %218, %220, %cst_187 {dimension_numbers = #tpu.dot_dimension_numbers<[1], [0], [0], [1], [0, 0, 1, 1], [], []>} : vector<64x8xf32>, vector<8x8xf32>, vector<64x8xf32> -> vector<64x8xf32>
    %222 = arith.addf %216, %221 : vector<64x8xf32>
    %223 = vector.extract_strided_slice %173 {offsets = [2, 2, 0], sizes = [8, 8, 8], strides = [1, 1, 1]} : vector<10x10x8xf32> to vector<8x8x8xf32>
    %224 = vector.shape_cast %223 : vector<8x8x8xf32> to vector<64x8xf32>
    %c2_188 = arith.constant 2 : index
    %c2_189 = arith.constant 2 : index
    %c0_190 = arith.constant 0 : index
    %c0_191 = arith.constant 0 : index
    %225 = vector.load %arg7[%c2_188, %c2_189, %c0_190, %c0_191] : memref<3x3x8x8xf32, #tpu.memory_space<vmem>>, vector<1x1x8x8xf32>
    %226 = vector.shape_cast %225 : vector<1x1x8x8xf32> to vector<8x8xf32>
    %cst_192 = arith.constant dense<0.000000e+00> : vector<64x8xf32>
    %227 = tpu.matmul %224, %226, %cst_192 {dimension_numbers = #tpu.dot_dimension_numbers<[1], [0], [0], [1], [0, 0, 1, 1], [], []>} : vector<64x8xf32>, vector<8x8xf32>, vector<64x8xf32> -> vector<64x8xf32>
    %228 = arith.addf %222, %227 : vector<64x8xf32>
    %cst_193 = arith.constant dense<0.000000e+00> : vector<8xf32>
    %229 = vector.multi_reduction <add>, %228, %cst_193 [0] : vector<64x8xf32> to vector<8xf32>
    %230 = vector.shape_cast %229 : vector<8xf32> to vector<1x8xf32>
    %231 = arith.addf %160, %230 : vector<1x8xf32>
    %232 = arith.mulf %228, %228 : vector<64x8xf32>
    %cst_194 = arith.constant dense<0.000000e+00> : vector<8xf32>
    %233 = vector.multi_reduction <add>, %232, %cst_194 [0] : vector<64x8xf32> to vector<8xf32>
    %234 = vector.shape_cast %233 : vector<8xf32> to vector<1x8xf32>
    %235 = arith.addf %161, %234 : vector<1x8xf32>
    %236 = vector.broadcast %154 : vector<1x8xf32> to vector<64x8xf32>
    %237 = arith.mulf %134, %236 : vector<64x8xf32>
    %238 = vector.broadcast %157 : vector<1x8xf32> to vector<64x8xf32>
    %239 = arith.addf %237, %238 : vector<64x8xf32>
    %cst_195 = arith.constant 0.000000e+00 : f32
    %240 = vector.broadcast %cst_195 : f32 to vector<64x8xf32>
    %241 = arith.maximumf %239, %240 : vector<64x8xf32>
    %242 = vector.shape_cast %241 : vector<64x8xf32> to vector<8x8x8xf32>
    %c1_196 = arith.constant 1 : index
    %c1_197 = arith.constant 1 : index
    %c1_198 = arith.constant 1 : index
    %c0_199 = arith.constant 0 : index
    %243 = vector.load %arg10[%c1_196, %c1_197, %c1_198, %c0_199] : memref<2x10x10x8xf32, #tpu.memory_space<vmem>>, vector<1x8x8x8xf32>
    %244 = vector.shape_cast %243 : vector<1x8x8x8xf32> to vector<8x8x8xf32>
    %245 = vector.shape_cast %242 : vector<8x8x8xf32> to vector<1x8x8x8xf32>
    tpu.vector_store %arg10[%c1_196, %c1_197, %c1_198, %c0_199], %245 {strides = array<i32>} : memref<2x10x10x8xf32, #tpu.memory_space<vmem>>, vector<1x8x8x8xf32>,
    %c1_200 = arith.constant 1 : index
    %c0_201 = arith.constant 0 : index
    %c0_202 = arith.constant 0 : index
    %c0_203 = arith.constant 0 : index
    %246 = vector.load %arg10[%c1_200, %c0_201, %c0_202, %c0_203] : memref<2x10x10x8xf32, #tpu.memory_space<vmem>>, vector<1x10x10x8xf32>
    %247 = vector.shape_cast %246 : vector<1x10x10x8xf32> to vector<10x10x8xf32>
    %cst_204 = arith.constant 0.000000e+00 : f32
    %248 = vector.broadcast %cst_204 : f32 to vector<64x8xf32>
    %249 = vector.extract_strided_slice %247 {offsets = [0, 0, 0], sizes = [8, 8, 8], strides = [1, 1, 1]} : vector<10x10x8xf32> to vector<8x8x8xf32>
    %250 = vector.shape_cast %249 : vector<8x8x8xf32> to vector<64x8xf32>
    %c0_205 = arith.constant 0 : index
    %c0_206 = arith.constant 0 : index
    %c0_207 = arith.constant 0 : index
    %c0_208 = arith.constant 0 : index
    %251 = vector.load %arg7[%c0_205, %c0_206, %c0_207, %c0_208] : memref<3x3x8x8xf32, #tpu.memory_space<vmem>>, vector<1x1x8x8xf32>
    %252 = vector.shape_cast %251 : vector<1x1x8x8xf32> to vector<8x8xf32>
    %cst_209 = arith.constant dense<0.000000e+00> : vector<64x8xf32>
    %253 = tpu.matmul %250, %252, %cst_209 {dimension_numbers = #tpu.dot_dimension_numbers<[1], [0], [0], [1], [0, 0, 1, 1], [], []>} : vector<64x8xf32>, vector<8x8xf32>, vector<64x8xf32> -> vector<64x8xf32>
    %254 = arith.addf %248, %253 : vector<64x8xf32>
    %255 = vector.extract_strided_slice %247 {offsets = [0, 1, 0], sizes = [8, 8, 8], strides = [1, 1, 1]} : vector<10x10x8xf32> to vector<8x8x8xf32>
    %256 = vector.shape_cast %255 : vector<8x8x8xf32> to vector<64x8xf32>
    %c0_210 = arith.constant 0 : index
    %c1_211 = arith.constant 1 : index
    %c0_212 = arith.constant 0 : index
    %c0_213 = arith.constant 0 : index
    %257 = vector.load %arg7[%c0_210, %c1_211, %c0_212, %c0_213] : memref<3x3x8x8xf32, #tpu.memory_space<vmem>>, vector<1x1x8x8xf32>
    %258 = vector.shape_cast %257 : vector<1x1x8x8xf32> to vector<8x8xf32>
    %cst_214 = arith.constant dense<0.000000e+00> : vector<64x8xf32>
    %259 = tpu.matmul %256, %258, %cst_214 {dimension_numbers = #tpu.dot_dimension_numbers<[1], [0], [0], [1], [0, 0, 1, 1], [], []>} : vector<64x8xf32>, vector<8x8xf32>, vector<64x8xf32> -> vector<64x8xf32>
    %260 = arith.addf %254, %259 : vector<64x8xf32>
    %261 = vector.extract_strided_slice %247 {offsets = [0, 2, 0], sizes = [8, 8, 8], strides = [1, 1, 1]} : vector<10x10x8xf32> to vector<8x8x8xf32>
    %262 = vector.shape_cast %261 : vector<8x8x8xf32> to vector<64x8xf32>
    %c0_215 = arith.constant 0 : index
    %c2_216 = arith.constant 2 : index
    %c0_217 = arith.constant 0 : index
    %c0_218 = arith.constant 0 : index
    %263 = vector.load %arg7[%c0_215, %c2_216, %c0_217, %c0_218] : memref<3x3x8x8xf32, #tpu.memory_space<vmem>>, vector<1x1x8x8xf32>
    %264 = vector.shape_cast %263 : vector<1x1x8x8xf32> to vector<8x8xf32>
    %cst_219 = arith.constant dense<0.000000e+00> : vector<64x8xf32>
    %265 = tpu.matmul %262, %264, %cst_219 {dimension_numbers = #tpu.dot_dimension_numbers<[1], [0], [0], [1], [0, 0, 1, 1], [], []>} : vector<64x8xf32>, vector<8x8xf32>, vector<64x8xf32> -> vector<64x8xf32>
    %266 = arith.addf %260, %265 : vector<64x8xf32>
    %267 = vector.extract_strided_slice %247 {offsets = [1, 0, 0], sizes = [8, 8, 8], strides = [1, 1, 1]} : vector<10x10x8xf32> to vector<8x8x8xf32>
    %268 = vector.shape_cast %267 : vector<8x8x8xf32> to vector<64x8xf32>
    %c1_220 = arith.constant 1 : index
    %c0_221 = arith.constant 0 : index
    %c0_222 = arith.constant 0 : index
    %c0_223 = arith.constant 0 : index
    %269 = vector.load %arg7[%c1_220, %c0_221, %c0_222, %c0_223] : memref<3x3x8x8xf32, #tpu.memory_space<vmem>>, vector<1x1x8x8xf32>
    %270 = vector.shape_cast %269 : vector<1x1x8x8xf32> to vector<8x8xf32>
    %cst_224 = arith.constant dense<0.000000e+00> : vector<64x8xf32>
    %271 = tpu.matmul %268, %270, %cst_224 {dimension_numbers = #tpu.dot_dimension_numbers<[1], [0], [0], [1], [0, 0, 1, 1], [], []>} : vector<64x8xf32>, vector<8x8xf32>, vector<64x8xf32> -> vector<64x8xf32>
    %272 = arith.addf %266, %271 : vector<64x8xf32>
    %273 = vector.extract_strided_slice %247 {offsets = [1, 1, 0], sizes = [8, 8, 8], strides = [1, 1, 1]} : vector<10x10x8xf32> to vector<8x8x8xf32>
    %274 = vector.shape_cast %273 : vector<8x8x8xf32> to vector<64x8xf32>
    %c1_225 = arith.constant 1 : index
    %c1_226 = arith.constant 1 : index
    %c0_227 = arith.constant 0 : index
    %c0_228 = arith.constant 0 : index
    %275 = vector.load %arg7[%c1_225, %c1_226, %c0_227, %c0_228] : memref<3x3x8x8xf32, #tpu.memory_space<vmem>>, vector<1x1x8x8xf32>
    %276 = vector.shape_cast %275 : vector<1x1x8x8xf32> to vector<8x8xf32>
    %cst_229 = arith.constant dense<0.000000e+00> : vector<64x8xf32>
    %277 = tpu.matmul %274, %276, %cst_229 {dimension_numbers = #tpu.dot_dimension_numbers<[1], [0], [0], [1], [0, 0, 1, 1], [], []>} : vector<64x8xf32>, vector<8x8xf32>, vector<64x8xf32> -> vector<64x8xf32>
    %278 = arith.addf %272, %277 : vector<64x8xf32>
    %279 = vector.extract_strided_slice %247 {offsets = [1, 2, 0], sizes = [8, 8, 8], strides = [1, 1, 1]} : vector<10x10x8xf32> to vector<8x8x8xf32>
    %280 = vector.shape_cast %279 : vector<8x8x8xf32> to vector<64x8xf32>
    %c1_230 = arith.constant 1 : index
    %c2_231 = arith.constant 2 : index
    %c0_232 = arith.constant 0 : index
    %c0_233 = arith.constant 0 : index
    %281 = vector.load %arg7[%c1_230, %c2_231, %c0_232, %c0_233] : memref<3x3x8x8xf32, #tpu.memory_space<vmem>>, vector<1x1x8x8xf32>
    %282 = vector.shape_cast %281 : vector<1x1x8x8xf32> to vector<8x8xf32>
    %cst_234 = arith.constant dense<0.000000e+00> : vector<64x8xf32>
    %283 = tpu.matmul %280, %282, %cst_234 {dimension_numbers = #tpu.dot_dimension_numbers<[1], [0], [0], [1], [0, 0, 1, 1], [], []>} : vector<64x8xf32>, vector<8x8xf32>, vector<64x8xf32> -> vector<64x8xf32>
    %284 = arith.addf %278, %283 : vector<64x8xf32>
    %285 = vector.extract_strided_slice %247 {offsets = [2, 0, 0], sizes = [8, 8, 8], strides = [1, 1, 1]} : vector<10x10x8xf32> to vector<8x8x8xf32>
    %286 = vector.shape_cast %285 : vector<8x8x8xf32> to vector<64x8xf32>
    %c2_235 = arith.constant 2 : index
    %c0_236 = arith.constant 0 : index
    %c0_237 = arith.constant 0 : index
    %c0_238 = arith.constant 0 : index
    %287 = vector.load %arg7[%c2_235, %c0_236, %c0_237, %c0_238] : memref<3x3x8x8xf32, #tpu.memory_space<vmem>>, vector<1x1x8x8xf32>
    %288 = vector.shape_cast %287 : vector<1x1x8x8xf32> to vector<8x8xf32>
    %cst_239 = arith.constant dense<0.000000e+00> : vector<64x8xf32>
    %289 = tpu.matmul %286, %288, %cst_239 {dimension_numbers = #tpu.dot_dimension_numbers<[1], [0], [0], [1], [0, 0, 1, 1], [], []>} : vector<64x8xf32>, vector<8x8xf32>, vector<64x8xf32> -> vector<64x8xf32>
    %290 = arith.addf %284, %289 : vector<64x8xf32>
    %291 = vector.extract_strided_slice %247 {offsets = [2, 1, 0], sizes = [8, 8, 8], strides = [1, 1, 1]} : vector<10x10x8xf32> to vector<8x8x8xf32>
    %292 = vector.shape_cast %291 : vector<8x8x8xf32> to vector<64x8xf32>
    %c2_240 = arith.constant 2 : index
    %c1_241 = arith.constant 1 : index
    %c0_242 = arith.constant 0 : index
    %c0_243 = arith.constant 0 : index
    %293 = vector.load %arg7[%c2_240, %c1_241, %c0_242, %c0_243] : memref<3x3x8x8xf32, #tpu.memory_space<vmem>>, vector<1x1x8x8xf32>
    %294 = vector.shape_cast %293 : vector<1x1x8x8xf32> to vector<8x8xf32>
    %cst_244 = arith.constant dense<0.000000e+00> : vector<64x8xf32>
    %295 = tpu.matmul %292, %294, %cst_244 {dimension_numbers = #tpu.dot_dimension_numbers<[1], [0], [0], [1], [0, 0, 1, 1], [], []>} : vector<64x8xf32>, vector<8x8xf32>, vector<64x8xf32> -> vector<64x8xf32>
    %296 = arith.addf %290, %295 : vector<64x8xf32>
    %297 = vector.extract_strided_slice %247 {offsets = [2, 2, 0], sizes = [8, 8, 8], strides = [1, 1, 1]} : vector<10x10x8xf32> to vector<8x8x8xf32>
    %298 = vector.shape_cast %297 : vector<8x8x8xf32> to vector<64x8xf32>
    %c2_245 = arith.constant 2 : index
    %c2_246 = arith.constant 2 : index
    %c0_247 = arith.constant 0 : index
    %c0_248 = arith.constant 0 : index
    %299 = vector.load %arg7[%c2_245, %c2_246, %c0_247, %c0_248] : memref<3x3x8x8xf32, #tpu.memory_space<vmem>>, vector<1x1x8x8xf32>
    %300 = vector.shape_cast %299 : vector<1x1x8x8xf32> to vector<8x8xf32>
    %cst_249 = arith.constant dense<0.000000e+00> : vector<64x8xf32>
    %301 = tpu.matmul %298, %300, %cst_249 {dimension_numbers = #tpu.dot_dimension_numbers<[1], [0], [0], [1], [0, 0, 1, 1], [], []>} : vector<64x8xf32>, vector<8x8xf32>, vector<64x8xf32> -> vector<64x8xf32>
    %302 = arith.addf %296, %301 : vector<64x8xf32>
    %cst_250 = arith.constant dense<0.000000e+00> : vector<8xf32>
    %303 = vector.multi_reduction <add>, %302, %cst_250 [0] : vector<64x8xf32> to vector<8xf32>
    %304 = vector.shape_cast %303 : vector<8xf32> to vector<1x8xf32>
    %305 = arith.addf %231, %304 : vector<1x8xf32>
    %306 = arith.mulf %302, %302 : vector<64x8xf32>
    %cst_251 = arith.constant dense<0.000000e+00> : vector<8xf32>
    %307 = vector.multi_reduction <add>, %306, %cst_251 [0] : vector<64x8xf32> to vector<8xf32>
    %308 = vector.shape_cast %307 : vector<8xf32> to vector<1x8xf32>
    %309 = arith.addf %235, %308 : vector<1x8xf32>
    %cst_252 = arith.constant 7.812500e-03 : f32
    %310 = vector.broadcast %cst_252 : f32 to vector<1x8xf32>
    %311 = arith.mulf %305, %310 : vector<1x8xf32>
    %cst_253 = arith.constant 7.812500e-03 : f32
    %312 = vector.broadcast %cst_253 : f32 to vector<1x8xf32>
    %313 = arith.mulf %309, %312 : vector<1x8xf32>
    %314 = arith.mulf %311, %311 : vector<1x8xf32>
    %315 = arith.subf %313, %314 : vector<1x8xf32>
    %cst_254 = arith.constant 0.000000e+00 : f32
    %316 = vector.broadcast %cst_254 : f32 to vector<1x8xf32>
    %317 = arith.maximumf %315, %316 : vector<1x8xf32>
    %c0_255 = arith.constant 0 : index
    %c0_256 = arith.constant 0 : index
    %318 = vector.load %arg4[%c0_255, %c0_256] : memref<1x8xf32, #tpu.memory_space<vmem>>, vector<1x8xf32>
    %cst_257 = arith.constant 9.99999974E-6 : f32
    %319 = vector.broadcast %cst_257 : f32 to vector<1x8xf32>
    %320 = arith.addf %317, %319 : vector<1x8xf32>
    %321 = math.rsqrt %320 : vector<1x8xf32>
    %322 = arith.mulf %318, %321 : vector<1x8xf32>
    %c0_258 = arith.constant 0 : index
    %c0_259 = arith.constant 0 : index
    %323 = vector.load %arg5[%c0_258, %c0_259] : memref<1x8xf32, #tpu.memory_space<vmem>>, vector<1x8xf32>
    %324 = arith.mulf %311, %322 : vector<1x8xf32>
    %325 = arith.subf %323, %324 : vector<1x8xf32>
    %326 = vector.broadcast %322 : vector<1x8xf32> to vector<64x8xf32>
    %327 = arith.mulf %228, %326 : vector<64x8xf32>
    %328 = vector.broadcast %325 : vector<1x8xf32> to vector<64x8xf32>
    %329 = arith.addf %327, %328 : vector<64x8xf32>
    %cst_260 = arith.constant 0.000000e+00 : f32
    %330 = vector.broadcast %cst_260 : f32 to vector<64x8xf32>
    %331 = arith.maximumf %329, %330 : vector<64x8xf32>
    %332 = tpu.transpose %331, [1, 0] : vector<64x8xf32> -> vector<8x64xf32>
    %c0_261 = arith.constant 0 : index
    %c0_262 = arith.constant 0 : index
    %c0_263 = arith.constant 0 : index
    %333 = vector.load %arg8[%c0_261, %c0_262, %c0_263] : memref<2x8x64xf32, #tpu.memory_space<vmem>>, vector<1x8x64xf32>
    %334 = vector.shape_cast %333 : vector<1x8x64xf32> to vector<8x64xf32>
    %335 = vector.shape_cast %332 : vector<8x64xf32> to vector<1x8x64xf32>
    tpu.vector_store %arg8[%c0_261, %c0_262, %c0_263], %335 {strides = array<i32>} : memref<2x8x64xf32, #tpu.memory_space<vmem>>, vector<1x8x64xf32>,
    %336 = vector.broadcast %322 : vector<1x8xf32> to vector<64x8xf32>
    %337 = arith.mulf %302, %336 : vector<64x8xf32>
    %338 = vector.broadcast %325 : vector<1x8xf32> to vector<64x8xf32>
    %339 = arith.addf %337, %338 : vector<64x8xf32>
    %cst_264 = arith.constant 0.000000e+00 : f32
    %340 = vector.broadcast %cst_264 : f32 to vector<64x8xf32>
    %341 = arith.maximumf %339, %340 : vector<64x8xf32>
    %342 = tpu.transpose %341, [1, 0] : vector<64x8xf32> -> vector<8x64xf32>
    %c1_265 = arith.constant 1 : index
    %c0_266 = arith.constant 0 : index
    %c0_267 = arith.constant 0 : index
    %343 = vector.load %arg8[%c1_265, %c0_266, %c0_267] : memref<2x8x64xf32, #tpu.memory_space<vmem>>, vector<1x8x64xf32>
    %344 = vector.shape_cast %343 : vector<1x8x64xf32> to vector<8x64xf32>
    %345 = vector.shape_cast %342 : vector<8x64xf32> to vector<1x8x64xf32>
    tpu.vector_store %arg8[%c1_265, %c0_266, %c0_267], %345 {strides = array<i32>} : memref<2x8x64xf32, #tpu.memory_space<vmem>>, vector<1x8x64xf32>,
    return
  }
  func.func @transform_0(%arg0: i32) -> (i32, i32, i32, i32) {
    %c0_i32 = arith.constant 0 : i32
    %c0_i32_0 = arith.constant 0 : i32
    %c0_i32_1 = arith.constant 0 : i32
    %c0_i32_2 = arith.constant 0 : i32
    %c0_i32_3 = arith.constant 0 : i32
    return %c0_i32, %c0_i32_0, %c0_i32_1, %c0_i32_2 : i32, i32, i32, i32
  }
  func.func @transform_1(%arg0: i32) -> (i32, i32) {
    %c0_i32 = arith.constant 0 : i32
    %c0_i32_0 = arith.constant 0 : i32
    %c0_i32_1 = arith.constant 0 : i32
    return %c0_i32, %c0_i32_0 : i32, i32
  }
  func.func @transform_2(%arg0: i32) -> (i32, i32) {
    %c0_i32 = arith.constant 0 : i32
    %c0_i32_0 = arith.constant 0 : i32
    %c0_i32_1 = arith.constant 0 : i32
    return %c0_i32, %c0_i32_0 : i32, i32
  }
  func.func @transform_3(%arg0: i32) -> (i32, i32) {
    %c0_i32 = arith.constant 0 : i32
    %c0_i32_0 = arith.constant 0 : i32
    %c0_i32_1 = arith.constant 0 : i32
    return %c0_i32, %c0_i32_0 : i32, i32
  }
  func.func @transform_4(%arg0: i32) -> (i32, i32) {
    %c0_i32 = arith.constant 0 : i32
    %c0_i32_0 = arith.constant 0 : i32
    %c0_i32_1 = arith.constant 0 : i32
    return %c0_i32, %c0_i32_0 : i32, i32
  }
  func.func @transform_5(%arg0: i32) -> (i32, i32, i32, i32) {
    %c0_i32 = arith.constant 0 : i32
    %c0_i32_0 = arith.constant 0 : i32
    %c0_i32_1 = arith.constant 0 : i32
    %c0_i32_2 = arith.constant 0 : i32
    %c0_i32_3 = arith.constant 0 : i32
    return %c0_i32, %c0_i32_0, %c0_i32_1, %c0_i32_2 : i32, i32, i32, i32
  }
  func.func @transform_6(%arg0: i32) -> (i32, i32, i32, i32) {
    %c0_i32 = arith.constant 0 : i32
    %c0_i32_0 = arith.constant 0 : i32
    %c0_i32_1 = arith.constant 0 : i32
    %c0_i32_2 = arith.constant 0 : i32
    %c0_i32_3 = arith.constant 0 : i32
    return %c0_i32, %c0_i32_0, %c0_i32_1, %c0_i32_2 : i32, i32, i32, i32
  }
  func.func @transform_7(%arg0: i32) -> (i32, i32, i32) {
    %c0_i32 = arith.constant 0 : i32
    %c0_i32_0 = arith.constant 0 : i32
    %c0_i32_1 = arith.constant 0 : i32
    %c0_i32_2 = arith.constant 0 : i32
    return %c0_i32, %c0_i32_0, %c0_i32_1 : i32, i32, i32
  }
}

</mosaic_0001>

<bundles_post_ra>
// kernel: down_forward.1
= control target key start
LH: loop header
LB: loop body
LE: loop exit
PB: predicated region body
PF: predicated region fallthrough
CT: control target
= control target key end

     0   :  { %vm165_vm0 = vcmask 1043456   ;;  %vm26_vm1 = vcmask 31744   ;;  %vm28_vm2 = vcmask 25600   ;;  %v6778_v2 = vmov 0.0   ;;  %s8520_s5 = inlined_call_operand.vmem [shape: f32[3,3,4,8], index: 5, kind: input, shape index: {}]   ;;  %s8521_s0 = inlined_call_operand.vmem [shape: f32[2,8,8,4], index: 0, kind: input, shape index: {}]   ;;  %s8522_s6 = inlined_call_operand.vmem [shape: f32[3,3,8,8], index: 6, kind: input, shape index: {}]   ;;  %s8523_s1 = inlined_call_operand.vmem [shape: f32[1,8], index: 1, kind: input, shape index: {}]   ;;  %s8524_s2 = inlined_call_operand.vmem [shape: f32[1,8], index: 2, kind: input, shape index: {}]   ;;  %s8525_s3 = inlined_call_operand.vmem [shape: f32[1,8], index: 3, kind: input, shape index: {}]   ;;  %s8526_s4 = inlined_call_operand.vmem [shape: f32[1,8], index: 4, kind: input, shape index: {}]   ;;  %s8527_s7 = inlined_call_operand.vmem [shape: f32[2,8,64], index: 7, kind: output, shape index: {}]  }
   0x1   :  { %v5342_v0 = vld [vmem:[%s8520_s5 + $0x4] sm:$0xf]  ;;  %27 = vst.msk [vmem:[#allocation2] sm:$0xff] %vm26_vm1, %v6778_v2  ;;  %30 = vst.msk [vmem:[#allocation2 + $0x10] sm:$0xff] %vm26_vm1, %v6778_v2  ;;  %v6913_v4 = vld [vmem:[%s8520_s5] sm:$0xf] }
   0x2   :  { %v5439_v1 = vld [vmem:[%s8520_s5 + $0x4] sm:$0xf]  ;;  %29 = vst.msk [vmem:[#allocation2 + $0x8] sm:$0x3] %vm28_vm2, %v6778_v2  ;;  %31 = vst.msk [vmem:[#allocation2 + $0x18] sm:$0x3] %vm28_vm2, %v6778_v2  ;;  %6013 = vmatprep.subr.msk.mxu0 %vm165_vm0, %v5342_v0 }
   0x3   :  { %32 = vst.msk [vmem:[#allocation2 + $0x20] sm:$0xff] %vm26_vm1, %v6778_v2  ;;  %34 = vst.msk [vmem:[#allocation2 + $0x30] sm:$0xff] %vm26_vm1, %v6778_v2  ;;  %v68_v3 = vld [vmem:[%s8521_s0] sm:$0xff]  ;;  %6139 = vmatprep.subr.msk.mxu1 %vm165_vm0, %v5439_v1  ;;  %6014 = vmatpush3.msk.msra.mxu0 %vm165_vm0, %v5342_v0  ;;  %v69_v7 = vld [vmem:[%s8521_s0 + $0x8] sm:$0xff]  ;;  %vm122_vm3 = vcmask 1046528   ;;  %vm398_vm4 = vcmask 1045504  }
   0x4   :  { %33 = vst.msk [vmem:[#allocation2 + $0x28] sm:$0x3] %vm28_vm2, %v6778_v2  ;;  %35 = vst.msk [vmem:[#allocation2 + $0x38] sm:$0x3] %vm28_vm2, %v6778_v2  ;;  %v6918_v5 = vld [vmem:[%s8520_s5] sm:$0xf]  ;;  %6140 = vmatpush3.msk.msra.mxu1 %vm165_vm0, %v5439_v1  ;;  %6027 = vmatprep.subr.msk.mxu0 %vm165_vm0, %v6913_v4 }
   0x5   :  { %36 = vst.msk [vmem:[#allocation2 + $0x40] sm:$0xff] %vm26_vm1, %v6778_v2  ;;  %38 = vst.msk [vmem:[#allocation2 + $0x50] sm:$0xff] %vm26_vm1, %v6778_v2  ;;  %v5431_v6 = vld [vmem:[%s8521_s0 + $0x40] sm:$0xff]  ;;  %v5432_v8 = vld [vmem:[%s8521_s0 + $0x48] sm:$0xff]  ;;  %6153 = vmatprep.subr.msk.mxu1 %vm165_vm0, %v6918_v5  ;;  %vm1293_vm5 = vcmask 64512   ;;  %vm2627_vm6 = vcmask 58368  }
   0x6   :  { %37 = vst.msk [vmem:[#allocation2 + $0x48] sm:$0x3] %vm28_vm2, %v6778_v2  ;;  %39 = vst.msk [vmem:[#allocation2 + $0x58] sm:$0x3] %vm28_vm2, %v6778_v2  ;;  %v70_v9 = vld [vmem:[%s8521_s0 + $0x10] sm:$0xff]  ;;  %v71_v11 = vld [vmem:[%s8521_s0 + $0x18] sm:$0xff] }
   0x7   :  { %40 = vst.msk [vmem:[#allocation2 + $0x60] sm:$0xff] %vm26_vm1, %v6778_v2  ;;  %42 = vst.msk [vmem:[#allocation2 + $0x70] sm:$0xff] %vm26_vm1, %v6778_v2  ;;  %v5433_v10 = vld [vmem:[%s8521_s0 + $0x50] sm:$0xff]  ;;  %v5434_v12 = vld [vmem:[%s8521_s0 + $0x58] sm:$0xff]  ;;  %vm5278_vm7 = vcmask 523264  }
   0x8   :  { %41 = vst.msk [vmem:[#allocation2 + $0x68] sm:$0x3] %vm28_vm2, %v6778_v2  ;;  %43 = vst.msk [vmem:[#allocation2 + $0x78] sm:$0x3] %vm28_vm2, %v6778_v2  ;;  %v72_v13 = vld [vmem:[%s8521_s0 + $0x20] sm:$0xff]  ;;  %v73_v15 = vld [vmem:[%s8521_s0 + $0x28] sm:$0xff] }
   0x9   :  { %44 = vst.msk [vmem:[#allocation2 + $0x80] sm:$0xff] %vm26_vm1, %v6778_v2  ;;  %46 = vst.msk [vmem:[#allocation2 + $0x90] sm:$0xff] %vm26_vm1, %v6778_v2  ;;  %v5435_v14 = vld [vmem:[%s8521_s0 + $0x60] sm:$0xff]  ;;  %v5436_v16 = vld [vmem:[%s8521_s0 + $0x68] sm:$0xff] }
   0xa   :  { %45 = vst.msk [vmem:[#allocation2 + $0x88] sm:$0x3] %vm28_vm2, %v6778_v2  ;;  %47 = vst.msk [vmem:[#allocation2 + $0x98] sm:$0x3] %vm28_vm2, %v6778_v2  ;;  %v74_v17 = vld [vmem:[%s8521_s0 + $0x30] sm:$0xff]  ;;  %v6979_v19 = vld [vmem:[#allocation2] sm:$0xff] }
   0xb   :  { %48 = vst.msk [vmem:[#allocation2 + $0xa0] sm:$0xff] %vm26_vm1, %v6778_v2  ;;  %50 = vst.msk [vmem:[#allocation2 + $0xb0] sm:$0xff] %vm26_vm1, %v6778_v2  ;;  %v5437_v18 = vld [vmem:[%s8521_s0 + $0x70] sm:$0xff]  ;;  %v6981_v20 = vld [vmem:[#allocation2 + $0x8] sm:$0x3]  ;;  %v123_v22 = vrot.slane %v6979_v19, 1 }
   0xc   :  { %49 = vst.msk [vmem:[#allocation2 + $0xa8] sm:$0x3] %vm28_vm2, %v6778_v2  ;;  %51 = vst.msk [vmem:[#allocation2 + $0xb8] sm:$0x3] %vm28_vm2, %v6778_v2  ;;  %v124_v23 = vrot.slane %v6981_v20, 1 }
   0xd   :  { %52 = vst.msk [vmem:[#allocation2 + $0xc0] sm:$0xff] %vm26_vm1, %v6778_v2  ;;  %54 = vst.msk [vmem:[#allocation2 + $0xd0] sm:$0xff] %vm26_vm1, %v6778_v2  ;;  %v7015_v40 = vld [vmem:[%s8520_s5 + $0x8] sm:$0xf] }
   0xe   :  { %53 = vst.msk [vmem:[#allocation2 + $0xc8] sm:$0x3] %vm28_vm2, %v6778_v2  ;;  %55 = vst.msk [vmem:[#allocation2 + $0xd8] sm:$0x3] %vm28_vm2, %v6778_v2  ;;  %v125_v30 = vsel %vm122_vm3, %v123_v22, %v124_v23  ;;  %v7031_v47 = vld [vmem:[%s8520_s5 + $0x8] sm:$0xf] }
   0xf   :  { %56 = vst.msk [vmem:[#allocation2 + $0xe0] sm:$0xff] %vm26_vm1, %v6778_v2  ;;  %58 = vst.msk [vmem:[#allocation2 + $0xf0] sm:$0xff] %vm26_vm1, %v6778_v2  ;;  %6015 = vmatprep.mubr.msk.f32.mxu0 %vm26_vm1, %v125_v30 }
  0x10   :  { %57 = vst.msk [vmem:[#allocation2 + $0xe8] sm:$0x3] %vm28_vm2, %v6778_v2  ;;  %59 = vst.msk [vmem:[#allocation2 + $0xf8] sm:$0x3] %vm28_vm2, %v6778_v2 }
  0x11   :  { %60 = vst.msk [vmem:[#allocation2 + $0x100] sm:$0xff] %vm26_vm1, %v6778_v2  ;;  %62 = vst.msk [vmem:[#allocation2 + $0x110] sm:$0xff] %vm26_vm1, %v6778_v2 }
  0x12   :  { %61 = vst.msk [vmem:[#allocation2 + $0x108] sm:$0x3] %vm28_vm2, %v6778_v2  ;;  %63 = vst.msk [vmem:[#allocation2 + $0x118] sm:$0x3] %vm28_vm2, %v6778_v2  ;;  %v6983_v21 = vld [vmem:[#allocation2 + $0xa0] sm:$0xff] }
  0x13   :  { %64 = vst.msk [vmem:[#allocation2 + $0x120] sm:$0xff] %vm26_vm1, %v6778_v2  ;;  %66 = vst.msk [vmem:[#allocation2 + $0x130] sm:$0xff] %vm26_vm1, %v6778_v2  ;;  %v6987_v24 = vld [vmem:[#allocation2 + $0xa8] sm:$0x3]  ;;  %v1402_v25 = vrot.slane %v6983_v21, 1 }
  0x14   :  { %65 = vst.msk [vmem:[#allocation2 + $0x128] sm:$0x3] %vm28_vm2, %v6778_v2  ;;  %67 = vst.msk [vmem:[#allocation2 + $0x138] sm:$0x3] %vm28_vm2, %v6778_v2  ;;  %v1403_v26 = vrot.slane %v6987_v24, 1 }
  0x15   :  { %77 = vst.msk [vmem:[#allocation2 + $0x11] sm:$0xff] %vm26_vm1, %v68_v3  ;;  %1356 = vst.msk [vmem:[#allocation2 + $0xb1] sm:$0xff] %vm26_vm1, %v5431_v6 }
  0x16   :  { %78 = vst.msk [vmem:[#allocation2 + $0x21] sm:$0xff] %vm26_vm1, %v69_v7  ;;  %1357 = vst.msk [vmem:[#allocation2 + $0xc1] sm:$0xff] %vm26_vm1, %v5432_v8  ;;  %v1404_v35 = vsel %vm122_vm3, %v1402_v25, %v1403_v26 }
  0x17   :  { %79 = vst.msk [vmem:[#allocation2 + $0x31] sm:$0xff] %vm26_vm1, %v70_v9  ;;  %1358 = vst.msk [vmem:[#allocation2 + $0xd1] sm:$0xff] %vm26_vm1, %v5433_v10  ;;  %6141 = vmatprep.mubr.msk.f32.mxu1 %vm26_vm1, %v1404_v35 }
  0x18   :  { %80 = vst.msk [vmem:[#allocation2 + $0x41] sm:$0xff] %vm26_vm1, %v71_v11  ;;  %1359 = vst.msk [vmem:[#allocation2 + $0xe1] sm:$0xff] %vm26_vm1, %v5434_v12 }
  0x19   :  { %81 = vst.msk [vmem:[#allocation2 + $0x51] sm:$0xff] %vm26_vm1, %v72_v13  ;;  %1360 = vst.msk [vmem:[#allocation2 + $0xf1] sm:$0xff] %vm26_vm1, %v5435_v14 }
  0x1a   :  { %82 = vst.msk [vmem:[#allocation2 + $0x61] sm:$0xff] %vm26_vm1, %v73_v15  ;;  %1361 = vst.msk [vmem:[#allocation2 + $0x101] sm:$0xff] %vm26_vm1, %v5436_v16 }
  0x1b   :  { %83 = vst.msk [vmem:[#allocation2 + $0x71] sm:$0xff] %vm26_vm1, %v74_v17  ;;  %1362 = vst.msk [vmem:[#allocation2 + $0x111] sm:$0xff] %vm26_vm1, %v5437_v18 }
  0x1c   :  { %v6991_v27 = vld [vmem:[#allocation2 + $0x10] sm:$0xff]  ;;  %v6993_v28 = vld [vmem:[#allocation2 + $0x18] sm:$0x3]  ;;  %2626 = vst.msk [vmem:[#allocation3] sm:$0xff] %vm1293_vm5, %v6778_v2  ;;  %2629 = vst.msk [vmem:[#allocation3 + $0x10] sm:$0xff] %vm1293_vm5, %v6778_v2 }
  0x1d   :  { %v6995_v29 = vld [vmem:[#allocation2 + $0xb0] sm:$0xff]  ;;  %v126_v31 = vrot.slane %v6991_v27, 1  ;;  %v127_v32 = vrot.slane %v6993_v28, 1  ;;  %v7000_v33 = vld [vmem:[#allocation2 + $0xb8] sm:$0x3]  ;;  %v7002_v34 = vld [vmem:[#allocation2 + $0x20] sm:$0xff] }
  0x1e   :  { %v1405_v36 = vrot.slane %v6995_v29, 1  ;;  %v1406_v37 = vrot.slane %v7000_v33, 1  ;;  %v7008_v38 = vld [vmem:[#allocation2 + $0x28] sm:$0x3]  ;;  %v7010_v39 = vld [vmem:[#allocation2 + $0xc0] sm:$0xff]  ;;  %v129_v42 = vrot.slane %v7002_v34, 1 }
  0x1f   :  { %v7019_v41 = vsel %vm122_vm3, %v126_v31, %v127_v32  ;;  %v130_v43 = vrot.slane %v7008_v38, 1  ;;  %v7023_v44 = vld [vmem:[#allocation2 + $0xc8] sm:$0x3]  ;;  %v1408_v45 = vrot.slane %v7010_v39, 1  ;;  %v7026_v46 = vld [vmem:[#allocation2 + $0x30] sm:$0xff]  ;;  %v7044_v53 = vld [vmem:[#allocation2 + $0x40] sm:$0xff] }
  0x20   :  { %6016 = vmatmul.mubr.msk.f32.vlgmr.msra.gmra.mrb[0].mxu0 %vm26_vm1, %v7019_v41  ;;  %v7036_v48 = vsel %vm122_vm3, %v1405_v36, %v1406_v37  ;;  %v1409_v49 = vrot.slane %v7023_v44, 1  ;;  %v7039_v50 = vld [vmem:[#allocation2 + $0x38] sm:$0x3]  ;;  %v132_v51 = vrot.slane %v7026_v46, 1  ;;  %v7042_v52 = vld [vmem:[#allocation2 + $0xd0] sm:$0xff]  ;;  %v135_v61 = vrot.slane %v7044_v53, 1 }
  0x21   :  { %6028 = vmatpush3.msk.msra.mxu0 %vm165_vm0, %v6913_v4  ;;  %6142 = vmatmul.mubr.msk.f32.vlgmr.msra.gmra.mrb[0].mxu1 %vm26_vm1, %v7036_v48  ;;  %v7051_v54 = vsel %vm122_vm3, %v129_v42, %v130_v43  ;;  %v133_v55 = vrot.slane %v7039_v50, 1  ;;  %v7054_v56 = vld [vmem:[#allocation2 + $0xd8] sm:$0x3]  ;;  %v1411_v57 = vrot.slane %v7042_v52, 1  ;;  %v7057_v58 = vld [vmem:[#allocation2 + $0x48] sm:$0x3] }
  0x22   :  { %6154 = vmatpush3.msk.msra.mxu1 %vm165_vm0, %v6918_v5  ;;  %6018 = vmatprep.mubr.msk.f32.mxu0 %vm26_vm1, %v7051_v54  ;;  %v7064_v59 = vsel %vm122_vm3, %v1408_v45, %v1409_v49  ;;  %v1412_v60 = vrot.slane %v7054_v56, 1  ;;  %v136_v62 = vrot.slane %v7057_v58, 1  ;;  %v7069_v63 = vld [vmem:[#allocation2 + $0xe0] sm:$0xff]  ;;  %v7071_v0 = vld [vmem:[#allocation2 + $0xe8] sm:$0x3]  ;;  %v7080_v5 = vld [vmem:[#allocation2 + $0x50] sm:$0xff] }
  0x23   :  { %6144 = vmatprep.mubr.msk.f32.mxu1 %vm26_vm1, %v7064_v59  ;;  %v7076_v1 = vsel %vm122_vm3, %v132_v51, %v133_v55  ;;  %v1414_v3 = vrot.slane %v7069_v63, 1  ;;  %v1415_v4 = vrot.slane %v7071_v0, 1  ;;  %v7082_v6 = vld [vmem:[#allocation2 + $0x58] sm:$0x3]  ;;  %v7084_v7 = vld [vmem:[#allocation2 + $0xf0] sm:$0xff]  ;;  %6041 = vmatprep.subr.msk.mxu0 %vm165_vm0, %v7015_v40  ;;  %v138_v10 = vrot.slane %v7080_v5, 1 }
  0x24   :  { %6019 = vmatmul.mubr.msk.f32.gmra.mrb[2].mxu0 %vm26_vm1, %v7076_v1  ;;  %v7091_v8 = vsel %vm122_vm3, %v1411_v57, %v1412_v60  ;;  %v7094_v9 = vsel %vm122_vm3, %v135_v61, %v136_v62  ;;  %v139_v11 = vrot.slane %v7082_v6, 1  ;;  %v7098_v12 = vld [vmem:[#allocation2 + $0xf8] sm:$0x3]  ;;  %v7100_v13 = vld [vmem:[#allocation2 + $0x60] sm:$0xff]  ;;  %6167 = vmatprep.subr.msk.mxu1 %vm165_vm0, %v7031_v47  ;;  %v1417_v16 = vrot.slane %v7084_v7, 1  ;;  %v7118_v23 = vld [vmem:[#allocation2 + $0x70] sm:$0xff] }
  0x25   :  { %v7102_v14 = vld [vmem:[#allocation2 + $0x100] sm:$0xff]  ;;  %6145 = vmatmul.mubr.msk.f32.gmra.mrb[2].mxu1 %vm26_vm1, %v7091_v8  ;;  %6021 = vmatprep.mubr.msk.f32.mxu0 %vm26_vm1, %v7094_v9  ;;  %v7111_v15 = vsel %vm122_vm3, %v1414_v3, %v1415_v4  ;;  %v1418_v17 = vrot.slane %v7098_v12, 1  ;;  %v7115_v18 = vld [vmem:[#allocation2 + $0x68] sm:$0x3]  ;;  %v141_v22 = vrot.slane %v7100_v13, 1  ;;  %v144_v37 = vrot.slane %v7118_v23, 1 }
  0x26   :  { %6147 = vmatprep.mubr.msk.f32.mxu1 %vm26_vm1, %v7111_v15  ;;  %v7123_v25 = vsel %vm122_vm3, %v138_v10, %v139_v11  ;;  %v142_v26 = vrot.slane %v7115_v18, 1  ;;  %v7126_v30 = vld [vmem:[#allocation2 + $0x108] sm:$0x3]  ;;  %v1420_v31 = vrot.slane %v7102_v14, 1  ;;  %v7129_v32 = vld [vmem:[#allocation2 + $0x78] sm:$0x3] }
  0x27   :  { %v7132_v35 = vsel %vm122_vm3, %v1417_v16, %v1418_v17  ;;  %v1421_v36 = vrot.slane %v7126_v30, 1  ;;  %v145_v42 = vrot.slane %v7129_v32, 1  ;;  %v7137_v43 = vld [vmem:[#allocation2 + $0x110] sm:$0xff]  ;;  %v7139_v45 = vld [vmem:[#allocation2 + $0x118] sm:$0x3]  ;;  %v1676_v11 = vrot.slane %v6987_v24, 2 }
  0x28   :  { %6022 = vmatmul.mubr.msk.f32.gmra.mrb[4].mxu0 %vm26_vm1, %v7123_v25  ;;  %v7144_v49 = vsel %vm122_vm3, %v141_v22, %v142_v26  ;;  %v1423_v51 = vrot.slane %v7137_v43, 1  ;;  %v1424_v55 = vrot.slane %v7139_v45, 1  ;;  %v75_v57 = vld [vmem:[%s8521_s0 + $0x38] sm:$0xff]  ;;  %v5371_v4 = vld [vmem:[%s8520_s5 + $0xc] sm:$0xf]  ;;  %v403_v16 = vrot.slane %v6993_v28, 2 }
  0x29   :  { %6148 = vmatmul.mubr.msk.f32.gmra.mrb[4].mxu1 %vm26_vm1, %v7132_v35  ;;  %6024 = vmatprep.mubr.msk.f32.mxu0 %vm26_vm1, %v7144_v49  ;;  %v7156_v60 = vsel %vm122_vm3, %v1420_v31, %v1421_v36  ;;  %v7159_v61 = vsel %vm122_vm3, %v144_v37, %v145_v42  ;;  %84 = vst.msk [vmem:[#allocation2 + $0x81] sm:$0xff] %vm26_vm1, %v75_v57  ;;  %v5438_v3 = vld [vmem:[%s8521_s0 + $0x78] sm:$0xff]  ;;  %v5468_v10 = vld [vmem:[%s8520_s5 + $0xc] sm:$0xf]  ;;  %v1675_v17 = vrot.slane %v6983_v21, 2  ;;  %v402_v22 = vrot.slane %v6991_v27, 2 }
  0x2a   :  { %6150 = vmatprep.mubr.msk.f32.mxu1 %vm26_vm1, %v7156_v60  ;;  %v7165_v62 = vsel %vm122_vm3, %v1423_v51, %v1424_v55  ;;  %1363 = vst.msk [vmem:[#allocation2 + $0x121] sm:$0xff] %vm26_vm1, %v5438_v3  ;;  %v405_v26 = vrot.slane %v7002_v34, 2  ;;  %v406_v31 = vrot.slane %v7008_v38, 2  ;;  %v1682_v36 = vrot.slane %v7023_v44, 2 }
  0x2b   :  { %v1677_v24 = vsel %vm398_vm4, %v1675_v17, %v1676_v11  ;;  %v7226_v28 = vsel %vm398_vm4, %v402_v22, %v403_v16  ;;  %v408_v37 = vrot.slane %v7026_v46, 2  ;;  %v409_v42 = vrot.slane %v7039_v50, 2  ;;  %v5478_v22 = vld [vmem:[%s8520_s5 + $0x10] sm:$0xf]  ;;  %2631 = vst.msk [vmem:[#allocation3 + $0x20] sm:$0xff] %vm1293_vm5, %v6778_v2  ;;  %2633 = vst.msk [vmem:[#allocation3 + $0x30] sm:$0xff] %vm1293_vm5, %v6778_v2 }
  0x2c   :  { %6025 = vmatmul.mubr.msk.f32.gmra.mrb[6].mxu0 %vm26_vm1, %v7159_v61  ;;  %v1684_v51 = vrot.slane %v7042_v52, 2  ;;  %v1685_v38 = vrot.slane %v7054_v56, 2  ;;  %v411_v55 = vrot.slane %v7044_v53, 2  ;;  %v412_v57 = vrot.slane %v7057_v58, 2  ;;  %2635 = vst.msk [vmem:[#allocation3 + $0x40] sm:$0xff] %vm1293_vm5, %v6778_v2  ;;  %2637 = vst.msk [vmem:[#allocation3 + $0x50] sm:$0xff] %vm1293_vm5, %v6778_v2 }
  0x2d   :  { %6151 = vmatmul.mubr.msk.f32.gmra.mrb[6].mxu1 %vm26_vm1, %v7165_v62  ;;  %6029 = vmatprep.mubr.msk.f32.mxu0 %vm26_vm1, %v6979_v19  ;;  %v7248_v50 = vsel %vm398_vm4, %v405_v26, %v406_v31  ;;  %v1687_v3 = vrot.slane %v7069_v63, 2  ;;  %v7258_v58 = vsel %vm398_vm4, %v408_v37, %v409_v42  ;;  %v414_v16 = vrot.slane %v7080_v5, 2  ;;  %v5391_v42 = vld [vmem:[%s8520_s5 + $0x14] sm:$0xf]  ;;  %2639 = vst.msk [vmem:[#allocation3 + $0x60] sm:$0xff] %vm1293_vm5, %v6778_v2 }
  0x2e   :  { %6155 = vmatprep.mubr.msk.f32.mxu1 %vm26_vm1, %v6983_v21  ;;  %v1678_v21 = vrot.slane %v6995_v29, 2  ;;  %v7270_v11 = vsel %vm398_vm4, %v411_v55, %v412_v57  ;;  %v415_v17 = vrot.slane %v7082_v6, 2  ;;  %v5498_v55 = vld [vmem:[%s8520_s5 + $0x18] sm:$0xf]  ;;  %2641 = vst.msk [vmem:[#allocation3 + $0x70] sm:$0xff] %vm1293_vm5, %v6778_v2  ;;  %2643 = vst.msk [vmem:[#allocation3 + $0x80] sm:$0xff] %vm1293_vm5, %v6778_v2 }
  0x2f   :  { %2645 = vst.msk [vmem:[#allocation3 + $0x90] sm:$0xff] %vm1293_vm5, %v6778_v2  ;;  %2647 = vst.msk [vmem:[#allocation3 + $0xa0] sm:$0xff] %vm1293_vm5, %v6778_v2 }
  0x30   :  { %6030 = vmatmul.mubr.msk.f32.vlgmr.msra.gmra.mrb[0].mxu0 %vm26_vm1, %v6991_v27  ;;  %2649 = vst.msk [vmem:[#allocation3 + $0xb0] sm:$0xff] %vm1293_vm5, %v6778_v2  ;;  %2651 = vst.msk [vmem:[#allocation3 + $0xc0] sm:$0xff] %vm1293_vm5, %v6778_v2 }
  0x31   :  { %6042 = vmatpush3.msk.msra.mxu0 %vm165_vm0, %v7015_v40  ;;  %6156 = vmatmul.mubr.msk.f32.vlgmr.msra.gmra.mrb[0].mxu1 %vm26_vm1, %v6995_v29  ;;  %v400_v40 = vrot.slane %v6981_v20, 2  ;;  %v1679_v20 = vrot.slane %v7000_v33, 2  ;;  %v1681_v33 = vrot.slane %v7010_v39, 2  ;;  %2653 = vst.msk [vmem:[#allocation3 + $0xd0] sm:$0xff] %vm1293_vm5, %v6778_v2  ;;  %2655 = vst.msk [vmem:[#allocation3 + $0xe0] sm:$0xff] %vm1293_vm5, %v6778_v2 }
  0x32   :  { %6168 = vmatpush3.msk.msra.mxu1 %vm165_vm0, %v7031_v47  ;;  %6032 = vmatprep.mubr.msk.f32.mxu0 %vm26_vm1, %v7002_v34  ;;  %v399_v47 = vrot.slane %v6979_v19, 2  ;;  %2657 = vst.msk [vmem:[#allocation3 + $0xf0] sm:$0xff] %vm1293_vm5, %v6778_v2  ;;  %2659 = vst.msk [vmem:[#allocation3 + $0x100] sm:$0xff] %vm1293_vm5, %v6778_v2 }
  0x33   :  { %6158 = vmatprep.mubr.msk.f32.mxu1 %vm26_vm1, %v7010_v39  ;;  %6055 = vmatprep.subr.msk.mxu0 %vm165_vm0, %v5371_v4  ;;  %v7245_v44 = vsel %vm398_vm4, %v1678_v21, %v1679_v20  ;;  %v7255_v56 = vsel %vm398_vm4, %v1681_v33, %v1682_v36  ;;  %v1691_v20 = vrot.slane %v7098_v12, 2  ;;  %v418_v21 = vrot.slane %v7115_v18, 2  ;;  %2661 = vst.msk [vmem:[#allocation3 + $0x110] sm:$0xff] %vm1293_vm5, %v6778_v2 }
  0x34   :  { %6033 = vmatmul.mubr.msk.f32.gmra.mrb[2].mxu0 %vm26_vm1, %v7026_v46  ;;  %6181 = vmatprep.subr.msk.mxu1 %vm165_vm0, %v5468_v10  ;;  %v401_v19 = vsel %vm398_vm4, %v399_v47, %v400_v40  ;;  %v1688_v40 = vrot.slane %v7071_v0, 2  ;;  %v5381_v47 = vld [vmem:[%s8520_s5 + $0x10] sm:$0xf]  ;;  %v7267_v0 = vsel %vm398_vm4, %v1684_v51, %v1685_v38  ;;  %v7300_v12 = vsel %vm398_vm4, %v414_v16, %v415_v17  ;;  %v5488_v51 = vld [vmem:[%s8520_s5 + $0x14] sm:$0xf] }
  0x35   :  { %6159 = vmatmul.mubr.msk.f32.gmra.mrb[2].mxu1 %vm26_vm1, %v7042_v52  ;;  %6035 = vmatprep.mubr.msk.f32.mxu0 %vm26_vm1, %v7044_v53  ;;  %v420_v18 = vrot.slane %v7118_v23, 2  ;;  %v1696_v33 = vrot.slane %v7137_v43, 2  ;;  %v1697_v36 = vrot.slane %v7139_v45, 2  ;;  %v5401_v38 = vld [vmem:[%s8520_s5 + $0x18] sm:$0xf]  ;;  %2663 = vst.msk [vmem:[#allocation3 + $0x120] sm:$0xff] %vm1293_vm5, %v6778_v2 }
  0x36   :  { %6161 = vmatprep.mubr.msk.f32.mxu1 %vm26_vm1, %v7069_v63  ;;  %v7287_v6 = vsel %vm398_vm4, %v1687_v3, %v1688_v40  ;;  %2665 = vst.msk [vmem:[#allocation3 + $0x130] sm:$0xff] %vm1293_vm5, %v6778_v2 }
  0x37   :  { %v7329_v45 = vsel %vm398_vm4, %v1696_v33, %v1697_v36  ;;  %2662 = vst.msk [vmem:[#allocation3 + $0x118] sm:$0x3] %vm2627_vm6, %v6778_v2  ;;  %2628 = vst.msk [vmem:[#allocation3 + $0x8] sm:$0x3] %vm2627_vm6, %v6778_v2 }
  0x38   :  { %6036 = vmatmul.mubr.msk.f32.gmra.mrb[4].mxu0 %vm26_vm1, %v7080_v5  ;;  %2630 = vst.msk [vmem:[#allocation3 + $0x18] sm:$0x3] %vm2627_vm6, %v6778_v2  ;;  %2632 = vst.msk [vmem:[#allocation3 + $0x28] sm:$0x3] %vm2627_vm6, %v6778_v2 }
  0x39   :  { %6162 = vmatmul.mubr.msk.f32.gmra.mrb[4].mxu1 %vm26_vm1, %v7084_v7  ;;  %6038 = vmatprep.mubr.msk.f32.mxu0 %vm26_vm1, %v7100_v13  ;;  %2634 = vst.msk [vmem:[#allocation3 + $0x38] sm:$0x3] %vm2627_vm6, %v6778_v2  ;;  %2636 = vst.msk [vmem:[#allocation3 + $0x48] sm:$0x3] %vm2627_vm6, %v6778_v2 }
  0x3a   :  { %6164 = vmatprep.mubr.msk.f32.mxu1 %vm26_vm1, %v7102_v14  ;;  %2638 = vst.msk [vmem:[#allocation3 + $0x58] sm:$0x3] %vm2627_vm6, %v6778_v2  ;;  %2640 = vst.msk [vmem:[#allocation3 + $0x68] sm:$0x3] %vm2627_vm6, %v6778_v2 }
  0x3b   :  { %2642 = vst.msk [vmem:[#allocation3 + $0x78] sm:$0x3] %vm2627_vm6, %v6778_v2  ;;  %2644 = vst.msk [vmem:[#allocation3 + $0x88] sm:$0x3] %vm2627_vm6, %v6778_v2 }
  0x3c   :  { %6039 = vmatmul.mubr.msk.f32.gmra.mrb[6].mxu0 %vm26_vm1, %v7118_v23  ;;  %2646 = vst.msk [vmem:[#allocation3 + $0x98] sm:$0x3] %vm2627_vm6, %v6778_v2  ;;  %2648 = vst.msk [vmem:[#allocation3 + $0xa8] sm:$0x3] %vm2627_vm6, %v6778_v2 }
  0x3d   :  { %6165 = vmatmul.mubr.msk.f32.gmra.mrb[6].mxu1 %vm26_vm1, %v7137_v43  ;;  %6043 = vmatprep.mubr.msk.f32.mxu0 %vm26_vm1, %v401_v19  ;;  %v417_v19 = vrot.slane %v7100_v13, 2  ;;  %2650 = vst.msk [vmem:[#allocation3 + $0xb8] sm:$0x3] %vm2627_vm6, %v6778_v2  ;;  %2652 = vst.msk [vmem:[#allocation3 + $0xc8] sm:$0x3] %vm2627_vm6, %v6778_v2 }
  0x3e   :  { %6169 = vmatprep.mubr.msk.f32.mxu1 %vm26_vm1, %v1677_v24  ;;  %v1693_v24 = vrot.slane %v7102_v14, 2  ;;  %2654 = vst.msk [vmem:[#allocation3 + $0xd8] sm:$0x3] %vm2627_vm6, %v6778_v2  ;;  %2656 = vst.msk [vmem:[#allocation3 + $0xe8] sm:$0x3] %vm2627_vm6, %v6778_v2 }
  0x3f   :  { %v7310_v31 = vsel %vm398_vm4, %v417_v19, %v418_v21  ;;  %2658 = vst.msk [vmem:[#allocation3 + $0xf8] sm:$0x3] %vm2627_vm6, %v6778_v2  ;;  %2660 = vst.msk [vmem:[#allocation3 + $0x108] sm:$0x3] %vm2627_vm6, %v6778_v2 }
  0x40   :  { %6044 = vmatmul.mubr.msk.f32.vlgmr.msra.gmra.mrb[0].mxu0 %vm26_vm1, %v7226_v28  ;;  %2664 = vst.msk [vmem:[#allocation3 + $0x128] sm:$0x3] %vm2627_vm6, %v6778_v2  ;;  %2666 = vst.msk [vmem:[#allocation3 + $0x138] sm:$0x3] %vm2627_vm6, %v6778_v2 }
  0x41   :  { %6056 = vmatpush3.msk.msra.mxu0 %vm165_vm0, %v5371_v4  ;;  %6170 = vmatmul.mubr.msk.f32.vlgmr.msra.gmra.mrb[0].mxu1 %vm26_vm1, %v7245_v44  ;;  %v1690_v4 = vrot.slane %v7084_v7, 2 }
  0x42   :  { %6182 = vmatpush3.msk.msra.mxu1 %vm165_vm0, %v5468_v10  ;;  %6046 = vmatprep.mubr.msk.f32.mxu0 %vm26_vm1, %v7248_v50  ;;  %v1694_v10 = vrot.slane %v7126_v30, 2  ;;  %v421_v30 = vrot.slane %v7129_v32, 2 }
  0x43   :  { %6172 = vmatprep.mubr.msk.f32.mxu1 %vm26_vm1, %v7255_v56  ;;  %6069 = vmatprep.subr.msk.mxu0 %vm165_vm0, %v5381_v47  ;;  %v7307_v26 = vsel %vm398_vm4, %v1690_v4, %v1691_v20  ;;  %v5508_v4 = vld [vmem:[%s8520_s5 + $0x1c] sm:$0xf]  ;;  %v7683_v2 = vld [vmem:[#allocation3 + $0xa8] sm:$0x3] }
  0x44   :  { %6047 = vmatmul.mubr.msk.f32.gmra.mrb[2].mxu0 %vm26_vm1, %v7258_v58  ;;  %6195 = vmatprep.subr.msk.mxu1 %vm165_vm0, %v5478_v22  ;;  %v7315_v37 = vsel %vm398_vm4, %v1693_v24, %v1694_v10  ;;  %v7324_v32 = vsel %vm398_vm4, %v420_v18, %v421_v30  ;;  %v5421_v10 = vld [vmem:[%s8520_s5 + $0x20] sm:$0xf] }
  0x45   :  { %6173 = vmatmul.mubr.msk.f32.gmra.mrb[2].mxu1 %vm26_vm1, %v7267_v0  ;;  %6049 = vmatprep.mubr.msk.f32.mxu0 %vm26_vm1, %v7270_v11  ;;  %v5518_v18 = vld [vmem:[%s8520_s5 + $0x20] sm:$0xf] }
  0x46   :  { %6175 = vmatprep.mubr.msk.f32.mxu1 %vm26_vm1, %v7287_v6 }
  0x48   :  { %6050 = vmatmul.mubr.msk.f32.gmra.mrb[4].mxu0 %vm26_vm1, %v7300_v12 }
  0x49   :  { %6176 = vmatmul.mubr.msk.f32.gmra.mrb[4].mxu1 %vm26_vm1, %v7307_v26  ;;  %6052 = vmatprep.mubr.msk.f32.mxu0 %vm26_vm1, %v7310_v31 }
  0x4a   :  { %6178 = vmatprep.mubr.msk.f32.mxu1 %vm26_vm1, %v7315_v37 }
  0x4c   :  { %6053 = vmatmul.mubr.msk.f32.gmra.mrb[6].mxu0 %vm26_vm1, %v7324_v32 }
  0x4d   :  { %6179 = vmatmul.mubr.msk.f32.gmra.mrb[6].mxu1 %vm26_vm1, %v7329_v45  ;;  %6057 = vmatprep.mubr.msk.f32.mxu0 %vm26_vm1, %v6991_v27  ;;  %v7371_v27 = vld [vmem:[#allocation2 + $0x80] sm:$0xff] }
  0x4e   :  { %6183 = vmatprep.mubr.msk.f32.mxu1 %vm26_vm1, %v6995_v29  ;;  %v7375_v29 = vld [vmem:[#allocation2 + $0x120] sm:$0xff]  ;;  %v679_v57 = vrot.slane %v7371_v27, 1 }
  0x4f   :  { %v1953_v40 = vrot.slane %v7375_v29, 1  ;;  %v2075_v20 = vrot.slane %v7375_v29, 2 }
  0x50   :  { %6058 = vmatmul.mubr.msk.f32.vlgmr.msra.gmra.mrb[0].mxu0 %vm26_vm1, %v7002_v34 }
  0x51   :  { %6070 = vmatpush3.msk.msra.mxu0 %vm165_vm0, %v5381_v47  ;;  %6184 = vmatmul.mubr.msk.f32.vlgmr.msra.gmra.mrb[0].mxu1 %vm26_vm1, %v7010_v39 }
  0x52   :  { %6196 = vmatpush3.msk.msra.mxu1 %vm165_vm0, %v5478_v22  ;;  %6060 = vmatprep.mubr.msk.f32.mxu0 %vm26_vm1, %v7026_v46  ;;  %v5411_v22 = vld [vmem:[%s8520_s5 + $0x1c] sm:$0xf] }
  0x53   :  { %6186 = vmatprep.mubr.msk.f32.mxu1 %vm26_vm1, %v7042_v52  ;;  %6083 = vmatprep.subr.msk.mxu0 %vm165_vm0, %v5391_v42 }
  0x54   :  { %6061 = vmatmul.mubr.msk.f32.gmra.mrb[2].mxu0 %vm26_vm1, %v7044_v53  ;;  %6209 = vmatprep.subr.msk.mxu1 %vm165_vm0, %v5488_v51 }
  0x55   :  { %6187 = vmatmul.mubr.msk.f32.gmra.mrb[2].mxu1 %vm26_vm1, %v7069_v63  ;;  %6063 = vmatprep.mubr.msk.f32.mxu0 %vm26_vm1, %v7080_v5 }
  0x56   :  { %6189 = vmatprep.mubr.msk.f32.mxu1 %vm26_vm1, %v7084_v7 }
  0x58   :  { %6064 = vmatmul.mubr.msk.f32.gmra.mrb[4].mxu0 %vm26_vm1, %v7100_v13 }
  0x59   :  { %6190 = vmatmul.mubr.msk.f32.gmra.mrb[4].mxu1 %vm26_vm1, %v7102_v14  ;;  %6066 = vmatprep.mubr.msk.f32.mxu0 %vm26_vm1, %v7118_v23 }
  0x5a   :  { %6192 = vmatprep.mubr.msk.f32.mxu1 %vm26_vm1, %v7137_v43 }
  0x5c   :  { %6067 = vmatmul.mubr.msk.f32.gmra.mrb[6].mxu0 %vm26_vm1, %v7371_v27 }
  0x5d   :  { %6193 = vmatmul.mubr.msk.f32.gmra.mrb[6].mxu1 %vm26_vm1, %v7375_v29  ;;  %6071 = vmatprep.mubr.msk.f32.mxu0 %vm26_vm1, %v7019_v41  ;;  %v102_v41 = vld [vmem:[#allocation2 + $0x88] sm:$0x3] }
  0x5e   :  { %6197 = vmatprep.mubr.msk.f32.mxu1 %vm26_vm1, %v7036_v48  ;;  %v1382_v48 = vld [vmem:[#allocation2 + $0x128] sm:$0x3]  ;;  %v680_v3 = vrot.slane %v102_v41, 1 }
  0x5f   :  { %v1954_v47 = vrot.slane %v1382_v48, 1  ;;  %v2076_v19 = vrot.slane %v1382_v48, 2 }
  0x60   :  { %6072 = vmatmul.mubr.msk.f32.vlgmr.msra.gmra.mrb[0].mxu0 %vm26_vm1, %v7051_v54  ;;  %v7420_v16 = vsel %vm122_vm3, %v679_v57, %v680_v3 }
  0x61   :  { %6084 = vmatpush3.msk.msra.mxu0 %vm165_vm0, %v5391_v42  ;;  %6198 = vmatmul.mubr.msk.f32.vlgmr.msra.gmra.mrb[0].mxu1 %vm26_vm1, %v7064_v59  ;;  %v7425_v17 = vsel %vm122_vm3, %v1953_v40, %v1954_v47  ;;  %v7475_v24 = vsel %vm398_vm4, %v2075_v20, %v2076_v19 }
  0x62   :  { %6210 = vmatpush3.msk.msra.mxu1 %vm165_vm0, %v5488_v51  ;;  %6074 = vmatprep.mubr.msk.f32.mxu0 %vm26_vm1, %v7076_v1 }
  0x63   :  { %6200 = vmatprep.mubr.msk.f32.mxu1 %vm26_vm1, %v7091_v8  ;;  %6097 = vmatprep.subr.msk.mxu0 %vm165_vm0, %v5401_v38 }
  0x64   :  { %6075 = vmatmul.mubr.msk.f32.gmra.mrb[2].mxu0 %vm26_vm1, %v7094_v9  ;;  %6223 = vmatprep.subr.msk.mxu1 %vm165_vm0, %v5498_v55 }
  0x65   :  { %6201 = vmatmul.mubr.msk.f32.gmra.mrb[2].mxu1 %vm26_vm1, %v7111_v15  ;;  %6077 = vmatprep.mubr.msk.f32.mxu0 %vm26_vm1, %v7123_v25 }
  0x66   :  { %6203 = vmatprep.mubr.msk.f32.mxu1 %vm26_vm1, %v7132_v35 }
  0x68   :  { %6078 = vmatmul.mubr.msk.f32.gmra.mrb[4].mxu0 %vm26_vm1, %v7144_v49 }
  0x69   :  { %6204 = vmatmul.mubr.msk.f32.gmra.mrb[4].mxu1 %vm26_vm1, %v7156_v60  ;;  %6080 = vmatprep.mubr.msk.f32.mxu0 %vm26_vm1, %v7159_v61 }
  0x6a   :  { %6206 = vmatprep.mubr.msk.f32.mxu1 %vm26_vm1, %v7165_v62 }
  0x6c   :  { %6081 = vmatmul.mubr.msk.f32.gmra.mrb[6].mxu0 %vm26_vm1, %v7420_v16 }
  0x6d   :  { %6207 = vmatmul.mubr.msk.f32.gmra.mrb[6].mxu1 %vm26_vm1, %v7425_v17  ;;  %6085 = vmatprep.mubr.msk.f32.mxu0 %vm26_vm1, %v7226_v28  ;;  %v802_v28 = vrot.slane %v7371_v27, 2 }
  0x6e   :  { %6211 = vmatprep.mubr.msk.f32.mxu1 %vm26_vm1, %v7245_v44  ;;  %v803_v44 = vrot.slane %v102_v41, 2 }
  0x70   :  { %6086 = vmatmul.mubr.msk.f32.vlgmr.msra.gmra.mrb[0].mxu0 %vm26_vm1, %v7248_v50  ;;  %v7470_v21 = vsel %vm398_vm4, %v802_v28, %v803_v44 }
  0x71   :  { %6098 = vmatpush3.msk.msra.mxu0 %vm165_vm0, %v5401_v38  ;;  %6212 = vmatmul.mubr.msk.f32.vlgmr.msra.gmra.mrb[0].mxu1 %vm26_vm1, %v7255_v56 }
  0x72   :  { %6224 = vmatpush3.msk.msra.mxu1 %vm165_vm0, %v5498_v55  ;;  %6088 = vmatprep.mubr.msk.f32.mxu0 %vm26_vm1, %v7258_v58 }
  0x73   :  { %6214 = vmatprep.mubr.msk.f32.mxu1 %vm26_vm1, %v7267_v0  ;;  %6111 = vmatprep.subr.msk.mxu0 %vm165_vm0, %v5411_v22 }
  0x74   :  { %6089 = vmatmul.mubr.msk.f32.gmra.mrb[2].mxu0 %vm26_vm1, %v7270_v11  ;;  %6237 = vmatprep.subr.msk.mxu1 %vm165_vm0, %v5508_v4 }
  0x75   :  { %6215 = vmatmul.mubr.msk.f32.gmra.mrb[2].mxu1 %vm26_vm1, %v7287_v6  ;;  %6091 = vmatprep.mubr.msk.f32.mxu0 %vm26_vm1, %v7300_v12 }
  0x76   :  { %6217 = vmatprep.mubr.msk.f32.mxu1 %vm26_vm1, %v7307_v26 }
  0x78   :  { %6092 = vmatmul.mubr.msk.f32.gmra.mrb[4].mxu0 %vm26_vm1, %v7310_v31 }
  0x79   :  { %6218 = vmatmul.mubr.msk.f32.gmra.mrb[4].mxu1 %vm26_vm1, %v7315_v37  ;;  %6094 = vmatprep.mubr.msk.f32.mxu0 %vm26_vm1, %v7324_v32 }
  0x7a   :  { %6220 = vmatprep.mubr.msk.f32.mxu1 %vm26_vm1, %v7329_v45 }
  0x7c   :  { %6095 = vmatmul.mubr.msk.f32.gmra.mrb[6].mxu0 %vm26_vm1, %v7470_v21 }
  0x7d   :  { %6221 = vmatmul.mubr.msk.f32.gmra.mrb[6].mxu1 %vm26_vm1, %v7475_v24  ;;  %6099 = vmatprep.mubr.msk.f32.mxu0 %vm26_vm1, %v7002_v34  ;;  %v103_v34 = vld [vmem:[#allocation2 + $0x90] sm:$0xff] }
  0x7e   :  { %6225 = vmatprep.mubr.msk.f32.mxu1 %vm26_vm1, %v7010_v39  ;;  %v1383_v39 = vld [vmem:[#allocation2 + $0x130] sm:$0xff] }
  0x80   :  { %6100 = vmatmul.mubr.msk.f32.vlgmr.msra.gmra.mrb[0].mxu0 %vm26_vm1, %v7026_v46  ;;  %v104_v46 = vld [vmem:[#allocation2 + $0x98] sm:$0x3] }
  0x81   :  { %6112 = vmatpush3.msk.msra.mxu0 %vm165_vm0, %v5411_v22  ;;  %6226 = vmatmul.mubr.msk.f32.vlgmr.msra.gmra.mrb[0].mxu1 %vm26_vm1, %v7042_v52  ;;  %v1384_v52 = vld [vmem:[#allocation2 + $0x138] sm:$0x3] }
  0x82   :  { %6238 = vmatpush3.msk.msra.mxu1 %vm165_vm0, %v5508_v4  ;;  %6102 = vmatprep.mubr.msk.f32.mxu0 %vm26_vm1, %v7044_v53  ;;  %v1047_v53 = vrot.slane %v103_v34, 1 }
  0x83   :  { %6228 = vmatprep.mubr.msk.f32.mxu1 %vm26_vm1, %v7069_v63  ;;  %6125 = vmatprep.subr.msk.mxu0 %vm165_vm0, %v5421_v10  ;;  %v2319_v63 = vrot.slane %v1384_v52, 1 }
  0x84   :  { %6103 = vmatmul.mubr.msk.f32.gmra.mrb[2].mxu0 %vm26_vm1, %v7080_v5  ;;  %6251 = vmatprep.subr.msk.mxu1 %vm165_vm0, %v5518_v18 }
  0x85   :  { %6229 = vmatmul.mubr.msk.f32.gmra.mrb[2].mxu1 %vm26_vm1, %v7084_v7  ;;  %6105 = vmatprep.mubr.msk.f32.mxu0 %vm26_vm1, %v7100_v13  ;;  %v1170_v7 = vrot.slane %v103_v34, 2  ;;  %v2441_v13 = vrot.slane %v1384_v52, 2 }
  0x86   :  { %6231 = vmatprep.mubr.msk.f32.mxu1 %vm26_vm1, %v7102_v14 }
  0x88   :  { %6106 = vmatmul.mubr.msk.f32.gmra.mrb[4].mxu0 %vm26_vm1, %v7118_v23  ;;  %v7667_v23 = vld [vmem:[#allocation3] sm:$0xff] }
  0x89   :  { %6232 = vmatmul.mubr.msk.f32.gmra.mrb[4].mxu1 %vm26_vm1, %v7137_v43  ;;  %6108 = vmatprep.mubr.msk.f32.mxu0 %vm26_vm1, %v7371_v27  ;;  %v5528_v43 = vld [vmem:[%s8522_s6 + $0x8] sm:$0xff] }
  0x8a   :  { %6234 = vmatprep.mubr.msk.f32.mxu1 %vm26_vm1, %v7375_v29 }
  0x8c   :  { %6109 = vmatmul.mubr.msk.f32.gmra.mrb[6].mxu0 %vm26_vm1, %v103_v34 }
  0x8d   :  { %6235 = vmatmul.mubr.msk.f32.gmra.mrb[6].mxu1 %vm26_vm1, %v1383_v39  ;;  %6113 = vmatprep.mubr.msk.f32.mxu0 %vm26_vm1, %v7051_v54  ;;  %v1048_v54 = vrot.slane %v104_v46, 1 }
  0x8e   :  { %6239 = vmatprep.mubr.msk.f32.mxu1 %vm26_vm1, %v7064_v59  ;;  %v2318_v59 = vrot.slane %v1383_v39, 1 }
  0x90   :  { %6114 = vmatmul.mubr.msk.f32.vlgmr.msra.gmra.mrb[0].mxu0 %vm26_vm1, %v7076_v1  ;;  %v1049_v1 = vsel %vm122_vm3, %v1047_v53, %v1048_v54  ;;  %v2320_v5 = vsel %vm122_vm3, %v2318_v59, %v2319_v63 }
  0x91   :  { %6126 = vmatpush3.msk.msra.mxu0 %vm165_vm0, %v5421_v10  ;;  %6240 = vmatmul.mubr.msk.f32.vlgmr.msra.gmra.mrb[0].mxu1 %vm26_vm1, %v7091_v8  ;;  %v1171_v8 = vrot.slane %v104_v46, 2 }
  0x92   :  { %6252 = vmatpush3.msk.msra.mxu1 %vm165_vm0, %v5518_v18  ;;  %6116 = vmatprep.mubr.msk.f32.mxu0 %vm26_vm1, %v7094_v9  ;;  %v2440_v9 = vrot.slane %v1383_v39, 2 }
  0x93   :  { %6242 = vmatprep.mubr.msk.f32.mxu1 %vm26_vm1, %v7111_v15  ;;  %v1172_v14 = vsel %vm398_vm4, %v1170_v7, %v1171_v8  ;;  %6265 = vmatprep.subr.mxu0 %v5528_v43 }
  0x94   :  { %6117 = vmatmul.mubr.msk.f32.gmra.mrb[2].mxu0 %vm26_vm1, %v7123_v25  ;;  %v2442_v15 = vsel %vm398_vm4, %v2440_v9, %v2441_v13  ;;  %v7669_v25 = vld [vmem:[#allocation3 + $0x8] sm:$0x3]  ;;  %6391 = vmatprep.subr.mxu1 %v5528_v43 }
  0x95   :  { %6243 = vmatmul.mubr.msk.f32.gmra.mrb[2].mxu1 %vm26_vm1, %v7132_v35  ;;  %6119 = vmatprep.mubr.msk.f32.mxu0 %vm26_vm1, %v7144_v49  ;;  %v7671_v35 = vld [vmem:[#allocation3 + $0xa0] sm:$0xff]  ;;  %v2749_v49 = vrot.slane %v7667_v23, 1 }
  0x96   :  { %6245 = vmatprep.mubr.msk.f32.mxu1 %vm26_vm1, %v7156_v60  ;;  %v2750_v60 = vrot.slane %v7669_v25, 1 }
  0x98   :  { %6120 = vmatmul.mubr.msk.f32.gmra.mrb[4].mxu0 %vm26_vm1, %v7159_v61  ;;  %v7681_v61 = vld [vmem:[%s8522_s6] sm:$0xff] }
  0x99   :  { %6246 = vmatmul.mubr.msk.f32.gmra.mrb[4].mxu1 %vm26_vm1, %v7165_v62  ;;  %6122 = vmatprep.mubr.msk.f32.mxu0 %vm26_vm1, %v7420_v16  ;;  %v4013_v62 = vrot.slane %v7671_v35, 1 }
  0x9a   :  { %6248 = vmatprep.mubr.msk.f32.mxu1 %vm26_vm1, %v7425_v17 }
  0x9c   :  { %6123 = vmatmul.mubr.msk.f32.gmra.mrb[6].mxu0 %vm26_vm1, %v1049_v1 }
  0x9d   :  { %6249 = vmatmul.mubr.msk.f32.gmra.mrb[6].mxu1 %vm26_vm1, %v2320_v5  ;;  %6127 = vmatprep.mubr.msk.f32.mxu0 %vm26_vm1, %v7248_v50  ;;  %v4014_v50 = vrot.slane %v7683_v2, 1 }
  0x9e   :  { %6253 = vmatprep.mubr.msk.f32.mxu1 %vm26_vm1, %v7255_v56  ;;  %v2751_v56 = vsel %vm122_vm3, %v2749_v49, %v2750_v60 }
  0xa0   :  { %6128 = vmatmul.mubr.msk.f32.vlgmr.msra.gmra.mrb[0].mxu0 %vm26_vm1, %v7258_v58  ;;  %v4015_v58 = vsel %vm122_vm3, %v4013_v62, %v4014_v50 }
  0xa1   :  { %6254 = vmatmul.mubr.msk.f32.vlgmr.msra.gmra.mrb[0].mxu1 %vm26_vm1, %v7267_v0  ;;  %6130 = vmatprep.mubr.msk.f32.mxu0 %vm26_vm1, %v7270_v11 }
  0xa2   :  { %6256 = vmatprep.mubr.msk.f32.mxu1 %vm26_vm1, %v7287_v6  ;;  %6266 = vmatpush3.msra.mxu0 %v5528_v43 }
  0xa3   :  { %6392 = vmatpush3.msra.mxu1 %v5528_v43  ;;  %6279 = vmatprep.subr.mxu0 %v7681_v61 }
  0xa4   :  { %6131 = vmatmul.mubr.msk.f32.gmra.mrb[2].mxu0 %vm26_vm1, %v7300_v12  ;;  %6405 = vmatprep.subr.mxu1 %v7681_v61 }
  0xa5   :  { %6257 = vmatmul.mubr.msk.f32.gmra.mrb[2].mxu1 %vm26_vm1, %v7307_v26  ;;  %6133 = vmatprep.mubr.msk.f32.mxu0 %vm26_vm1, %v7310_v31 }
  0xa6   :  { %6259 = vmatprep.mubr.msk.f32.mxu1 %vm26_vm1, %v7315_v37 }
  0xa8   :  { %6134 = vmatmul.mubr.msk.f32.gmra.mrb[4].mxu0 %vm26_vm1, %v7324_v32 }
  0xa9   :  { %6260 = vmatmul.mubr.msk.f32.gmra.mrb[4].mxu1 %vm26_vm1, %v7329_v45  ;;  %6136 = vmatprep.mubr.msk.f32.mxu0 %vm26_vm1, %v7470_v21 }
  0xaa   :  { %6262 = vmatprep.mubr.msk.f32.mxu1 %vm26_vm1, %v7475_v24 }
  0xac   :  { %6137 = vmatmul.mubr.msk.f32.gmra.mrb[6].mxu0 %vm26_vm1, %v1172_v14 }
  0xad   :  { %6263 = vmatmul.mubr.msk.f32.gmra.mrb[6].mxu1 %vm26_vm1, %v2442_v15  ;;  %6267 = vmatprep.mubr.msk.f32.mxu0 %vm1293_vm5, %v2751_v56 }
  0xae   :  { %6393 = vmatprep.mubr.msk.f32.mxu1 %vm1293_vm5, %v4015_v58 }
 0x173   :  { %v7693_v0 = vpop.f32.mrb[0].mxu0 }
 0x174   :  { %v1295_v11 = vsel %vm1293_vm5, %v7693_v0, 0.0  ;;  %v1317_v6 = vmul.f32 %v7693_v0, %v7693_v0  ;;  %v7699_v12 = vpop.f32.mrb[0].mxu1  ;;  %v7701_v30 = vpop.f32.mrb[1].mxu0 }
 0x175   :  { %v2563_v26 = vsel %vm1293_vm5, %v7699_v12, 0.0  ;;  %v2585_v31 = vmul.f32 %v7699_v12, %v7699_v12  ;;  %v1294_v33 = vsel %vm1293_vm5, %v7701_v30, 0.0  ;;  %v1316_v36 = vmul.f32 %v7701_v30, %v7701_v30  ;;  %v7711_v37 = vpop.f32.mrb[1].mxu1 }
 0x176   :  { %v1325_v32 = vsel %vm1293_vm5, %v1317_v6, 0.0  ;;  %v1296_v45 = vadd.f32 %v1295_v11, %v1294_v33  ;;  %v2562_v42 = vsel %vm1293_vm5, %v7711_v37, 0.0  ;;  %v2584_v51 = vmul.f32 %v7711_v37, %v7711_v37 }
 0x177   :  { %v2593_v27 = vsel %vm1293_vm5, %v2585_v31, 0.0  ;;  %v1324_v29 = vsel %vm1293_vm5, %v1316_v36, 0.0  ;;  %v2564_v38 = vadd.f32 %v2563_v26, %v2562_v42  ;;  %v7720_v55 = vpop.f32.mrb[2].mxu0 }
 0x178   :  { %v1326_v41 = vadd.f32 %v1325_v32, %v1324_v29  ;;  %v2592_v48 = vsel %vm1293_vm5, %v2584_v51, 0.0  ;;  %v1319_v57 = vmul.f32 %v7720_v55, %v7720_v55  ;;  %v7725_v3 = vpop.f32.mrb[2].mxu1  ;;  %v7727_v40 = vpop.f32.mrb[3].mxu0  ;;  %v1299_v20 = vsel %vm1293_vm5, %v7720_v55, 0.0 }
 0x179   :  { %v2594_v47 = vadd.f32 %v2593_v27, %v2592_v48  ;;  %v2587_v16 = vmul.f32 %v7725_v3, %v7725_v3  ;;  %v1297_v17 = vsel %vm1293_vm5, %v7727_v40, 0.0  ;;  %v7733_v22 = vpop.f32.mrb[3].mxu1  ;;  %v1318_v28 = vmul.f32 %v7727_v40, %v7727_v40 }
 0x17a   :  { %v1298_v4 = vadd.f32 %v1297_v17, %v1296_v45  ;;  %v2565_v44 = vsel %vm1293_vm5, %v7733_v22, 0.0  ;;  %v2586_v21 = vmul.f32 %v7733_v22, %v7733_v22  ;;  %v1329_v10 = vsel %vm1293_vm5, %v1319_v57, 0.0 }
 0x17b   :  { %v2566_v19 = vadd.f32 %v2565_v44, %v2564_v38  ;;  %v7743_v24 = vpop.f32.mrb[4].mxu0  ;;  %v2567_v18 = vsel %vm1293_vm5, %v7725_v3, 0.0  ;;  %v1327_v34 = vsel %vm1293_vm5, %v1318_v28, 0.0  ;;  %v2597_v53 = vsel %vm1293_vm5, %v2587_v16, 0.0 }
 0x17c   :  { %v7749_v39 = vpop.f32.mrb[4].mxu1  ;;  %v7751_v46 = vpop.f32.mrb[5].mxu0  ;;  %v1300_v52 = vadd.f32 %v1299_v20, %v1298_v4  ;;  %v1328_v54 = vadd.f32 %v1327_v34, %v1326_v41  ;;  %v2595_v59 = vsel %vm1293_vm5, %v2586_v21, 0.0  ;;  %v1321_v63 = vmul.f32 %v7743_v24, %v7743_v24 }
 0x17d   :  { %v7757_v1 = vpop.f32.mrb[5].mxu1  ;;  %v2596_v5 = vadd.f32 %v2595_v59, %v2594_v47  ;;  %v2589_v7 = vmul.f32 %v7749_v39, %v7749_v39  ;;  %v1301_v8 = vsel %vm1293_vm5, %v7751_v46, 0.0  ;;  %v1320_v9 = vmul.f32 %v7751_v46, %v7751_v46 }
 0x17e   :  { %v1303_v13 = vsel %vm1293_vm5, %v7743_v24, 0.0  ;;  %v1302_v14 = vadd.f32 %v1301_v8, %v1300_v52  ;;  %v1330_v15 = vadd.f32 %v1329_v10, %v1328_v54  ;;  %v2568_v43 = vadd.f32 %v2567_v18, %v2566_v19 }
 0x17f   :  { %v7767_v49 = vpop.f32.mrb[6].mxu0  ;;  %v1331_v60 = vsel %vm1293_vm5, %v1320_v9, 0.0  ;;  %v2569_v62 = vsel %vm1293_vm5, %v7757_v1, 0.0  ;;  %v2588_v50 = vmul.f32 %v7757_v1, %v7757_v1  ;;  %v2598_v56 = vadd.f32 %v2597_v53, %v2596_v5 }
 0x180   :  { %v7774_v58 = vpop.f32.mrb[6].mxu1  ;;  %v7776_v11 = vpop.f32.mrb[7].mxu0  ;;  %v1333_v6 = vsel %vm1293_vm5, %v1321_v63, 0.0  ;;  %v2571_v26 = vsel %vm1293_vm5, %v7749_v39, 0.0  ;;  %v1332_v31 = vadd.f32 %v1331_v60, %v1330_v15  ;;  %v2570_v33 = vadd.f32 %v2569_v62, %v2568_v43 }
 0x181   :  { %v7781_v36 = vpop.f32.mrb[7].mxu1  ;;  %v2601_v32 = vsel %vm1293_vm5, %v2589_v7, 0.0  ;;  %v2599_v45 = vsel %vm1293_vm5, %v2588_v50, 0.0  ;;  %v1307_v42 = vsel %vm1293_vm5, %v7767_v49, 0.0  ;;  %v1304_v51 = vadd.f32 %v1303_v13, %v1302_v14 }
 0x182   :  { %v2600_v27 = vadd.f32 %v2599_v45, %v2598_v56  ;;  %v1323_v29 = vmul.f32 %v7767_v49, %v7767_v49  ;;  %v1305_v38 = vsel %vm1293_vm5, %v7776_v11, 0.0  ;;  %v1322_v41 = vmul.f32 %v7776_v11, %v7776_v11 }
 0x183   :  { %v2591_v48 = vmul.f32 %v7774_v58, %v7774_v58  ;;  %v1306_v57 = vadd.f32 %v1305_v38, %v1304_v51  ;;  %v1334_v47 = vadd.f32 %v1333_v6, %v1332_v31  ;;  %v2572_v16 = vadd.f32 %v2571_v26, %v2570_v33 }
 0x184   :  { %v1335_v17 = vsel %vm1293_vm5, %v1322_v41, 0.0  ;;  %v2573_v4 = vsel %vm1293_vm5, %v7781_v36, 0.0  ;;  %v2590_v28 = vmul.f32 %v7781_v36, %v7781_v36  ;;  %v2602_v44 = vadd.f32 %v2601_v32, %v2600_v27 }
 0x185   :  { %v1308_v20 = vadd.f32 %v1307_v42, %v1306_v57  ;;  %v1336_v19 = vadd.f32 %v1335_v17, %v1334_v47  ;;  %v2574_v21 = vadd.f32 %v2573_v4, %v2572_v16  ;;  %v1337_v10 = vsel %vm1293_vm5, %v1323_v29, 0.0 }
 0x186   :  { %v2575_v18 = vsel %vm1293_vm5, %v7774_v58, 0.0  ;;  %v2603_v34 = vsel %vm1293_vm5, %v2590_v28, 0.0  ;;  %v2605_v63 = vsel %vm1293_vm5, %v2591_v48, 0.0 }
 0x187   :  { %v1309_v52 = vrot.slane %v1308_v20, 4  ;;  %v1338_v53 = vadd.f32 %v1337_v10, %v1336_v19  ;;  %v2576_v54 = vadd.f32 %v2575_v18, %v2574_v21  ;;  %v2604_v59 = vadd.f32 %v2603_v34, %v2602_v44  ;;  %v2619_v21 = vld [vmem:[%s8523_s1] sm:$0x1] }
 0x189   :  { %v1310_v5 = vadd.f32 %v1309_v52, %v1308_v20  ;;  %v1339_v7 = vrot.slane %v1338_v53, 4  ;;  %v2577_v8 = vrot.slane %v2576_v54, 4  ;;  %v2606_v9 = vadd.f32 %v2605_v63, %v2604_v59  ;;  %v2623_v52 = vld [vmem:[%s8524_s2] sm:$0x1] }
 0x18a   :  { %v2668_v20 = vlaneseq }
 0x18b   :  { %v1311_v13 = vrot.slane %v1310_v5, 2  ;;  %v1340_v14 = vadd.f32 %v1339_v7, %v1338_v53  ;;  %v2578_v15 = vadd.f32 %v2577_v8, %v2576_v54  ;;  %v2607_v43 = vrot.slane %v2606_v9, 4 }
 0x18c   :  { %v2669_v19 = vshrl.u32 %v2668_v20, 7 }
 0x18d   :  { %v1312_v60 = vadd.f32 %v1311_v13, %v1310_v5  ;;  %v1341_v62 = vrot.slane %v1340_v14, 2  ;;  %v2579_v50 = vrot.slane %v2578_v15, 2  ;;  %v2608_v56 = vadd.f32 %v2607_v43, %v2606_v9 }
 0x18e   :  { %v7808_v10 = vsub.s32 0, %v2669_v19 }
 0x18f   :  { %v1313_v6 = vrot.slane %v1312_v60, 1  ;;  %v1342_v26 = vadd.f32 %v1341_v62, %v1340_v14  ;;  %v2580_v31 = vadd.f32 %v2579_v50, %v2578_v15  ;;  %v2609_v33 = vrot.slane %v2608_v56, 2 }
 0x191   :  { %v1314_v32 = vadd.f32 %v1313_v6, %v1312_v60  ;;  %v1343_v45 = vrot.slane %v1342_v26, 1  ;;  %v2581_v42 = vrot.slane %v2580_v31, 1  ;;  %v2610_v51 = vadd.f32 %v2609_v33, %v2608_v56 }
 0x193   :  { %v1344_v27 = vadd.f32 %v1343_v45, %v1342_v26  ;;  %v2582_v29 = vadd.f32 %v2581_v42, %v2580_v31  ;;  %v2611_v38 = vrot.slane %v2610_v51, 1 }
 0x195   :  { %v2583_v41 = vadd.f32 %v2582_v29, %v1314_v32  ;;  %v2612_v48 = vadd.f32 %v2611_v38, %v2610_v51 }
 0x197   :  { %v2613_v57 = vadd.f32 %v2612_v48, %v1344_v27  ;;  %v2614_v47 = vmul.f32 0.0078125, %v2583_v41 }
 0x199   :  { %v2615_v16 = vmul.f32 0.0078125, %v2613_v57  ;;  %v2616_v17 = vmul.f32 %v2614_v47, %v2614_v47 }
 0x19b   :  { %v2617_v4 = vsub.f32 %v2615_v16, %v2616_v17 }
 0x19d   :  { %v2618_v28 = vmax.f32 %v2617_v4, 0.0 }
 0x19f   :  { %v2620_v44 = vadd.f32 1e-05, %v2618_v28 }
 0x1a1   :  { %6774 = vrsqrt.f32 %v2620_v44 }
 0x1ab   :  { %v6775_v18 = vpop.eup %6774 }
 0x1ac   :  { %v2622_v34 = vmul.f32 %v6775_v18, %v2619_v21 }
 0x1ae   :  { %v2624_v53 = vmul.f32 %v2622_v34, %v2614_v47  ;;  %v2671_v54 = vrot.slane %v2622_v34, %v7808_v10 }
 0x1b0   :  { %v2625_v59 = vsub.f32 %v2623_v52, %v2624_v53  ;;  %v3948_v63 = vmul.f32 %v2671_v54, %v7781_v36  ;;  %v2673_v5 = vmul.f32 %v2671_v54, %v7701_v30  ;;  %v3942_v7 = vmul.f32 %v2671_v54, %v7711_v37 }
 0x1b1   :  { %v2674_v8 = vmul.f32 %v7693_v0, %v2671_v54  ;;  %v3943_v9 = vmul.f32 %v7699_v12, %v2671_v54  ;;  %v2675_v13 = vmul.f32 %v2671_v54, %v7727_v40  ;;  %v3944_v14 = vmul.f32 %v2671_v54, %v7733_v22 }
 0x1b2   :  { %v2685_v15 = vrot.slane %v2625_v59, %v7808_v10  ;;  %v2676_v43 = vmul.f32 %v7720_v55, %v2671_v54  ;;  %v3945_v60 = vmul.f32 %v7725_v3, %v2671_v54  ;;  %v2677_v36 = vmul.f32 %v2671_v54, %v7751_v46 }
 0x1b3   :  { %v3946_v30 = vmul.f32 %v2671_v54, %v7757_v1  ;;  %v2678_v37 = vmul.f32 %v7743_v24, %v2671_v54  ;;  %v3947_v0 = vmul.f32 %v7749_v39, %v2671_v54  ;;  %v2679_v12 = vmul.f32 %v2671_v54, %v7776_v11 }
 0x1b4   :  { %v3956_v62 = vadd.f32 %v3948_v63, %v2685_v15  ;;  %v2687_v40 = vadd.f32 %v2685_v15, %v2673_v5  ;;  %v3950_v50 = vadd.f32 %v3942_v7, %v2685_v15  ;;  %v2688_v22 = vadd.f32 %v2685_v15, %v2674_v8 }
 0x1b5   :  { %v3951_v56 = vadd.f32 %v3943_v9, %v2685_v15  ;;  %v2689_v6 = vadd.f32 %v2685_v15, %v2675_v13  ;;  %v3952_v26 = vadd.f32 %v3944_v14, %v2685_v15  ;;  %v2690_v55 = vadd.f32 %v2685_v15, %v2676_v43  ;;  %v7871_v9 = vld [vmem:[%s8522_s6 + $0x10] sm:$0xff] }
 0x1b6   :  { %v3964_v31 = vmax.f32 %v3956_v62, 0.0  ;;  %v2695_v3 = vmax.f32 %v2687_v40, 0.0  ;;  %v3958_v33 = vmax.f32 %v3950_v50, 0.0  ;;  %v2696_v46 = vmax.f32 %v2688_v22, 0.0 }
 0x1b7   :  { %v3959_v32 = vmax.f32 %v3951_v56, 0.0  ;;  %v2697_v1 = vmax.f32 %v2689_v6, 0.0  ;;  %v3960_v45 = vmax.f32 %v3952_v26, 0.0  ;;  %v2698_v24 = vmax.f32 %v2690_v55, 0.0 }
 0x1b8   :  { %3973 = vst.msk [vmem:[#allocation3 + $0x111] sm:$0xff] %vm1293_vm5, %v3964_v31  ;;  %2704 = vst.msk [vmem:[#allocation3 + $0x11] sm:$0xff] %vm1293_vm5, %v2695_v3  ;;  %v3953_v39 = vadd.f32 %v3945_v60, %v2685_v15  ;;  %v2691_v11 = vadd.f32 %v2685_v15, %v2677_v36  ;;  %v3954_v42 = vadd.f32 %v3946_v30, %v2685_v15 }
 0x1b9   :  { %3967 = vst.msk [vmem:[#allocation3 + $0xb1] sm:$0xff] %vm1293_vm5, %v3958_v33  ;;  %2705 = vst.msk [vmem:[#allocation3 + $0x21] sm:$0xff] %vm1293_vm5, %v2696_v46  ;;  %v2692_v51 = vadd.f32 %v2685_v15, %v2678_v37  ;;  %v3955_v27 = vadd.f32 %v3947_v0, %v2685_v15  ;;  %v2693_v29 = vadd.f32 %v2685_v15, %v2679_v12 }
 0x1ba   :  { %3968 = vst.msk [vmem:[#allocation3 + $0xc1] sm:$0xff] %vm1293_vm5, %v3959_v32  ;;  %2706 = vst.msk [vmem:[#allocation3 + $0x31] sm:$0xff] %vm1293_vm5, %v2697_v1  ;;  %v2680_v38 = vmul.f32 %v7767_v49, %v2671_v54  ;;  %v3949_v41 = vmul.f32 %v7774_v58, %v2671_v54  ;;  %v3961_v48 = vmax.f32 %v3953_v39, 0.0  ;;  %v2699_v57 = vmax.f32 %v2691_v11, 0.0 }
 0x1bb   :  { %3969 = vst.msk [vmem:[#allocation3 + $0xd1] sm:$0xff] %vm1293_vm5, %v3960_v45  ;;  %2707 = vst.msk [vmem:[#allocation3 + $0x41] sm:$0xff] %vm1293_vm5, %v2698_v24  ;;  %v3962_v47 = vmax.f32 %v3954_v42, 0.0  ;;  %v2700_v16 = vmax.f32 %v2692_v51, 0.0  ;;  %v3963_v17 = vmax.f32 %v3955_v27, 0.0  ;;  %v2701_v4 = vmax.f32 %v2693_v29, 0.0 }
 0x1bc   :  { %v2694_v28 = vadd.f32 %v2685_v15, %v2680_v38  ;;  %v3957_v44 = vadd.f32 %v3949_v41, %v2685_v15  ;;  %3970 = vst.msk [vmem:[#allocation3 + $0xe1] sm:$0xff] %vm1293_vm5, %v3961_v48  ;;  %2708 = vst.msk [vmem:[#allocation3 + $0x51] sm:$0xff] %vm1293_vm5, %v2699_v57 }
 0x1bd   :  { %3971 = vst.msk [vmem:[#allocation3 + $0xf1] sm:$0xff] %vm1293_vm5, %v3962_v47  ;;  %2709 = vst.msk [vmem:[#allocation3 + $0x61] sm:$0xff] %vm1293_vm5, %v2700_v16 }
 0x1be   :  { %3972 = vst.msk [vmem:[#allocation3 + $0x101] sm:$0xff] %vm1293_vm5, %v3963_v17  ;;  %2710 = vst.msk [vmem:[#allocation3 + $0x71] sm:$0xff] %vm1293_vm5, %v2701_v4  ;;  %v2702_v49 = vmax.f32 %v2694_v28, 0.0  ;;  %v3965_v58 = vmax.f32 %v3957_v44, 0.0 }
 0x1bf   :  { %v7845_v20 = vld [vmem:[#allocation3 + $0x10] sm:$0xff]  ;;  %v7847_v19 = vld [vmem:[#allocation3 + $0x18] sm:$0x3] }
 0x1c0   :  { %v7849_v21 = vld [vmem:[#allocation3 + $0xb0] sm:$0xff]  ;;  %2711 = vst.msk [vmem:[#allocation3 + $0x81] sm:$0xff] %vm1293_vm5, %v2702_v49  ;;  %3974 = vst.msk [vmem:[#allocation3 + $0x121] sm:$0xff] %vm1293_vm5, %v3965_v58  ;;  %v2752_v18 = vrot.slane %v7845_v20, 1  ;;  %v2753_v34 = vrot.slane %v7847_v19, 1  ;;  %v7858_v54 = vld [vmem:[#allocation3 + $0x20] sm:$0xff] }
 0x1c1   :  { %v7855_v52 = vld [vmem:[#allocation3 + $0xb8] sm:$0x3]  ;;  %v4016_v53 = vrot.slane %v7849_v21, 1  ;;  %v7861_v63 = vld [vmem:[#allocation3 + $0x28] sm:$0x3]  ;;  %v2755_v5 = vrot.slane %v7858_v54, 1 }
 0x1c2   :  { %v4017_v59 = vrot.slane %v7855_v52, 1  ;;  %v7864_v7 = vld [vmem:[#allocation3 + $0xc0] sm:$0xff]  ;;  %v7866_v8 = vld [vmem:[#allocation3 + $0x30] sm:$0xff]  ;;  %v7874_v13 = vsel %vm122_vm3, %v2752_v18, %v2753_v34  ;;  %v2756_v14 = vrot.slane %v7861_v63, 1  ;;  %v7877_v15 = vld [vmem:[#allocation3 + $0xc8] sm:$0x3] }
 0x1c3   :  { %v4019_v43 = vrot.slane %v7864_v7, 1  ;;  %v7880_v60 = vld [vmem:[#allocation3 + $0x38] sm:$0x3]  ;;  %6268 = vmatmul.mubr.msk.f32.vlgmr.msra.gmra.mrb[8].mxu0 %vm1293_vm5, %v7874_v13  ;;  %v4020_v30 = vrot.slane %v7877_v15, 1  ;;  %v2758_v37 = vrot.slane %v7866_v8, 1  ;;  %v7890_v12 = vld [vmem:[#allocation3 + $0xd0] sm:$0xff] }
 0x1c4   :  { %v7885_v36 = vsel %vm122_vm3, %v4016_v53, %v4017_v59  ;;  %v2759_v0 = vrot.slane %v7880_v60, 1  ;;  %v7892_v62 = vld [vmem:[#allocation3 + $0xd8] sm:$0x3]  ;;  %6280 = vmatpush3.msra.mxu0 %v7681_v61  ;;  %v7898_v40 = vsel %vm122_vm3, %v2755_v5, %v2756_v14  ;;  %v4022_v50 = vrot.slane %v7890_v12, 1  ;;  %v7902_v56 = vld [vmem:[#allocation3 + $0x40] sm:$0xff]  ;;  %v7918_v46 = vld [vmem:[#allocation3 + $0x50] sm:$0xff] }
 0x1c5   :  { %6394 = vmatmul.mubr.msk.f32.vlgmr.msra.gmra.mrb[8].mxu1 %vm1293_vm5, %v7885_v36  ;;  %v4023_v22 = vrot.slane %v7892_v62, 1  ;;  %v7904_v6 = vld [vmem:[#allocation3 + $0x48] sm:$0x3]  ;;  %v7906_v26 = vld [vmem:[#allocation3 + $0xe0] sm:$0xff]  ;;  %6270 = vmatprep.mubr.msk.f32.mxu0 %vm1293_vm5, %v7898_v40  ;;  %v7912_v55 = vsel %vm122_vm3, %v4019_v43, %v4020_v30  ;;  %v2761_v31 = vrot.slane %v7902_v56, 1  ;;  %v7920_v32 = vld [vmem:[#allocation3 + $0xf0] sm:$0xff] }
 0x1c6   :  { %6406 = vmatpush3.msra.mxu1 %v7681_v61  ;;  %v2762_v3 = vrot.slane %v7904_v6, 1  ;;  %v7916_v33 = vld [vmem:[#allocation3 + $0xe8] sm:$0x3]  ;;  %6396 = vmatprep.mubr.msk.f32.mxu1 %vm1293_vm5, %v7912_v55  ;;  %v7925_v61 = vsel %vm122_vm3, %v2758_v37, %v2759_v0  ;;  %v4025_v1 = vrot.slane %v7906_v26, 1  ;;  %v7929_v24 = vld [vmem:[#allocation3 + $0x58] sm:$0x3] }
 0x1c7   :  { %v4026_v45 = vrot.slane %v7916_v33, 1  ;;  %v2764_v39 = vrot.slane %v7918_v46, 1  ;;  %v7932_v11 = vld [vmem:[#allocation3 + $0x60] sm:$0xff]  ;;  %6293 = vmatprep.subr.mxu0 %v7871_v9  ;;  %6271 = vmatmul.mubr.msk.f32.gmra.mrb[10].mxu0 %vm1293_vm5, %v7925_v61  ;;  %v7938_v42 = vsel %vm122_vm3, %v4022_v50, %v4023_v22  ;;  %v2765_v27 = vrot.slane %v7929_v24, 1  ;;  %v7944_v29 = vld [vmem:[#allocation3 + $0xf8] sm:$0x3] }
 0x1c8   :  { %v7941_v51 = vsel %vm122_vm3, %v2761_v31, %v2762_v3  ;;  %v4028_v38 = vrot.slane %v7920_v32, 1  ;;  %v7947_v41 = vld [vmem:[#allocation3 + $0x68] sm:$0x3]  ;;  %6419 = vmatprep.subr.mxu1 %v7871_v9  ;;  %v4029_v57 = vrot.slane %v7944_v29, 1  ;;  %v2767_v47 = vrot.slane %v7932_v11, 1  ;;  %v7960_v17 = vld [vmem:[#allocation3 + $0x100] sm:$0xff] }
 0x1c9   :  { %6397 = vmatmul.mubr.msk.f32.gmra.mrb[10].mxu1 %vm1293_vm5, %v7938_v42  ;;  %6273 = vmatprep.mubr.msk.f32.mxu0 %vm1293_vm5, %v7941_v51  ;;  %v7955_v48 = vsel %vm122_vm3, %v4025_v1, %v4026_v45  ;;  %v2768_v16 = vrot.slane %v7947_v41, 1  ;;  %v7962_v4 = vld [vmem:[#allocation3 + $0x108] sm:$0x3]  ;;  %v4031_v28 = vrot.slane %v7960_v17, 1  ;;  %v7968_v49 = vld [vmem:[#allocation3 + $0x70] sm:$0xff]  ;;  %v7975_v34 = vsel %vm122_vm3, %v2764_v39, %v2765_v27  ;;  %v5554_v31 = vld [vmem:[%s8522_s6 + $0x18] sm:$0xff] }
 0x1ca   :  { %6399 = vmatprep.mubr.msk.f32.mxu1 %vm1293_vm5, %v7955_v48  ;;  %v4032_v44 = vrot.slane %v7962_v4, 1  ;;  %v7970_v58 = vld [vmem:[#allocation3 + $0x78] sm:$0x3]  ;;  %v7972_v18 = vld [vmem:[#allocation3 + $0x110] sm:$0xff]  ;;  %v2770_v53 = vrot.slane %v7968_v49, 1  ;;  %v7984_v14 = vsel %vm122_vm3, %v4028_v38, %v4029_v57  ;;  %v3018_v3 = vrot.slane %v7669_v25, 2 }
 0x1cb   :  { %v2771_v59 = vrot.slane %v7970_v58, 1  ;;  %v7979_v5 = vld [vmem:[#allocation3 + $0x118] sm:$0x3]  ;;  %6274 = vmatmul.mubr.msk.f32.gmra.mrb[12].mxu0 %vm1293_vm5, %v7975_v34  ;;  %v7987_v43 = vsel %vm122_vm3, %v2767_v47, %v2768_v16  ;;  %v4034_v30 = vrot.slane %v7972_v18, 1  ;;  %v4280_v1 = vrot.slane %v7671_v35, 2 }
 0x1cc   :  { %v4035_v37 = vrot.slane %v7979_v5, 1  ;;  %6276 = vmatprep.mubr.msk.f32.mxu0 %vm1293_vm5, %v7987_v43  ;;  %v7996_v0 = vsel %vm122_vm3, %v4031_v28, %v4032_v44  ;;  %v4281_v45 = vrot.slane %v7683_v2, 2  ;;  %v3020_v25 = vrot.slane %v7845_v20, 2 }
 0x1cd   :  { %6400 = vmatmul.mubr.msk.f32.gmra.mrb[12].mxu1 %vm1293_vm5, %v7984_v14  ;;  %v8001_v50 = vsel %vm122_vm3, %v2770_v53, %v2771_v59  ;;  %v4283_v39 = vrot.slane %v7849_v21, 2  ;;  %v4284_v27 = vrot.slane %v7855_v52, 2  ;;  %v3023_v38 = vrot.slane %v7858_v54, 2 }
 0x1ce   :  { %6402 = vmatprep.mubr.msk.f32.mxu1 %vm1293_vm5, %v7996_v0  ;;  %v8006_v22 = vsel %vm122_vm3, %v4034_v30, %v4035_v37  ;;  %v4282_v2 = vsel %vm398_vm4, %v4280_v1, %v4281_v45  ;;  %v3024_v57 = vrot.slane %v7861_v63, 2  ;;  %v4287_v16 = vrot.slane %v7877_v15, 2  ;;  %v5563_v15 = vld [vmem:[%s8522_s6 + $0x20] sm:$0xff] }
 0x1cf   :  { %6277 = vmatmul.mubr.msk.f32.gmra.mrb[14].mxu0 %vm1293_vm5, %v8001_v50  ;;  %v3026_v52 = vrot.slane %v7866_v8, 2  ;;  %v3027_v28 = vrot.slane %v7880_v60, 2  ;;  %v4289_v44 = vrot.slane %v7890_v12, 2  ;;  %v4290_v53 = vrot.slane %v7892_v62, 2 }
 0x1d0   :  { %6281 = vmatprep.mubr.msk.f32.mxu0 %vm1293_vm5, %v7667_v23  ;;  %v3029_v59 = vrot.slane %v7902_v56, 2  ;;  %v3030_v63 = vrot.slane %v7904_v6, 2  ;;  %v8075_v30 = vsel %vm398_vm4, %v4283_v39, %v4284_v27  ;;  %v8083_v60 = vsel %vm398_vm4, %v3023_v38, %v3024_v57 }
 0x1d1   :  { %6403 = vmatmul.mubr.msk.f32.gmra.mrb[14].mxu1 %vm1293_vm5, %v8006_v22  ;;  %v4292_v62 = vrot.slane %v7906_v26, 2  ;;  %v4293_v6 = vrot.slane %v7916_v33, 2  ;;  %v3032_v33 = vrot.slane %v7918_v46, 2  ;;  %v4295_v45 = vrot.slane %v7920_v32, 2 }
 0x1d2   :  { %6407 = vmatprep.mubr.msk.f32.mxu1 %vm1293_vm5, %v7671_v35  ;;  %v3021_v35 = vrot.slane %v7847_v19, 2  ;;  %v4286_v19 = vrot.slane %v7864_v7, 2  ;;  %v8101_v1 = vsel %vm398_vm4, %v3029_v59, %v3030_v63  ;;  %v4299_v39 = vrot.slane %v7962_v4, 2 }
 0x1d3   :  { %6282 = vmatmul.mubr.msk.f32.vlgmr.msra.gmra.mrb[8].mxu0 %vm1293_vm5, %v7845_v20  ;;  %v3039_v27 = vrot.slane %v7970_v58, 2  ;;  %v4301_v4 = vrot.slane %v7972_v18, 2 }
 0x1d4   :  { %6294 = vmatpush3.msra.mxu0 %v7871_v9  ;;  %6284 = vmatprep.mubr.msk.f32.mxu0 %vm1293_vm5, %v7858_v54  ;;  %v8063_v47 = vsel %vm398_vm4, %v3020_v25, %v3021_v35  ;;  %v8090_v37 = vsel %vm398_vm4, %v4286_v19, %v4287_v16  ;;  %v3035_v25 = vrot.slane %v7932_v11, 2  ;;  %v3036_v35 = vrot.slane %v7947_v41, 2 }
 0x1d5   :  { %6408 = vmatmul.mubr.msk.f32.vlgmr.msra.gmra.mrb[8].mxu1 %vm1293_vm5, %v7849_v21  ;;  %6307 = vmatprep.subr.mxu0 %v5554_v31  ;;  %v3038_v41 = vrot.slane %v7968_v49, 2  ;;  %v4302_v19 = vrot.slane %v7979_v5, 2 }
 0x1d6   :  { %6420 = vmatpush3.msra.mxu1 %v7871_v9  ;;  %6410 = vmatprep.mubr.msk.f32.mxu1 %vm1293_vm5, %v7864_v7  ;;  %v3017_v9 = vrot.slane %v7667_v23, 2  ;;  %v8133_v57 = vsel %vm398_vm4, %v3035_v25, %v3036_v35  ;;  %v5599_v25 = vld [vmem:[%s8522_s6 + $0x40] sm:$0xff] }
 0x1d7   :  { %6285 = vmatmul.mubr.msk.f32.gmra.mrb[10].mxu0 %vm1293_vm5, %v7866_v8  ;;  %6433 = vmatprep.subr.mxu1 %v5554_v31  ;;  %v8147_v16 = vsel %vm398_vm4, %v3038_v41, %v3039_v27  ;;  %v8152_v5 = vsel %vm398_vm4, %v4301_v4, %v4302_v19 }
 0x1d8   :  { %6287 = vmatprep.mubr.msk.f32.mxu0 %vm1293_vm5, %v7902_v56  ;;  %v3019_v23 = vsel %vm398_vm4, %v3017_v9, %v3018_v3  ;;  %v8093_v9 = vsel %vm398_vm4, %v3026_v52, %v3027_v28  ;;  %v8098_v3 = vsel %vm398_vm4, %v4289_v44, %v4290_v53  ;;  %v5572_v52 = vld [vmem:[%s8522_s6 + $0x28] sm:$0xff]  ;;  %v5581_v28 = vld [vmem:[%s8522_s6 + $0x30] sm:$0xff] }
 0x1d9   :  { %6411 = vmatmul.mubr.msk.f32.gmra.mrb[10].mxu1 %vm1293_vm5, %v7890_v12 }
 0x1da   :  { %6413 = vmatprep.mubr.msk.f32.mxu1 %vm1293_vm5, %v7906_v26 }
 0x1db   :  { %6288 = vmatmul.mubr.msk.f32.gmra.mrb[12].mxu0 %vm1293_vm5, %v7918_v46 }
 0x1dc   :  { %6290 = vmatprep.mubr.msk.f32.mxu0 %vm1293_vm5, %v7932_v11 }
 0x1dd   :  { %6414 = vmatmul.mubr.msk.f32.gmra.mrb[12].mxu1 %vm1293_vm5, %v7920_v32 }
 0x1de   :  { %6416 = vmatprep.mubr.msk.f32.mxu1 %vm1293_vm5, %v7960_v17 }
 0x1df   :  { %6291 = vmatmul.mubr.msk.f32.gmra.mrb[14].mxu0 %vm1293_vm5, %v7968_v49 }
 0x1e0   :  { %6295 = vmatprep.mubr.msk.f32.mxu0 %vm1293_vm5, %v3019_v23  ;;  %v4296_v23 = vrot.slane %v7944_v29, 2 }
 0x1e1   :  { %6417 = vmatmul.mubr.msk.f32.gmra.mrb[14].mxu1 %vm1293_vm5, %v7972_v18 }
 0x1e2   :  { %6421 = vmatprep.mubr.msk.f32.mxu1 %vm1293_vm5, %v4282_v2  ;;  %v4298_v2 = vrot.slane %v7960_v17, 2  ;;  %v8130_v38 = vsel %vm398_vm4, %v4295_v45, %v4296_v23 }
 0x1e3   :  { %6296 = vmatmul.mubr.msk.f32.vlgmr.msra.gmra.mrb[8].mxu0 %vm1293_vm5, %v8063_v47 }
 0x1e4   :  { %6308 = vmatpush3.msra.mxu0 %v5554_v31  ;;  %6298 = vmatprep.mubr.msk.f32.mxu0 %vm1293_vm5, %v8083_v60  ;;  %v8142_v58 = vsel %vm398_vm4, %v4298_v2, %v4299_v39 }
 0x1e5   :  { %6422 = vmatmul.mubr.msk.f32.vlgmr.msra.gmra.mrb[8].mxu1 %vm1293_vm5, %v8075_v30  ;;  %6321 = vmatprep.subr.mxu0 %v5563_v15 }
 0x1e6   :  { %6434 = vmatpush3.msra.mxu1 %v5554_v31  ;;  %6424 = vmatprep.mubr.msk.f32.mxu1 %vm1293_vm5, %v8090_v37  ;;  %v3033_v31 = vrot.slane %v7929_v24, 2  ;;  %v8116_v24 = vsel %vm398_vm4, %v4292_v62, %v4293_v6  ;;  %v5590_v6 = vld [vmem:[%s8522_s6 + $0x38] sm:$0xff] }
 0x1e7   :  { %6299 = vmatmul.mubr.msk.f32.gmra.mrb[10].mxu0 %vm1293_vm5, %v8093_v9  ;;  %6447 = vmatprep.subr.mxu1 %v5563_v15 }
 0x1e8   :  { %6301 = vmatprep.mubr.msk.f32.mxu0 %vm1293_vm5, %v8101_v1  ;;  %v8123_v29 = vsel %vm398_vm4, %v3032_v33, %v3033_v31 }
 0x1e9   :  { %6425 = vmatmul.mubr.msk.f32.gmra.mrb[10].mxu1 %vm1293_vm5, %v8098_v3 }
 0x1ea   :  { %6427 = vmatprep.mubr.msk.f32.mxu1 %vm1293_vm5, %v8116_v24 }
 0x1eb   :  { %6302 = vmatmul.mubr.msk.f32.gmra.mrb[12].mxu0 %vm1293_vm5, %v8123_v29 }
 0x1ec   :  { %6304 = vmatprep.mubr.msk.f32.mxu0 %vm1293_vm5, %v8133_v57 }
 0x1ed   :  { %6428 = vmatmul.mubr.msk.f32.gmra.mrb[12].mxu1 %vm1293_vm5, %v8130_v38 }
 0x1ee   :  { %6430 = vmatprep.mubr.msk.f32.mxu1 %vm1293_vm5, %v8142_v58 }
 0x1ef   :  { %6305 = vmatmul.mubr.msk.f32.gmra.mrb[14].mxu0 %vm1293_vm5, %v8147_v16 }
 0x1f0   :  { %6309 = vmatprep.mubr.msk.f32.mxu0 %vm1293_vm5, %v7845_v20  ;;  %v8187_v20 = vld [vmem:[#allocation3 + $0x80] sm:$0xff] }
 0x1f1   :  { %6431 = vmatmul.mubr.msk.f32.gmra.mrb[14].mxu1 %vm1293_vm5, %v8152_v5  ;;  %v3291_v44 = vrot.slane %v8187_v20, 1 }
 0x1f2   :  { %6435 = vmatprep.mubr.msk.f32.mxu1 %vm1293_vm5, %v7849_v21  ;;  %v8191_v21 = vld [vmem:[#allocation3 + $0x120] sm:$0xff] }
 0x1f3   :  { %6310 = vmatmul.mubr.msk.f32.vlgmr.msra.gmra.mrb[8].mxu0 %vm1293_vm5, %v7858_v54  ;;  %v4552_v59 = vrot.slane %v8191_v21, 1  ;;  %v4671_v33 = vrot.slane %v8191_v21, 2 }
 0x1f4   :  { %6322 = vmatpush3.msra.mxu0 %v5563_v15  ;;  %6312 = vmatprep.mubr.msk.f32.mxu0 %vm1293_vm5, %v7866_v8 }
 0x1f5   :  { %6436 = vmatmul.mubr.msk.f32.vlgmr.msra.gmra.mrb[8].mxu1 %vm1293_vm5, %v7864_v7  ;;  %6335 = vmatprep.subr.mxu0 %v5572_v52 }
 0x1f6   :  { %6448 = vmatpush3.msra.mxu1 %v5563_v15  ;;  %6438 = vmatprep.mubr.msk.f32.mxu1 %vm1293_vm5, %v7890_v12 }
 0x1f7   :  { %6313 = vmatmul.mubr.msk.f32.gmra.mrb[10].mxu0 %vm1293_vm5, %v7902_v56  ;;  %6461 = vmatprep.subr.mxu1 %v5572_v52 }
 0x1f8   :  { %6315 = vmatprep.mubr.msk.f32.mxu0 %vm1293_vm5, %v7918_v46 }
 0x1f9   :  { %6439 = vmatmul.mubr.msk.f32.gmra.mrb[10].mxu1 %vm1293_vm5, %v7906_v26 }
 0x1fa   :  { %6441 = vmatprep.mubr.msk.f32.mxu1 %vm1293_vm5, %v7920_v32 }
 0x1fb   :  { %6316 = vmatmul.mubr.msk.f32.gmra.mrb[12].mxu0 %vm1293_vm5, %v7932_v11 }
 0x1fc   :  { %6318 = vmatprep.mubr.msk.f32.mxu0 %vm1293_vm5, %v7968_v49 }
 0x1fd   :  { %6442 = vmatmul.mubr.msk.f32.gmra.mrb[12].mxu1 %vm1293_vm5, %v7960_v17 }
 0x1fe   :  { %6444 = vmatprep.mubr.msk.f32.mxu1 %vm1293_vm5, %v7972_v18 }
 0x1ff   :  { %6319 = vmatmul.mubr.msk.f32.gmra.mrb[14].mxu0 %vm1293_vm5, %v8187_v20 }
 0x200   :  { %6323 = vmatprep.mubr.msk.f32.mxu0 %vm1293_vm5, %v7874_v13  ;;  %v2729_v13 = vld [vmem:[#allocation3 + $0x88] sm:$0x3] }
 0x201   :  { %6445 = vmatmul.mubr.msk.f32.gmra.mrb[14].mxu1 %vm1293_vm5, %v8191_v21  ;;  %v3292_v53 = vrot.slane %v2729_v13, 1 }
 0x202   :  { %6449 = vmatprep.mubr.msk.f32.mxu1 %vm1293_vm5, %v7885_v36  ;;  %v3993_v36 = vld [vmem:[#allocation3 + $0x128] sm:$0x3] }
 0x203   :  { %6324 = vmatmul.mubr.msk.f32.vlgmr.msra.gmra.mrb[8].mxu0 %vm1293_vm5, %v7898_v40  ;;  %v4553_v63 = vrot.slane %v3993_v36, 1  ;;  %v8229_v15 = vsel %vm122_vm3, %v3291_v44, %v3292_v53  ;;  %v4672_v31 = vrot.slane %v3993_v36, 2 }
 0x204   :  { %6336 = vmatpush3.msra.mxu0 %v5572_v52  ;;  %6326 = vmatprep.mubr.msk.f32.mxu0 %vm1293_vm5, %v7925_v61 }
 0x205   :  { %6450 = vmatmul.mubr.msk.f32.vlgmr.msra.gmra.mrb[8].mxu1 %vm1293_vm5, %v7912_v55  ;;  %6349 = vmatprep.subr.mxu0 %v5581_v28  ;;  %v8234_v62 = vsel %vm122_vm3, %v4552_v59, %v4553_v63  ;;  %v8277_v23 = vsel %vm398_vm4, %v4671_v33, %v4672_v31 }
 0x206   :  { %6462 = vmatpush3.msra.mxu1 %v5572_v52  ;;  %6452 = vmatprep.mubr.msk.f32.mxu1 %vm1293_vm5, %v7938_v42 }
 0x207   :  { %6327 = vmatmul.mubr.msk.f32.gmra.mrb[10].mxu0 %vm1293_vm5, %v7941_v51  ;;  %6475 = vmatprep.subr.mxu1 %v5581_v28 }
 0x208   :  { %6329 = vmatprep.mubr.msk.f32.mxu0 %vm1293_vm5, %v7975_v34 }
 0x209   :  { %6453 = vmatmul.mubr.msk.f32.gmra.mrb[10].mxu1 %vm1293_vm5, %v7955_v48 }
 0x20a   :  { %6455 = vmatprep.mubr.msk.f32.mxu1 %vm1293_vm5, %v7984_v14 }
 0x20b   :  { %6330 = vmatmul.mubr.msk.f32.gmra.mrb[12].mxu0 %vm1293_vm5, %v7987_v43 }
 0x20c   :  { %6332 = vmatprep.mubr.msk.f32.mxu0 %vm1293_vm5, %v8001_v50 }
 0x20d   :  { %6456 = vmatmul.mubr.msk.f32.gmra.mrb[12].mxu1 %vm1293_vm5, %v7996_v0 }
 0x20e   :  { %6458 = vmatprep.mubr.msk.f32.mxu1 %vm1293_vm5, %v8006_v22 }
 0x20f   :  { %6333 = vmatmul.mubr.msk.f32.gmra.mrb[14].mxu0 %vm1293_vm5, %v8229_v15 }
 0x210   :  { %6337 = vmatprep.mubr.msk.f32.mxu0 %vm1293_vm5, %v8063_v47  ;;  %v3411_v47 = vrot.slane %v8187_v20, 2 }
 0x211   :  { %6459 = vmatmul.mubr.msk.f32.gmra.mrb[14].mxu1 %vm1293_vm5, %v8234_v62 }
 0x212   :  { %6463 = vmatprep.mubr.msk.f32.mxu1 %vm1293_vm5, %v8075_v30  ;;  %v3412_v30 = vrot.slane %v2729_v13, 2 }
 0x213   :  { %6338 = vmatmul.mubr.msk.f32.vlgmr.msra.gmra.mrb[8].mxu0 %vm1293_vm5, %v8083_v60 }
 0x214   :  { %6350 = vmatpush3.msra.mxu0 %v5581_v28  ;;  %6340 = vmatprep.mubr.msk.f32.mxu0 %vm1293_vm5, %v8093_v9  ;;  %v8272_v45 = vsel %vm398_vm4, %v3411_v47, %v3412_v30 }
 0x215   :  { %6464 = vmatmul.mubr.msk.f32.vlgmr.msra.gmra.mrb[8].mxu1 %vm1293_vm5, %v8090_v37  ;;  %6363 = vmatprep.subr.mxu0 %v5590_v6 }
 0x216   :  { %6476 = vmatpush3.msra.mxu1 %v5581_v28  ;;  %6466 = vmatprep.mubr.msk.f32.mxu1 %vm1293_vm5, %v8098_v3 }
 0x217   :  { %6341 = vmatmul.mubr.msk.f32.gmra.mrb[10].mxu0 %vm1293_vm5, %v8101_v1  ;;  %6489 = vmatprep.subr.mxu1 %v5590_v6 }
 0x218   :  { %6343 = vmatprep.mubr.msk.f32.mxu0 %vm1293_vm5, %v8123_v29 }
 0x219   :  { %6467 = vmatmul.mubr.msk.f32.gmra.mrb[10].mxu1 %vm1293_vm5, %v8116_v24 }
 0x21a   :  { %6469 = vmatprep.mubr.msk.f32.mxu1 %vm1293_vm5, %v8130_v38 }
 0x21b   :  { %6344 = vmatmul.mubr.msk.f32.gmra.mrb[12].mxu0 %vm1293_vm5, %v8133_v57 }
 0x21c   :  { %6346 = vmatprep.mubr.msk.f32.mxu0 %vm1293_vm5, %v8147_v16 }
 0x21d   :  { %6470 = vmatmul.mubr.msk.f32.gmra.mrb[12].mxu1 %vm1293_vm5, %v8142_v58 }
 0x21e   :  { %6472 = vmatprep.mubr.msk.f32.mxu1 %vm1293_vm5, %v8152_v5 }
 0x21f   :  { %6347 = vmatmul.mubr.msk.f32.gmra.mrb[14].mxu0 %vm1293_vm5, %v8272_v45 }
 0x220   :  { %6351 = vmatprep.mubr.msk.f32.mxu0 %vm1293_vm5, %v7858_v54  ;;  %v2730_v54 = vld [vmem:[#allocation3 + $0x90] sm:$0xff] }
 0x221   :  { %6473 = vmatmul.mubr.msk.f32.gmra.mrb[14].mxu1 %vm1293_vm5, %v8277_v23 }
 0x222   :  { %6477 = vmatprep.mubr.msk.f32.mxu1 %vm1293_vm5, %v7864_v7  ;;  %v3994_v7 = vld [vmem:[#allocation3 + $0x130] sm:$0xff] }
 0x223   :  { %6352 = vmatmul.mubr.msk.f32.vlgmr.msra.gmra.mrb[8].mxu0 %vm1293_vm5, %v7866_v8  ;;  %v2731_v8 = vld [vmem:[#allocation3 + $0x98] sm:$0x3] }
 0x224   :  { %6364 = vmatpush3.msra.mxu0 %v5590_v6  ;;  %6354 = vmatprep.mubr.msk.f32.mxu0 %vm1293_vm5, %v7902_v56  ;;  %v3651_v56 = vrot.slane %v2731_v8, 1 }
 0x225   :  { %6478 = vmatmul.mubr.msk.f32.vlgmr.msra.gmra.mrb[8].mxu1 %vm1293_vm5, %v7890_v12  ;;  %6377 = vmatprep.subr.mxu0 %v5599_v25  ;;  %v3995_v12 = vld [vmem:[#allocation3 + $0x138] sm:$0x3] }
 0x226   :  { %6490 = vmatpush3.msra.mxu1 %v5590_v6  ;;  %6480 = vmatprep.mubr.msk.f32.mxu1 %vm1293_vm5, %v7906_v26  ;;  %v4908_v26 = vrot.slane %v3994_v7, 1 }
 0x227   :  { %6355 = vmatmul.mubr.msk.f32.gmra.mrb[10].mxu0 %vm1293_vm5, %v7918_v46  ;;  %6503 = vmatprep.subr.mxu1 %v5599_v25 }
 0x228   :  { %6357 = vmatprep.mubr.msk.f32.mxu0 %vm1293_vm5, %v7932_v11  ;;  %v3771_v11 = vrot.slane %v2731_v8, 2 }
 0x229   :  { %6481 = vmatmul.mubr.msk.f32.gmra.mrb[10].mxu1 %vm1293_vm5, %v7920_v32 }
 0x22a   :  { %6483 = vmatprep.mubr.msk.f32.mxu1 %vm1293_vm5, %v7960_v17 }
 0x22b   :  { %6358 = vmatmul.mubr.msk.f32.gmra.mrb[12].mxu0 %vm1293_vm5, %v7968_v49 }
 0x22c   :  { %6360 = vmatprep.mubr.msk.f32.mxu0 %vm1293_vm5, %v8187_v20 }
 0x22d   :  { %6484 = vmatmul.mubr.msk.f32.gmra.mrb[12].mxu1 %vm1293_vm5, %v7972_v18 }
 0x22e   :  { %6486 = vmatprep.mubr.msk.f32.mxu1 %vm1293_vm5, %v8191_v21 }
 0x22f   :  { %6361 = vmatmul.mubr.msk.f32.gmra.mrb[14].mxu0 %vm1293_vm5, %v2730_v54 }
 0x230   :  { %6365 = vmatprep.mubr.msk.f32.mxu0 %vm1293_vm5, %v7898_v40  ;;  %v3650_v40 = vrot.slane %v2730_v54, 1 }
 0x231   :  { %6487 = vmatmul.mubr.msk.f32.gmra.mrb[14].mxu1 %vm1293_vm5, %v3994_v7 }
 0x232   :  { %6491 = vmatprep.mubr.msk.f32.mxu1 %vm1293_vm5, %v7912_v55  ;;  %v4909_v55 = vrot.slane %v3995_v12, 1  ;;  %v3652_v46 = vsel %vm122_vm3, %v3650_v40, %v3651_v56 }
 0x233   :  { %6366 = vmatmul.mubr.msk.f32.vlgmr.msra.gmra.mrb[8].mxu0 %vm1293_vm5, %v7925_v61  ;;  %v3770_v61 = vrot.slane %v2730_v54, 2 }
 0x234   :  { %6378 = vmatpush3.msra.mxu0 %v5599_v25  ;;  %6368 = vmatprep.mubr.msk.f32.mxu0 %vm1293_vm5, %v7941_v51  ;;  %v4910_v32 = vsel %vm122_vm3, %v4908_v26, %v4909_v55  ;;  %v5028_v51 = vrot.slane %v3995_v12, 2 }
 0x235   :  { %6492 = vmatmul.mubr.msk.f32.vlgmr.msra.gmra.mrb[8].mxu1 %vm1293_vm5, %v7938_v42  ;;  %v5027_v42 = vrot.slane %v3994_v7, 2 }
 0x236   :  { %6504 = vmatpush3.msra.mxu1 %v5599_v25  ;;  %6494 = vmatprep.mubr.msk.f32.mxu1 %vm1293_vm5, %v7955_v48  ;;  %v3772_v48 = vsel %vm398_vm4, %v3770_v61, %v3771_v11 }
 0x237   :  { %6369 = vmatmul.mubr.msk.f32.gmra.mrb[10].mxu0 %vm1293_vm5, %v7975_v34  ;;  %v5029_v17 = vsel %vm398_vm4, %v5027_v42, %v5028_v51 }
 0x238   :  { %6371 = vmatprep.mubr.msk.f32.mxu0 %vm1293_vm5, %v7987_v43 }
 0x239   :  { %6495 = vmatmul.mubr.msk.f32.gmra.mrb[10].mxu1 %vm1293_vm5, %v7984_v14 }
 0x23a   :  { %6497 = vmatprep.mubr.msk.f32.mxu1 %vm1293_vm5, %v7996_v0 }
 0x23b   :  { %6372 = vmatmul.mubr.msk.f32.gmra.mrb[12].mxu0 %vm1293_vm5, %v8001_v50 }
 0x23c   :  { %6374 = vmatprep.mubr.msk.f32.mxu0 %vm1293_vm5, %v8229_v15 }
 0x23d   :  { %6498 = vmatmul.mubr.msk.f32.gmra.mrb[12].mxu1 %vm1293_vm5, %v8006_v22 }
 0x23e   :  { %6500 = vmatprep.mubr.msk.f32.mxu1 %vm1293_vm5, %v8234_v62 }
 0x23f   :  { %6375 = vmatmul.mubr.msk.f32.gmra.mrb[14].mxu0 %vm1293_vm5, %v3652_v46 }
 0x240   :  { %6379 = vmatprep.mubr.msk.f32.mxu0 %vm1293_vm5, %v8083_v60 }
 0x241   :  { %6501 = vmatmul.mubr.msk.f32.gmra.mrb[14].mxu1 %vm1293_vm5, %v4910_v32 }
 0x242   :  { %6505 = vmatprep.mubr.msk.f32.mxu1 %vm1293_vm5, %v8090_v37 }
 0x243   :  { %6380 = vmatmul.mubr.msk.f32.vlgmr.msra.gmra.mrb[8].mxu0 %vm1293_vm5, %v8093_v9 }
 0x244   :  { %6382 = vmatprep.mubr.msk.f32.mxu0 %vm1293_vm5, %v8101_v1 }
 0x245   :  { %6506 = vmatmul.mubr.msk.f32.vlgmr.msra.gmra.mrb[8].mxu1 %vm1293_vm5, %v8098_v3 }
 0x246   :  { %6508 = vmatprep.mubr.msk.f32.mxu1 %vm1293_vm5, %v8116_v24 }
 0x247   :  { %6383 = vmatmul.mubr.msk.f32.gmra.mrb[10].mxu0 %vm1293_vm5, %v8123_v29 }
 0x248   :  { %6385 = vmatprep.mubr.msk.f32.mxu0 %vm1293_vm5, %v8133_v57 }
 0x249   :  { %6509 = vmatmul.mubr.msk.f32.gmra.mrb[10].mxu1 %vm1293_vm5, %v8130_v38 }
 0x24a   :  { %6511 = vmatprep.mubr.msk.f32.mxu1 %vm1293_vm5, %v8142_v58 }
 0x24b   :  { %6386 = vmatmul.mubr.msk.f32.gmra.mrb[12].mxu0 %vm1293_vm5, %v8147_v16 }
 0x24c   :  { %6388 = vmatprep.mubr.msk.f32.mxu0 %vm1293_vm5, %v8272_v45 }
 0x24d   :  { %6512 = vmatmul.mubr.msk.f32.gmra.mrb[12].mxu1 %vm1293_vm5, %v8152_v5 }
 0x24e   :  { %6514 = vmatprep.mubr.msk.f32.mxu1 %vm1293_vm5, %v8277_v23 }
 0x24f   :  { %6389 = vmatmul.mubr.msk.f32.gmra.mrb[14].mxu0 %vm1293_vm5, %v3772_v48 }
 0x251   :  { %6515 = vmatmul.mubr.msk.f32.gmra.mrb[14].mxu1 %vm1293_vm5, %v5029_v17 }
 0x316   :  { %v8378_v49 = vpop.f32.mrb[8].mxu0 }
 0x317   :  { %v3891_v18 = vsel %vm1293_vm5, %v8378_v49, 0.0  ;;  %v3913_v34 = vmul.f32 %v8378_v49, %v8378_v49  ;;  %v8386_v43 = vpop.f32.mrb[9].mxu0 }
 0x318   :  { %v8384_v14 = vpop.f32.mrb[8].mxu1  ;;  %v3890_v22 = vsel %vm1293_vm5, %v8386_v43, 0.0  ;;  %v3912_v60 = vmul.f32 %v8386_v43, %v8386_v43 }
 0x319   :  { %v5147_v0 = vsel %vm1293_vm5, %v8384_v14, 0.0  ;;  %v5169_v50 = vmul.f32 %v8384_v14, %v8384_v14  ;;  %v8396_v37 = vpop.f32.mrb[9].mxu1  ;;  %v3921_v9 = vsel %vm1293_vm5, %v3913_v34, 0.0  ;;  %v3892_v3 = vadd.f32 %v3891_v18, %v3890_v22 }
 0x31a   :  { %v5146_v1 = vsel %vm1293_vm5, %v8396_v37, 0.0  ;;  %v5168_v35 = vmul.f32 %v8396_v37, %v8396_v37  ;;  %v3920_v2 = vsel %vm1293_vm5, %v3912_v60, 0.0  ;;  %v8405_v29 = vpop.f32.mrb[10].mxu0 }
 0x31b   :  { %v5177_v24 = vsel %vm1293_vm5, %v5169_v50, 0.0  ;;  %v5148_v39 = vadd.f32 %v5147_v0, %v5146_v1  ;;  %v3922_v41 = vadd.f32 %v3921_v9, %v3920_v2  ;;  %v3915_v38 = vmul.f32 %v8405_v29, %v8405_v29  ;;  %v8412_v4 = vpop.f32.mrb[11].mxu0 }
 0x31c   :  { %v5176_v27 = vsel %vm1293_vm5, %v5168_v35, 0.0  ;;  %v8410_v57 = vpop.f32.mrb[10].mxu1  ;;  %v3893_v16 = vsel %vm1293_vm5, %v8412_v4, 0.0  ;;  %v3914_v20 = vmul.f32 %v8412_v4, %v8412_v4  ;;  %v3895_v28 = vsel %vm1293_vm5, %v8405_v29, 0.0 }
 0x31d   :  { %v5178_v19 = vadd.f32 %v5177_v24, %v5176_v27  ;;  %v5171_v58 = vmul.f32 %v8410_v57, %v8410_v57  ;;  %v8418_v5 = vpop.f32.mrb[11].mxu1  ;;  %v3894_v52 = vadd.f32 %v3893_v16, %v3892_v3  ;;  %v3925_v53 = vsel %vm1293_vm5, %v3915_v38, 0.0 }
 0x31e   :  { %v5149_v21 = vsel %vm1293_vm5, %v8418_v5, 0.0  ;;  %v5170_v36 = vmul.f32 %v8418_v5, %v8418_v5  ;;  %v8428_v44 = vpop.f32.mrb[12].mxu0  ;;  %v5151_v59 = vsel %vm1293_vm5, %v8410_v57, 0.0  ;;  %v3923_v63 = vsel %vm1293_vm5, %v3914_v20, 0.0 }
 0x31f   :  { %v5150_v13 = vadd.f32 %v5149_v21, %v5148_v39  ;;  %v8436_v62 = vpop.f32.mrb[13].mxu0  ;;  %v3896_v6 = vadd.f32 %v3895_v28, %v3894_v52  ;;  %v5181_v47 = vsel %vm1293_vm5, %v5171_v58, 0.0  ;;  %v3924_v30 = vadd.f32 %v3923_v63, %v3922_v41 }
 0x320   :  { %v8434_v15 = vpop.f32.mrb[12].mxu1  ;;  %v5179_v33 = vsel %vm1293_vm5, %v5170_v36, 0.0  ;;  %v3917_v31 = vmul.f32 %v8428_v44, %v8428_v44  ;;  %v3897_v54 = vsel %vm1293_vm5, %v8436_v62, 0.0  ;;  %v3916_v7 = vmul.f32 %v8436_v62, %v8436_v62 }
 0x321   :  { %v8442_v45 = vpop.f32.mrb[13].mxu1  ;;  %v5180_v23 = vadd.f32 %v5179_v33, %v5178_v19  ;;  %v5173_v25 = vmul.f32 %v8434_v15, %v8434_v15  ;;  %v3899_v8 = vsel %vm1293_vm5, %v8428_v44, 0.0  ;;  %v3898_v12 = vadd.f32 %v3897_v54, %v3896_v6 }
 0x322   :  { %v3926_v40 = vadd.f32 %v3925_v53, %v3924_v30  ;;  %v5152_v56 = vadd.f32 %v5151_v59, %v5150_v13  ;;  %v8452_v26 = vpop.f32.mrb[14].mxu0  ;;  %v3927_v55 = vsel %vm1293_vm5, %v3916_v7, 0.0  ;;  %v5153_v46 = vsel %vm1293_vm5, %v8442_v45, 0.0 }
 0x323   :  { %v5172_v32 = vmul.f32 %v8442_v45, %v8442_v45  ;;  %v5182_v61 = vadd.f32 %v5181_v47, %v5180_v23  ;;  %v8461_v42 = vpop.f32.mrb[15].mxu0  ;;  %v3929_v51 = vsel %vm1293_vm5, %v3917_v31, 0.0  ;;  %v5155_v48 = vsel %vm1293_vm5, %v8434_v15, 0.0 }
 0x324   :  { %v8459_v11 = vpop.f32.mrb[14].mxu1  ;;  %v3928_v17 = vadd.f32 %v3927_v55, %v3926_v40  ;;  %v5154_v18 = vadd.f32 %v5153_v46, %v5152_v56  ;;  %v5185_v0 = vsel %vm1293_vm5, %v5173_v25, 0.0  ;;  %v3903_v22 = vsel %vm1293_vm5, %v8452_v26, 0.0 }
 0x325   :  { %v8466_v34 = vpop.f32.mrb[15].mxu1  ;;  %v5183_v50 = vsel %vm1293_vm5, %v5172_v32, 0.0  ;;  %v3900_v60 = vadd.f32 %v3899_v8, %v3898_v12  ;;  %v3919_v3 = vmul.f32 %v8452_v26, %v8452_v26  ;;  %v3901_v1 = vsel %vm1293_vm5, %v8461_v42, 0.0 }
 0x326   :  { %v5184_v9 = vadd.f32 %v5183_v50, %v5182_v61  ;;  %v3918_v35 = vmul.f32 %v8461_v42, %v8461_v42  ;;  %v5175_v24 = vmul.f32 %v8459_v11, %v8459_v11  ;;  %v3930_v39 = vadd.f32 %v3929_v51, %v3928_v17 }
 0x327   :  { %v3902_v2 = vadd.f32 %v3901_v1, %v3900_v60  ;;  %v5156_v41 = vadd.f32 %v5155_v48, %v5154_v18  ;;  %v5157_v38 = vsel %vm1293_vm5, %v8466_v34, 0.0  ;;  %v5174_v19 = vmul.f32 %v8466_v34, %v8466_v34 }
 0x328   :  { %v3931_v27 = vsel %vm1293_vm5, %v3918_v35, 0.0  ;;  %v5186_v58 = vadd.f32 %v5185_v0, %v5184_v9  ;;  %v3933_v21 = vsel %vm1293_vm5, %v3919_v3, 0.0  ;;  %v5159_v28 = vsel %vm1293_vm5, %v8459_v11, 0.0 }
 0x329   :  { %v3904_v16 = vadd.f32 %v3903_v22, %v3902_v2  ;;  %v3932_v52 = vadd.f32 %v3931_v27, %v3930_v39  ;;  %v5158_v20 = vadd.f32 %v5157_v38, %v5156_v41  ;;  %v5187_v13 = vsel %vm1293_vm5, %v5174_v19, 0.0  ;;  %v5203_v27 = vld [vmem:[%s8525_s3] sm:$0x1] }
 0x32a   :  { %v5188_v63 = vadd.f32 %v5187_v13, %v5186_v58  ;;  %v5189_v6 = vsel %vm1293_vm5, %v5175_v24, 0.0  ;;  %v5207_v58 = vld [vmem:[%s8526_s4] sm:$0x1] }
 0x32b   :  { %v3905_v36 = vrot.slane %v3904_v16, 4  ;;  %v3934_v53 = vadd.f32 %v3933_v21, %v3932_v52  ;;  %v5160_v59 = vadd.f32 %v5159_v28, %v5158_v20 }
 0x32c   :  { %v5190_v31 = vadd.f32 %v5189_v6, %v5188_v63 }
 0x32d   :  { %v3906_v47 = vadd.f32 %v3905_v36, %v3904_v16  ;;  %v3935_v30 = vrot.slane %v3934_v53, 4  ;;  %v5161_v33 = vrot.slane %v5160_v59, 4 }
 0x32e   :  { %v5191_v7 = vrot.slane %v5190_v31, 4 }
 0x32f   :  { %v3907_v23 = vrot.slane %v3906_v47, 2  ;;  %v3936_v25 = vadd.f32 %v3935_v30, %v3934_v53  ;;  %v5162_v54 = vadd.f32 %v5161_v33, %v5160_v59 }
 0x330   :  { %v5192_v56 = vadd.f32 %v5191_v7, %v5190_v31 }
 0x331   :  { %v3908_v8 = vadd.f32 %v3907_v23, %v3906_v47  ;;  %v3937_v12 = vrot.slane %v3936_v25, 2  ;;  %v5163_v40 = vrot.slane %v5162_v54, 2 }
 0x332   :  { %v5193_v61 = vrot.slane %v5192_v56, 2 }
 0x333   :  { %v3909_v55 = vrot.slane %v3908_v8, 1  ;;  %v3938_v46 = vadd.f32 %v3937_v12, %v3936_v25  ;;  %v5164_v32 = vadd.f32 %v5163_v40, %v5162_v54 }
 0x334   :  { %v5194_v18 = vadd.f32 %v5193_v61, %v5192_v56 }
 0x335   :  { %v3910_v51 = vadd.f32 %v3909_v55, %v3908_v8  ;;  %v3939_v48 = vrot.slane %v3938_v46, 1  ;;  %v5165_v17 = vrot.slane %v5164_v32, 1 }
 0x336   :  { %v5195_v22 = vrot.slane %v5194_v18, 1 }
 0x337   :  { %v3940_v0 = vadd.f32 %v3939_v48, %v3938_v46  ;;  %v5166_v50 = vadd.f32 %v5165_v17, %v5164_v32 }
 0x338   :  { %v5196_v9 = vadd.f32 %v5195_v22, %v5194_v18 }
 0x339   :  { %v5167_v60 = vadd.f32 %v5166_v50, %v3910_v51 }
 0x33a   :  { %v5197_v3 = vadd.f32 %v5196_v9, %v3940_v0 }
 0x33b   :  { %v5198_v1 = vmul.f32 0.0078125, %v5167_v60 }
 0x33c   :  { %v5199_v35 = vmul.f32 0.0078125, %v5197_v3 }
 0x33d   :  { %v5200_v24 = vmul.f32 %v5198_v1, %v5198_v1 }
 0x33f   :  { %v5201_v2 = vsub.f32 %v5199_v35, %v5200_v24 }
 0x341   :  { %v5202_v39 = vmax.f32 %v5201_v2, 0.0 }
 0x343   :  { %v5204_v41 = vadd.f32 1e-05, %v5202_v39 }
 0x345   :  { %6776 = vrsqrt.f32 %v5204_v41 }
 0x34f   :  { %v6777_v38 = vpop.eup %6776 }
 0x350   :  { %v5206_v19 = vmul.f32 %v6777_v38, %v5203_v27 }
 0x352   :  { %v5208_v16 = vmul.f32 %v5206_v19, %v5198_v1  ;;  %v5214_v52 = vrot.slane %v5206_v19, %v7808_v10 }
 0x354   :  { %v5209_v20 = vsub.f32 %v5207_v58, %v5208_v16  ;;  %v5286_v21 = vmul.f32 %v5214_v52, %v8466_v34  ;;  %v5280_v28 = vmul.f32 %v5214_v52, %v8396_v37  ;;  %v5216_v13 = vmul.f32 %v5214_v52, %v8386_v43 }
 0x355   :  { %v5281_v36 = vmul.f32 %v8384_v14, %v5214_v52  ;;  %v5217_v53 = vmul.f32 %v8378_v49, %v5214_v52  ;;  %v5282_v59 = vmul.f32 %v5214_v52, %v8418_v5  ;;  %v5218_v63 = vmul.f32 %v5214_v52, %v8412_v4 }
 0x356   :  { %v5228_v6 = vrot.slane %v5209_v20, %v7808_v10  ;;  %v5283_v47 = vmul.f32 %v8410_v57, %v5214_v52  ;;  %v5219_v30 = vmul.f32 %v8405_v29, %v5214_v52  ;;  %v5284_v34 = vmul.f32 %v5214_v52, %v8442_v45 }
 0x357   :  { %v5220_v37 = vmul.f32 %v5214_v52, %v8436_v62  ;;  %v5285_v43 = vmul.f32 %v8434_v15, %v5214_v52  ;;  %v5221_v14 = vmul.f32 %v8428_v44, %v5214_v52  ;;  %v5222_v49 = vmul.f32 %v5214_v52, %v8461_v42 }
 0x358   :  { %v5288_v33 = vadd.f32 %v5280_v28, %v5228_v6  ;;  %v5230_v5 = vadd.f32 %v5228_v6, %v5216_v13  ;;  %v5289_v31 = vadd.f32 %v5281_v36, %v5228_v6  ;;  %v5231_v4 = vadd.f32 %v5228_v6, %v5217_v53 }
 0x359   :  { %v5290_v23 = vadd.f32 %v5282_v59, %v5228_v6  ;;  %v5232_v10 = vadd.f32 %v5228_v6, %v5218_v63  ;;  %v5291_v25 = vadd.f32 %v5283_v47, %v5228_v6  ;;  %v5233_v57 = vadd.f32 %v5228_v6, %v5219_v30 }
 0x35a   :  { %v5296_v54 = vmax.f32 %v5288_v33, 0.0  ;;  %v5238_v29 = vmax.f32 %v5230_v5, 0.0  ;;  %v5292_v45 = vadd.f32 %v5284_v34, %v5228_v6  ;;  %v5234_v62 = vadd.f32 %v5228_v6, %v5220_v37 }
 0x35b   :  { %v5293_v7 = vadd.f32 %v5285_v43, %v5228_v6  ;;  %v5235_v15 = vadd.f32 %v5228_v6, %v5221_v14  ;;  %v5294_v8 = vadd.f32 %v5286_v21, %v5228_v6  ;;  %v5236_v44 = vadd.f32 %v5228_v6, %v5222_v49 }
 0x35c   :  { %5304 = vxpose.xlu1.b32.start [1/8] (short) (narrow) %v5296_v54, 8  ;;  %5246 = vxpose.xlu0.b32.start [1/8] (short) (narrow) %v5238_v29, 8  ;;  %v5287_v42 = vmul.f32 %v8459_v11, %v5214_v52  ;;  %v5297_v12 = vmax.f32 %v5289_v31, 0.0  ;;  %v5239_v40 = vmax.f32 %v5231_v4, 0.0  ;;  %v5223_v56 = vmul.f32 %v8452_v26, %v5214_v52 }
 0x35d   :  { %v5298_v32 = vmax.f32 %v5290_v23, 0.0  ;;  %v5240_v61 = vmax.f32 %v5232_v10, 0.0  ;;  %v5299_v51 = vmax.f32 %v5291_v25, 0.0  ;;  %v5241_v48 = vmax.f32 %v5233_v57, 0.0 }
 0x35e   :  { %v5295_v55 = vadd.f32 %v5287_v42, %v5228_v6  ;;  %v5237_v46 = vadd.f32 %v5228_v6, %v5223_v56  ;;  %v5300_v17 = vmax.f32 %v5292_v45, 0.0  ;;  %v5242_v18 = vmax.f32 %v5234_v62, 0.0 }
 0x35f   :  { %v5301_v11 = vmax.f32 %v5293_v7, 0.0  ;;  %v5243_v0 = vmax.f32 %v5235_v15, 0.0  ;;  %v5302_v26 = vmax.f32 %v5294_v8, 0.0  ;;  %v5244_v50 = vmax.f32 %v5236_v44, 0.0 }
 0x360   :  { %5305 = vxpose.xlu1.b32.cont [2/8] (short) (narrow) %v5297_v12, 8  ;;  %5247 = vxpose.xlu0.b32.cont [2/8] (short) (narrow) %v5239_v40, 8  ;;  %v5303_v22 = vmax.f32 %v5295_v55, 0.0  ;;  %v5245_v60 = vmax.f32 %v5237_v46, 0.0 }
 0x364   :  { %5306 = vxpose.xlu1.b32.cont [3/8] (short) (narrow) %v5298_v32, 8  ;;  %5248 = vxpose.xlu0.b32.cont [3/8] (short) (narrow) %v5240_v61, 8 }
 0x368   :  { %5307 = vxpose.xlu1.b32.cont [4/8] (short) (narrow) %v5299_v51, 8  ;;  %5249 = vxpose.xlu0.b32.cont [4/8] (short) (narrow) %v5241_v48, 8 }
 0x36c   :  { %5308 = vxpose.xlu1.b32.cont [5/8] (short) (narrow) %v5300_v17, 8  ;;  %5250 = vxpose.xlu0.b32.cont [5/8] (short) (narrow) %v5242_v18, 8 }
 0x370   :  { %5309 = vxpose.xlu1.b32.cont [6/8] (short) (narrow) %v5301_v11, 8  ;;  %5251 = vxpose.xlu0.b32.cont [6/8] (short) (narrow) %v5243_v0, 8 }
 0x374   :  { %5310 = vxpose.xlu1.b32.cont [7/8] (short) (narrow) %v5302_v26, 8  ;;  %5252 = vxpose.xlu0.b32.cont [7/8] (short) (narrow) %v5244_v50, 8 }
 0x378   :  { %5311 = vxpose.xlu1.b32.end [8/8] (short) (narrow) %v5303_v22, 8  ;;  %5253 = vxpose.xlu0.b32.end [8/8] (short) (narrow) %v5245_v60, 8 }
 0x3dc   :  { %v5320_v9 = vpop.trf.xlu1  ;;  %v5262_v3 = vpop.trf.xlu0 }
 0x3dd   :  { %5688 = vst.msk [vmem:[%s8527_s7 + $0x8] sm:$0xff] %vm5278_vm7, %v5320_v9  ;;  %5279 = vst.msk [vmem:[%s8527_s7] sm:$0xff] %vm5278_vm7, %v5262_v3 }

</bundles_post_ra>
